<compile_context>
chip_gen: v7x
topology: tpu7x:2x2x1
jax: 0.10.0
libtpu: 0.0.40
codegen_flags: <defaults>
</compile_context>

<pallas_src>
import functools

import jax
import jax.numpy as jnp
import numpy as np
from jax.experimental import pallas as pl
from jax.experimental.pallas import tpu as pltpu


def _round_up(x, m):
    return (x + m - 1) // m * m


def _cdiv(a, b):
    return (a + b - 1) // b


def _leaky_relu(x, slope=0.2):
    # 1 mul + 1 max instead of cmp + mul + select.
    return jnp.maximum(x, slope * x)


def _default_group_size():
    # 256-wide MXU output tile (v6e/v7x) -> pack 4 neighbors (4*64 = 256);
    # 128-wide MXU (v2-v5) -> pack 2 (2*64 = 128).
    try:
        kind = jax.devices()[0].device_kind.lower()
    except Exception:
        return 4
    if any(tag in kind for tag in ("v2", "v3", "v4", "v5")):
        return 2
    return 4


# --------------------------------------------------------------------------
# Fused kernel: graph-feature -> conv1 + max_k -> conv2 -> conv3 -> conv4 -> sigmoid
# --------------------------------------------------------------------------
def _semantic_kernel(nbr_ref, xyz_ref, w1blk_ref, w1c_ref, b1_ref,
                     w2_ref, b2_ref, w3_ref, b3_ref, w4_ref, b4_ref,
                     out_ref, *, num_groups, group):
    ctr = xyz_ref[...]                                   # (3, tm) f32
    mm_dtype = w1blk_ref.dtype
    w1blk = w1blk_ref[...]                               # (g*64, g*6)

    # conv1 over k neighbors, `group` neighbors packed per MXU push via the
    # block-diagonal weight; running max over groups -> never materialises a
    # (64, k, tm) tensor.  Short static loop (k/group iterations).
    acc = None
    for gi in range(num_groups):
        pieces = []
        for u in range(group):
            nb = nbr_ref[gi * group + u]                 # (3, tm) f32, static slice
            d = nb - ctr                                 # graph feature in f32
            pieces.append(d * d)                         # channels [sq(diff), diff]
            pieces.append(d)
        feat = jnp.concatenate(pieces, axis=0).astype(mm_dtype)       # (g*6, tm)
        z = jnp.dot(w1blk, feat, preferred_element_type=jnp.float32)  # (g*64, tm)
        gmax = z[0:64]
        for u in range(1, group):
            gmax = jnp.maximum(gmax, z[u * 64:(u + 1) * 64])
        acc = gmax if acc is None else jnp.maximum(acc, gmax)

    # Neighbor-invariant center term w1[:, 6:9] @ ctr, hoisted out of the k
    # loop and computed on the VPU (MXU is the bottleneck).
    w1c = w1c_ref[...]                                   # (64, 3) f32
    ctr_term = (w1c[:, 0:1] * ctr[0:1, :]
                + w1c[:, 1:2] * ctr[1:2, :]
                + w1c[:, 2:3] * ctr[2:3, :])             # (64, tm) f32

    # LeakyReLU is monotone => max(LReLU(z_j + c)) == LReLU(max(z_j) + c).
    h1 = _leaky_relu(acc + ctr_term + b1_ref[...])       # (64, tm) f32
    # nn.Dropout(p=0.5) is identity in eval mode.

    h2 = _leaky_relu(
        jnp.dot(w2_ref[...], h1.astype(mm_dtype),
                preferred_element_type=jnp.float32) + b2_ref[...])    # (256, tm)
    h3 = _leaky_relu(
        jnp.dot(w3_ref[...], h2.astype(mm_dtype),
                preferred_element_type=jnp.float32) + b3_ref[...])    # (128, tm)

    # conv4 (128 -> 1): VPU multiply + sublane reduce -> lane-dense (1, tm) row.
    logit = jnp.sum(h3 * w4_ref[...], axis=0, keepdims=True) + b4_ref[...]
    out_ref[...] = jax.nn.sigmoid(logit)


def semantic_head(nbrs, xyz, params, *, tm=1024, group=None,
                  compute_dtype=jnp.bfloat16, min_grid=2):
    """nbrs: (k, 3, M) f32 neighbor xyz; xyz: (3, M) f32. Returns (M,) importance."""
    k, three, M = nbrs.shape
    assert three == 3 and xyz.shape == (3, M), (nbrs.shape, xyz.shape)
    if group is None:
        group = _default_group_size()
    group = max(1, min(group, k))

    w1, b1 = params["w1"], params["b1"]
    w2, b2 = params["w2"], params["b2"]
    w3, b3 = params["w3"], params["b3"]
    w4, b4 = params["w4"], params["b4"]

    # Split conv1: neighbor-dependent columns [sq(diff), diff] go to the MXU as a
    # block-diagonal weight packing `group` neighbors into the output dimension;
    # the center columns are applied on the VPU inside the kernel.
    w1_6 = w1[:, :6]
    w1_c = w1[:, 6:9]
    w1blk = jnp.kron(jnp.eye(group, dtype=w1.dtype), w1_6)   # (g*64, g*6)

    mm = jnp.dtype(compute_dtype)
    w1blk = w1blk.astype(mm)
    w2 = w2.astype(mm)
    w3 = w3.astype(mm)

    # Pad k to a multiple of the group size by repeating neighbor 0 (max-safe).
    k_pad = _round_up(k, group)
    if k_pad != k:
        nbrs = jnp.concatenate(
            [nbrs, jnp.broadcast_to(nbrs[:1], (k_pad - k,) + nbrs.shape[1:])],
            axis=0)

    # Near-equal 128-multiple tiles (minimises dead padded columns); keep at
    # least `min_grid` steps so both v7x TensorCores get work.
    m128 = _round_up(M, 128)
    n_tiles = max(_cdiv(m128, tm), 1)
    if m128 >= 2 * 128:
        n_tiles = max(n_tiles, min_grid)
    tm_eff = _round_up(_cdiv(m128, n_tiles), 128)
    n_tiles = _cdiv(m128, tm_eff)
    m_pad = n_tiles * tm_eff
    if m_pad != M:
        nbrs = jnp.pad(nbrs, ((0, 0), (0, 0), (0, m_pad - M)))
        xyz = jnp.pad(xyz, ((0, 0), (0, m_pad - M)))

    def cspec(a):
        shape = tuple(a.shape)
        zeros = (0,) * len(shape)
        return pl.BlockSpec(shape, lambda i, z=zeros: z)

    kernel = functools.partial(_semantic_kernel,
                               num_groups=k_pad // group, group=group)
    out = pl.pallas_call(
        kernel,
        out_shape=jax.ShapeDtypeStruct((1, m_pad), jnp.float32),
        grid=(n_tiles,),
        in_specs=[
            pl.BlockSpec((k_pad, 3, tm_eff), lambda i: (0, 0, i)),   # neighbors
            pl.BlockSpec((3, tm_eff), lambda i: (0, i)),             # center xyz
            cspec(w1blk), cspec(w1_c), cspec(b1),
            cspec(w2), cspec(b2),
            cspec(w3), cspec(b3),
            cspec(w4), cspec(b4),
        ],
        out_specs=pl.BlockSpec((1, tm_eff), lambda i: (0, i)),
        compiler_params=pltpu.CompilerParams(
            dimension_semantics=("parallel",),
            vmem_limit_bytes=32 * 1024 * 1024,   # ample: a few MiB/step at tm=1024
        ),
    )(nbrs, xyz, w1blk, w1_c, b1, w2, b2, w3, b3, w4, b4)
    return out[0, :M]


# --------------------------------------------------------------------------
# Forward pass (kNN/gather glue in plain JAX, everything else in the kernel)
# --------------------------------------------------------------------------
def semantic_module_forward(x, params, *, k=20, tm=1024,
                            compute_dtype=jnp.bfloat16, group=None):
    """x: (B, 3, N) points. Returns sigmoid importance (B, N) (eval mode)."""
    B, C, N = x.shape
    M = B * N

    # ---- kNN (self included, like knn_points) + neighbor gather ----
    # TODO(synk): the O(N^2) pairwise-distance kNN + top_k + gather are
    # index-generation glue with no clean Pallas equivalent here; they stay in
    # plain JAX/XLA and dominate wall-clock at large N (block/reuse if needed).
    xyz_bnc = jnp.transpose(x, (0, 2, 1))                            # (B, N, 3)
    d2 = jnp.sum((xyz_bnc[:, :, None, :] - xyz_bnc[:, None, :, :]) ** 2, axis=-1)
    _, idx = jax.lax.top_k(-d2, k)                                   # (B, N, k)

    x_flat = jnp.transpose(x, (1, 0, 2)).reshape(C, M)               # (3, M)
    idx_flat = (idx + (jnp.arange(B) * N)[:, None, None]).reshape(M, k)
    nbrs = jnp.transpose(x_flat[:, idx_flat], (2, 0, 1))             # (k, 3, M)

    # Neighbors/centres stay f32 in HBM; the kernel builds the graph feature in
    # f32 and casts only the matmul operands to compute_dtype.
    out = semantic_head(nbrs, x_flat, params, tm=tm, group=group,
                        compute_dtype=compute_dtype)
    return out.reshape(B, N)


# --------------------------------------------------------------------------
# Parameters: raw (PyTorch-style) params + eval-mode BN folding
# --------------------------------------------------------------------------
def init_raw_params(key):
    ks = jax.random.split(key, 16)

    def conv(kk, cout, cin, scale):
        return scale * jax.random.normal(kk, (cout, cin), jnp.float32)

    def bn(k0, k1, k2, k3, c):
        return dict(
            gamma=1.0 + 0.1 * jax.random.normal(k0, (c,), jnp.float32),
            beta=0.1 * jax.random.normal(k1, (c,), jnp.float32),
            mean=0.05 * jax.random.normal(k2, (c,), jnp.float32),
            var=1.0 + 0.1 * jnp.abs(jax.random.normal(k3, (c,), jnp.float32)),
        )

    return dict(
        w1=conv(ks[0], 64, 9, 0.2),   bn1=bn(ks[1], ks[2], ks[3], ks[4], 64),
        w2=conv(ks[5], 256, 64, 0.1), bn2=bn(ks[6], ks[7], ks[8], ks[9], 256),
        w3=conv(ks[10], 128, 256, 0.1), bn3=bn(ks[11], ks[12], ks[13], ks[14], 128),
        w4=conv(ks[15], 1, 128, 0.1), b4=jnp.full((1,), 0.05, jnp.float32),
    )


def fold_params(raw, eps=1e-5):
    """Fold eval-mode BatchNorm into conv weights/biases; kernel layout (cout, cin)."""
    def fold(w, bn):
        s = bn["gamma"] / jnp.sqrt(bn["var"] + eps)
        b = bn["beta"] - bn["mean"] * s
        return w * s[:, None], b[:, None]

    w1, b1 = fold(raw["w1"], raw["bn1"])
    w2, b2 = fold(raw["w2"], raw["bn2"])
    w3, b3 = fold(raw["w3"], raw["bn3"])
    return dict(w1=w1, b1=b1, w2=w2, b2=b2, w3=w3, b3=b3,
                w4=jnp.transpose(raw["w4"]),      # (128, 1) for the VPU reduce
                b4=raw["b4"].reshape(1, 1))


# --------------------------------------------------------------------------
# Pure-JAX reference (raw, unfolded params) for correctness checking
# --------------------------------------------------------------------------
def reference_forward(x, raw, *, k=20, eps=1e-5):
    B, C, N = x.shape
    hp = jax.lax.Precision.HIGHEST
    xyz = jnp.transpose(x, (0, 2, 1))                                # (B, N, 3)
    d2 = jnp.sum((xyz[:, :, None, :] - xyz[:, None, :, :]) ** 2, axis=-1)
    _, idx = jax.lax.top_k(-d2, k)
    nbr = jax.vmap(lambda pts, ids: pts[ids])(xyz, idx)              # (B, N, k, 3)
    center = xyz[:, :, None, :]
    diff = nbr - center
    feat = jnp.concatenate(
        [diff * diff, diff, jnp.broadcast_to(center, diff.shape)], axis=-1)

    def bn(y, p):
        return (y - p["mean"]) / jnp.sqrt(p["var"] + eps) * p["gamma"] + p["beta"]

    def lrelu(v):
        return jnp.where(v > 0, v, 0.2 * v)

    y = lrelu(bn(jnp.einsum("bnkc,dc->bnkd", feat, raw["w1"], precision=hp),
                 raw["bn1"]))
    y = jnp.max(y, axis=2)                                           # (B, N, 64)
    h = lrelu(bn(jnp.einsum("bnc,dc->bnd", y, raw["w2"], precision=hp),
                 raw["bn2"]))
    h = lrelu(bn(jnp.einsum("bnc,dc->bnd", h, raw["w3"], precision=hp),
                 raw["bn3"]))
    logit = jnp.einsum("bnc,dc->bnd", h, raw["w4"], precision=hp) + raw["b4"]
    return jax.nn.sigmoid(logit)[..., 0]


if __name__ == "__main__":
    key = jax.random.PRNGKey(0)
    k_x, k_p = jax.random.split(key)

    B, N, K = 2, 128, 20            # module default k=20, 3-D points
    x = jax.random.normal(k_x, (B, 3, N), jnp.float32)
    raw = init_raw_params(k_p)
    params = fold_params(raw)
    ref = reference_forward(x, raw, k=K)

    # f32 matmul path: tight check of the fused algorithm (hoisting, packing,
    # BN folding, max/LReLU reordering).
    fwd_f32 = jax.jit(functools.partial(
        semantic_module_forward, k=K, compute_dtype=jnp.float32))
    pred_f32 = fwd_f32(x, params)
    jax.block_until_ready(pred_f32)
    assert pred_f32.shape == (B, N), pred_f32.shape
    np.testing.assert_allclose(np.asarray(pred_f32), np.asarray(ref),
                               rtol=2e-3, atol=2e-3)

    # Default bf16-MXU path (f32 accumulation, f32 graph feature / epilogues).
    fwd = jax.jit(functools.partial(semantic_module_forward, k=K))
    pred = fwd(x, params)
    jax.block_until_ready(pred)
    assert pred.shape == (B, N), pred.shape
    np.testing.assert_allclose(np.asarray(pred), np.asarray(ref),
                               rtol=2e-2, atol=2e-2)
    print("KERNEL_OK")
</pallas_src>

<mosaic_0001>
module attributes {stable_mosaic.version = 11 : i64} {
  func.func @_semantic_kernel(%arg0: i32, %arg1: memref<20x3x128xf32, #tpu.memory_space<vmem>>, %arg2: memref<3x128xf32, #tpu.memory_space<vmem>>, %arg3: memref<256x24xf32, #tpu.memory_space<vmem>>, %arg4: memref<64x3xf32, #tpu.memory_space<vmem>>, %arg5: memref<64x1xf32, #tpu.memory_space<vmem>>, %arg6: memref<256x64xf32, #tpu.memory_space<vmem>>, %arg7: memref<256x1xf32, #tpu.memory_space<vmem>>, %arg8: memref<128x256xf32, #tpu.memory_space<vmem>>, %arg9: memref<128x1xf32, #tpu.memory_space<vmem>>, %arg10: memref<128x1xf32, #tpu.memory_space<vmem>>, %arg11: memref<1x1xf32, #tpu.memory_space<vmem>>, %arg12: memref<1x128xf32, #tpu.memory_space<vmem>>) attributes {dimension_semantics = [#tpu.dimension_semantics<parallel>], iteration_bounds = array<i64: 2>, scalar_prefetch = 0 : i64, scratch_operands = 0 : i64, tpu.core_type = #tpu.core_type<tc>, window_params = [{transform_indices = @transform_0, window_bounds = array<i64: 20, 3, 128>}, {transform_indices = @transform_1, window_bounds = array<i64: 3, 128>}, {pipeline_mode = #tpu.pipeline_mode<synchronous>, transform_indices = @transform_2, window_bounds = array<i64: 256, 24>}, {pipeline_mode = #tpu.pipeline_mode<synchronous>, transform_indices = @transform_3, window_bounds = array<i64: 64, 3>}, {pipeline_mode = #tpu.pipeline_mode<synchronous>, transform_indices = @transform_4, window_bounds = array<i64: 64, 1>}, {pipeline_mode = #tpu.pipeline_mode<synchronous>, transform_indices = @transform_5, window_bounds = array<i64: 256, 64>}, {pipeline_mode = #tpu.pipeline_mode<synchronous>, transform_indices = @transform_6, window_bounds = array<i64: 256, 1>}, {pipeline_mode = #tpu.pipeline_mode<synchronous>, transform_indices = @transform_7, window_bounds = array<i64: 128, 256>}, {pipeline_mode = #tpu.pipeline_mode<synchronous>, transform_indices = @transform_8, window_bounds = array<i64: 128, 1>}, {pipeline_mode = #tpu.pipeline_mode<synchronous>, transform_indices = @transform_9, window_bounds = array<i64: 128, 1>}, {pipeline_mode = #tpu.pipeline_mode<synchronous>, transform_indices = @transform_10, window_bounds = array<i64: 1, 1>}, {transform_indices = @transform_11, window_bounds = array<i64: 1, 128>}]} {
    %c0 = arith.constant 0 : index
    %c0_0 = arith.constant 0 : index
    %0 = vector.load %arg2[%c0, %c0_0] : memref<3x128xf32, #tpu.memory_space<vmem>>, vector<3x128xf32>
    %c0_1 = arith.constant 0 : index
    %c0_2 = arith.constant 0 : index
    %1 = vector.load %arg3[%c0_1, %c0_2] : memref<256x24xf32, #tpu.memory_space<vmem>>, vector<256x24xf32>
    %c0_3 = arith.constant 0 : index
    %c0_4 = arith.constant 0 : index
    %c0_5 = arith.constant 0 : index
    %2 = vector.load %arg1[%c0_3, %c0_4, %c0_5] : memref<20x3x128xf32, #tpu.memory_space<vmem>>, vector<1x3x128xf32>
    %3 = vector.shape_cast %2 : vector<1x3x128xf32> to vector<3x128xf32>
    %4 = arith.subf %3, %0 : vector<3x128xf32>
    %5 = arith.mulf %4, %4 : vector<3x128xf32>
    %c1 = arith.constant 1 : index
    %c0_6 = arith.constant 0 : index
    %c0_7 = arith.constant 0 : index
    %6 = vector.load %arg1[%c1, %c0_6, %c0_7] : memref<20x3x128xf32, #tpu.memory_space<vmem>>, vector<1x3x128xf32>
    %7 = vector.shape_cast %6 : vector<1x3x128xf32> to vector<3x128xf32>
    %8 = arith.subf %7, %0 : vector<3x128xf32>
    %9 = arith.mulf %8, %8 : vector<3x128xf32>
    %c2 = arith.constant 2 : index
    %c0_8 = arith.constant 0 : index
    %c0_9 = arith.constant 0 : index
    %10 = vector.load %arg1[%c2, %c0_8, %c0_9] : memref<20x3x128xf32, #tpu.memory_space<vmem>>, vector<1x3x128xf32>
    %11 = vector.shape_cast %10 : vector<1x3x128xf32> to vector<3x128xf32>
    %12 = arith.subf %11, %0 : vector<3x128xf32>
    %13 = arith.mulf %12, %12 : vector<3x128xf32>
    %c3 = arith.constant 3 : index
    %c0_10 = arith.constant 0 : index
    %c0_11 = arith.constant 0 : index
    %14 = vector.load %arg1[%c3, %c0_10, %c0_11] : memref<20x3x128xf32, #tpu.memory_space<vmem>>, vector<1x3x128xf32>
    %15 = vector.shape_cast %14 : vector<1x3x128xf32> to vector<3x128xf32>
    %16 = arith.subf %15, %0 : vector<3x128xf32>
    %17 = arith.mulf %16, %16 : vector<3x128xf32>
    %18 = tpu.concatenate %5, %4, %9, %8, %13, %12, %17, %16 in 0 : vector<3x128xf32>, vector<3x128xf32>, vector<3x128xf32>, vector<3x128xf32>, vector<3x128xf32>, vector<3x128xf32>, vector<3x128xf32>, vector<3x128xf32> -> vector<24x128xf32>
    %cst = arith.constant dense<0.000000e+00> : vector<256x128xf32>
    %19 = tpu.matmul %1, %18, %cst {dimension_numbers = #tpu.dot_dimension_numbers<[1], [0], [0], [1], [0, 0, 1, 1], [], []>} : vector<256x24xf32>, vector<24x128xf32>, vector<256x128xf32> -> vector<256x128xf32>
    %20 = vector.extract_strided_slice %19 {offsets = [0, 0], sizes = [64, 128], strides = [1, 1]} : vector<256x128xf32> to vector<64x128xf32>
    %21 = vector.extract_strided_slice %19 {offsets = [64, 0], sizes = [64, 128], strides = [1, 1]} : vector<256x128xf32> to vector<64x128xf32>
    %22 = arith.maximumf %20, %21 : vector<64x128xf32>
    %23 = vector.extract_strided_slice %19 {offsets = [128, 0], sizes = [64, 128], strides = [1, 1]} : vector<256x128xf32> to vector<64x128xf32>
    %24 = arith.maximumf %22, %23 : vector<64x128xf32>
    %25 = vector.extract_strided_slice %19 {offsets = [192, 0], sizes = [64, 128], strides = [1, 1]} : vector<256x128xf32> to vector<64x128xf32>
    %26 = arith.maximumf %24, %25 : vector<64x128xf32>
    %c4 = arith.constant 4 : index
    %c0_12 = arith.constant 0 : index
    %c0_13 = arith.constant 0 : index
    %27 = vector.load %arg1[%c4, %c0_12, %c0_13] : memref<20x3x128xf32, #tpu.memory_space<vmem>>, vector<1x3x128xf32>
    %28 = vector.shape_cast %27 : vector<1x3x128xf32> to vector<3x128xf32>
    %29 = arith.subf %28, %0 : vector<3x128xf32>
    %30 = arith.mulf %29, %29 : vector<3x128xf32>
    %c5 = arith.constant 5 : index
    %c0_14 = arith.constant 0 : index
    %c0_15 = arith.constant 0 : index
    %31 = vector.load %arg1[%c5, %c0_14, %c0_15] : memref<20x3x128xf32, #tpu.memory_space<vmem>>, vector<1x3x128xf32>
    %32 = vector.shape_cast %31 : vector<1x3x128xf32> to vector<3x128xf32>
    %33 = arith.subf %32, %0 : vector<3x128xf32>
    %34 = arith.mulf %33, %33 : vector<3x128xf32>
    %c6 = arith.constant 6 : index
    %c0_16 = arith.constant 0 : index
    %c0_17 = arith.constant 0 : index
    %35 = vector.load %arg1[%c6, %c0_16, %c0_17] : memref<20x3x128xf32, #tpu.memory_space<vmem>>, vector<1x3x128xf32>
    %36 = vector.shape_cast %35 : vector<1x3x128xf32> to vector<3x128xf32>
    %37 = arith.subf %36, %0 : vector<3x128xf32>
    %38 = arith.mulf %37, %37 : vector<3x128xf32>
    %c7 = arith.constant 7 : index
    %c0_18 = arith.constant 0 : index
    %c0_19 = arith.constant 0 : index
    %39 = vector.load %arg1[%c7, %c0_18, %c0_19] : memref<20x3x128xf32, #tpu.memory_space<vmem>>, vector<1x3x128xf32>
    %40 = vector.shape_cast %39 : vector<1x3x128xf32> to vector<3x128xf32>
    %41 = arith.subf %40, %0 : vector<3x128xf32>
    %42 = arith.mulf %41, %41 : vector<3x128xf32>
    %43 = tpu.concatenate %30, %29, %34, %33, %38, %37, %42, %41 in 0 : vector<3x128xf32>, vector<3x128xf32>, vector<3x128xf32>, vector<3x128xf32>, vector<3x128xf32>, vector<3x128xf32>, vector<3x128xf32>, vector<3x128xf32> -> vector<24x128xf32>
    %cst_20 = arith.constant dense<0.000000e+00> : vector<256x128xf32>
    %44 = tpu.matmul %1, %43, %cst_20 {dimension_numbers = #tpu.dot_dimension_numbers<[1], [0], [0], [1], [0, 0, 1, 1], [], []>} : vector<256x24xf32>, vector<24x128xf32>, vector<256x128xf32> -> vector<256x128xf32>
    %45 = vector.extract_strided_slice %44 {offsets = [0, 0], sizes = [64, 128], strides = [1, 1]} : vector<256x128xf32> to vector<64x128xf32>
    %46 = vector.extract_strided_slice %44 {offsets = [64, 0], sizes = [64, 128], strides = [1, 1]} : vector<256x128xf32> to vector<64x128xf32>
    %47 = arith.maximumf %45, %46 : vector<64x128xf32>
    %48 = vector.extract_strided_slice %44 {offsets = [128, 0], sizes = [64, 128], strides = [1, 1]} : vector<256x128xf32> to vector<64x128xf32>
    %49 = arith.maximumf %47, %48 : vector<64x128xf32>
    %50 = vector.extract_strided_slice %44 {offsets = [192, 0], sizes = [64, 128], strides = [1, 1]} : vector<256x128xf32> to vector<64x128xf32>
    %51 = arith.maximumf %49, %50 : vector<64x128xf32>
    %52 = arith.maximumf %26, %51 : vector<64x128xf32>
    %c8 = arith.constant 8 : index
    %c0_21 = arith.constant 0 : index
    %c0_22 = arith.constant 0 : index
    %53 = vector.load %arg1[%c8, %c0_21, %c0_22] : memref<20x3x128xf32, #tpu.memory_space<vmem>>, vector<1x3x128xf32>
    %54 = vector.shape_cast %53 : vector<1x3x128xf32> to vector<3x128xf32>
    %55 = arith.subf %54, %0 : vector<3x128xf32>
    %56 = arith.mulf %55, %55 : vector<3x128xf32>
    %c9 = arith.constant 9 : index
    %c0_23 = arith.constant 0 : index
    %c0_24 = arith.constant 0 : index
    %57 = vector.load %arg1[%c9, %c0_23, %c0_24] : memref<20x3x128xf32, #tpu.memory_space<vmem>>, vector<1x3x128xf32>
    %58 = vector.shape_cast %57 : vector<1x3x128xf32> to vector<3x128xf32>
    %59 = arith.subf %58, %0 : vector<3x128xf32>
    %60 = arith.mulf %59, %59 : vector<3x128xf32>
    %c10 = arith.constant 10 : index
    %c0_25 = arith.constant 0 : index
    %c0_26 = arith.constant 0 : index
    %61 = vector.load %arg1[%c10, %c0_25, %c0_26] : memref<20x3x128xf32, #tpu.memory_space<vmem>>, vector<1x3x128xf32>
    %62 = vector.shape_cast %61 : vector<1x3x128xf32> to vector<3x128xf32>
    %63 = arith.subf %62, %0 : vector<3x128xf32>
    %64 = arith.mulf %63, %63 : vector<3x128xf32>
    %c11 = arith.constant 11 : index
    %c0_27 = arith.constant 0 : index
    %c0_28 = arith.constant 0 : index
    %65 = vector.load %arg1[%c11, %c0_27, %c0_28] : memref<20x3x128xf32, #tpu.memory_space<vmem>>, vector<1x3x128xf32>
    %66 = vector.shape_cast %65 : vector<1x3x128xf32> to vector<3x128xf32>
    %67 = arith.subf %66, %0 : vector<3x128xf32>
    %68 = arith.mulf %67, %67 : vector<3x128xf32>
    %69 = tpu.concatenate %56, %55, %60, %59, %64, %63, %68, %67 in 0 : vector<3x128xf32>, vector<3x128xf32>, vector<3x128xf32>, vector<3x128xf32>, vector<3x128xf32>, vector<3x128xf32>, vector<3x128xf32>, vector<3x128xf32> -> vector<24x128xf32>
    %cst_29 = arith.constant dense<0.000000e+00> : vector<256x128xf32>
    %70 = tpu.matmul %1, %69, %cst_29 {dimension_numbers = #tpu.dot_dimension_numbers<[1], [0], [0], [1], [0, 0, 1, 1], [], []>} : vector<256x24xf32>, vector<24x128xf32>, vector<256x128xf32> -> vector<256x128xf32>
    %71 = vector.extract_strided_slice %70 {offsets = [0, 0], sizes = [64, 128], strides = [1, 1]} : vector<256x128xf32> to vector<64x128xf32>
    %72 = vector.extract_strided_slice %70 {offsets = [64, 0], sizes = [64, 128], strides = [1, 1]} : vector<256x128xf32> to vector<64x128xf32>
    %73 = arith.maximumf %71, %72 : vector<64x128xf32>
    %74 = vector.extract_strided_slice %70 {offsets = [128, 0], sizes = [64, 128], strides = [1, 1]} : vector<256x128xf32> to vector<64x128xf32>
    %75 = arith.maximumf %73, %74 : vector<64x128xf32>
    %76 = vector.extract_strided_slice %70 {offsets = [192, 0], sizes = [64, 128], strides = [1, 1]} : vector<256x128xf32> to vector<64x128xf32>
    %77 = arith.maximumf %75, %76 : vector<64x128xf32>
    %78 = arith.maximumf %52, %77 : vector<64x128xf32>
    %c12 = arith.constant 12 : index
    %c0_30 = arith.constant 0 : index
    %c0_31 = arith.constant 0 : index
    %79 = vector.load %arg1[%c12, %c0_30, %c0_31] : memref<20x3x128xf32, #tpu.memory_space<vmem>>, vector<1x3x128xf32>
    %80 = vector.shape_cast %79 : vector<1x3x128xf32> to vector<3x128xf32>
    %81 = arith.subf %80, %0 : vector<3x128xf32>
    %82 = arith.mulf %81, %81 : vector<3x128xf32>
    %c13 = arith.constant 13 : index
    %c0_32 = arith.constant 0 : index
    %c0_33 = arith.constant 0 : index
    %83 = vector.load %arg1[%c13, %c0_32, %c0_33] : memref<20x3x128xf32, #tpu.memory_space<vmem>>, vector<1x3x128xf32>
    %84 = vector.shape_cast %83 : vector<1x3x128xf32> to vector<3x128xf32>
    %85 = arith.subf %84, %0 : vector<3x128xf32>
    %86 = arith.mulf %85, %85 : vector<3x128xf32>
    %c14 = arith.constant 14 : index
    %c0_34 = arith.constant 0 : index
    %c0_35 = arith.constant 0 : index
    %87 = vector.load %arg1[%c14, %c0_34, %c0_35] : memref<20x3x128xf32, #tpu.memory_space<vmem>>, vector<1x3x128xf32>
    %88 = vector.shape_cast %87 : vector<1x3x128xf32> to vector<3x128xf32>
    %89 = arith.subf %88, %0 : vector<3x128xf32>
    %90 = arith.mulf %89, %89 : vector<3x128xf32>
    %c15 = arith.constant 15 : index
    %c0_36 = arith.constant 0 : index
    %c0_37 = arith.constant 0 : index
    %91 = vector.load %arg1[%c15, %c0_36, %c0_37] : memref<20x3x128xf32, #tpu.memory_space<vmem>>, vector<1x3x128xf32>
    %92 = vector.shape_cast %91 : vector<1x3x128xf32> to vector<3x128xf32>
    %93 = arith.subf %92, %0 : vector<3x128xf32>
    %94 = arith.mulf %93, %93 : vector<3x128xf32>
    %95 = tpu.concatenate %82, %81, %86, %85, %90, %89, %94, %93 in 0 : vector<3x128xf32>, vector<3x128xf32>, vector<3x128xf32>, vector<3x128xf32>, vector<3x128xf32>, vector<3x128xf32>, vector<3x128xf32>, vector<3x128xf32> -> vector<24x128xf32>
    %cst_38 = arith.constant dense<0.000000e+00> : vector<256x128xf32>
    %96 = tpu.matmul %1, %95, %cst_38 {dimension_numbers = #tpu.dot_dimension_numbers<[1], [0], [0], [1], [0, 0, 1, 1], [], []>} : vector<256x24xf32>, vector<24x128xf32>, vector<256x128xf32> -> vector<256x128xf32>
    %97 = vector.extract_strided_slice %96 {offsets = [0, 0], sizes = [64, 128], strides = [1, 1]} : vector<256x128xf32> to vector<64x128xf32>
    %98 = vector.extract_strided_slice %96 {offsets = [64, 0], sizes = [64, 128], strides = [1, 1]} : vector<256x128xf32> to vector<64x128xf32>
    %99 = arith.maximumf %97, %98 : vector<64x128xf32>
    %100 = vector.extract_strided_slice %96 {offsets = [128, 0], sizes = [64, 128], strides = [1, 1]} : vector<256x128xf32> to vector<64x128xf32>
    %101 = arith.maximumf %99, %100 : vector<64x128xf32>
    %102 = vector.extract_strided_slice %96 {offsets = [192, 0], sizes = [64, 128], strides = [1, 1]} : vector<256x128xf32> to vector<64x128xf32>
    %103 = arith.maximumf %101, %102 : vector<64x128xf32>
    %104 = arith.maximumf %78, %103 : vector<64x128xf32>
    %c16 = arith.constant 16 : index
    %c0_39 = arith.constant 0 : index
    %c0_40 = arith.constant 0 : index
    %105 = vector.load %arg1[%c16, %c0_39, %c0_40] : memref<20x3x128xf32, #tpu.memory_space<vmem>>, vector<1x3x128xf32>
    %106 = vector.shape_cast %105 : vector<1x3x128xf32> to vector<3x128xf32>
    %107 = arith.subf %106, %0 : vector<3x128xf32>
    %108 = arith.mulf %107, %107 : vector<3x128xf32>
    %c17 = arith.constant 17 : index
    %c0_41 = arith.constant 0 : index
    %c0_42 = arith.constant 0 : index
    %109 = vector.load %arg1[%c17, %c0_41, %c0_42] : memref<20x3x128xf32, #tpu.memory_space<vmem>>, vector<1x3x128xf32>
    %110 = vector.shape_cast %109 : vector<1x3x128xf32> to vector<3x128xf32>
    %111 = arith.subf %110, %0 : vector<3x128xf32>
    %112 = arith.mulf %111, %111 : vector<3x128xf32>
    %c18 = arith.constant 18 : index
    %c0_43 = arith.constant 0 : index
    %c0_44 = arith.constant 0 : index
    %113 = vector.load %arg1[%c18, %c0_43, %c0_44] : memref<20x3x128xf32, #tpu.memory_space<vmem>>, vector<1x3x128xf32>
    %114 = vector.shape_cast %113 : vector<1x3x128xf32> to vector<3x128xf32>
    %115 = arith.subf %114, %0 : vector<3x128xf32>
    %116 = arith.mulf %115, %115 : vector<3x128xf32>
    %c19 = arith.constant 19 : index
    %c0_45 = arith.constant 0 : index
    %c0_46 = arith.constant 0 : index
    %117 = vector.load %arg1[%c19, %c0_45, %c0_46] : memref<20x3x128xf32, #tpu.memory_space<vmem>>, vector<1x3x128xf32>
    %118 = vector.shape_cast %117 : vector<1x3x128xf32> to vector<3x128xf32>
    %119 = arith.subf %118, %0 : vector<3x128xf32>
    %120 = arith.mulf %119, %119 : vector<3x128xf32>
    %121 = tpu.concatenate %108, %107, %112, %111, %116, %115, %120, %119 in 0 : vector<3x128xf32>, vector<3x128xf32>, vector<3x128xf32>, vector<3x128xf32>, vector<3x128xf32>, vector<3x128xf32>, vector<3x128xf32>, vector<3x128xf32> -> vector<24x128xf32>
    %cst_47 = arith.constant dense<0.000000e+00> : vector<256x128xf32>
    %122 = tpu.matmul %1, %121, %cst_47 {dimension_numbers = #tpu.dot_dimension_numbers<[1], [0], [0], [1], [0, 0, 1, 1], [], []>} : vector<256x24xf32>, vector<24x128xf32>, vector<256x128xf32> -> vector<256x128xf32>
    %123 = vector.extract_strided_slice %122 {offsets = [0, 0], sizes = [64, 128], strides = [1, 1]} : vector<256x128xf32> to vector<64x128xf32>
    %124 = vector.extract_strided_slice %122 {offsets = [64, 0], sizes = [64, 128], strides = [1, 1]} : vector<256x128xf32> to vector<64x128xf32>
    %125 = arith.maximumf %123, %124 : vector<64x128xf32>
    %126 = vector.extract_strided_slice %122 {offsets = [128, 0], sizes = [64, 128], strides = [1, 1]} : vector<256x128xf32> to vector<64x128xf32>
    %127 = arith.maximumf %125, %126 : vector<64x128xf32>
    %128 = vector.extract_strided_slice %122 {offsets = [192, 0], sizes = [64, 128], strides = [1, 1]} : vector<256x128xf32> to vector<64x128xf32>
    %129 = arith.maximumf %127, %128 : vector<64x128xf32>
    %130 = arith.maximumf %104, %129 : vector<64x128xf32>
    %c0_48 = arith.constant 0 : index
    %c0_49 = arith.constant 0 : index
    %131 = vector.load %arg4[%c0_48, %c0_49] : memref<64x3xf32, #tpu.memory_space<vmem>>, vector<64x3xf32>
    %132 = vector.extract_strided_slice %131 {offsets = [0, 0], sizes = [64, 1], strides = [1, 1]} : vector<64x3xf32> to vector<64x1xf32>
    %133 = vector.extract_strided_slice %0 {offsets = [0, 0], sizes = [1, 128], strides = [1, 1]} : vector<3x128xf32> to vector<1x128xf32>
    %134 = vector.broadcast %132 : vector<64x1xf32> to vector<64x128xf32>
    %135 = vector.broadcast %133 : vector<1x128xf32> to vector<64x128xf32>
    %136 = arith.mulf %134, %135 : vector<64x128xf32>
    %137 = vector.extract_strided_slice %131 {offsets = [0, 1], sizes = [64, 1], strides = [1, 1]} : vector<64x3xf32> to vector<64x1xf32>
    %138 = vector.extract_strided_slice %0 {offsets = [1, 0], sizes = [1, 128], strides = [1, 1]} : vector<3x128xf32> to vector<1x128xf32>
    %139 = vector.broadcast %137 : vector<64x1xf32> to vector<64x128xf32>
    %140 = vector.broadcast %138 : vector<1x128xf32> to vector<64x128xf32>
    %141 = arith.mulf %139, %140 : vector<64x128xf32>
    %142 = arith.addf %136, %141 : vector<64x128xf32>
    %143 = vector.extract_strided_slice %131 {offsets = [0, 2], sizes = [64, 1], strides = [1, 1]} : vector<64x3xf32> to vector<64x1xf32>
    %144 = vector.extract_strided_slice %0 {offsets = [2, 0], sizes = [1, 128], strides = [1, 1]} : vector<3x128xf32> to vector<1x128xf32>
    %145 = vector.broadcast %143 : vector<64x1xf32> to vector<64x128xf32>
    %146 = vector.broadcast %144 : vector<1x128xf32> to vector<64x128xf32>
    %147 = arith.mulf %145, %146 : vector<64x128xf32>
    %148 = arith.addf %142, %147 : vector<64x128xf32>
    %149 = arith.addf %130, %148 : vector<64x128xf32>
    %c0_50 = arith.constant 0 : index
    %c0_51 = arith.constant 0 : index
    %150 = vector.load %arg5[%c0_50, %c0_51] : memref<64x1xf32, #tpu.memory_space<vmem>>, vector<64x1xf32>
    %151 = vector.broadcast %150 : vector<64x1xf32> to vector<64x128xf32>
    %152 = arith.addf %149, %151 : vector<64x128xf32>
    %cst_52 = arith.constant 2.000000e-01 : f32
    %153 = vector.broadcast %cst_52 : f32 to vector<64x128xf32>
    %154 = arith.mulf %153, %152 : vector<64x128xf32>
    %155 = arith.maximumf %152, %154 : vector<64x128xf32>
    %c0_53 = arith.constant 0 : index
    %c0_54 = arith.constant 0 : index
    %156 = vector.load %arg6[%c0_53, %c0_54] : memref<256x64xf32, #tpu.memory_space<vmem>>, vector<256x64xf32>
    %cst_55 = arith.constant dense<0.000000e+00> : vector<256x128xf32>
    %157 = tpu.matmul %156, %155, %cst_55 {dimension_numbers = #tpu.dot_dimension_numbers<[1], [0], [0], [1], [0, 0, 1, 1], [], []>} : vector<256x64xf32>, vector<64x128xf32>, vector<256x128xf32> -> vector<256x128xf32>
    %c0_56 = arith.constant 0 : index
    %c0_57 = arith.constant 0 : index
    %158 = vector.load %arg7[%c0_56, %c0_57] : memref<256x1xf32, #tpu.memory_space<vmem>>, vector<256x1xf32>
    %159 = vector.broadcast %158 : vector<256x1xf32> to vector<256x128xf32>
    %160 = arith.addf %157, %159 : vector<256x128xf32>
    %cst_58 = arith.constant 2.000000e-01 : f32
    %161 = vector.broadcast %cst_58 : f32 to vector<256x128xf32>
    %162 = arith.mulf %161, %160 : vector<256x128xf32>
    %163 = arith.maximumf %160, %162 : vector<256x128xf32>
    %c0_59 = arith.constant 0 : index
    %c0_60 = arith.constant 0 : index
    %164 = vector.load %arg8[%c0_59, %c0_60] : memref<128x256xf32, #tpu.memory_space<vmem>>, vector<128x256xf32>
    %cst_61 = arith.constant dense<0.000000e+00> : vector<128x128xf32>
    %165 = tpu.matmul %164, %163, %cst_61 {dimension_numbers = #tpu.dot_dimension_numbers<[1], [0], [0], [1], [0, 0, 1, 1], [], []>} : vector<128x256xf32>, vector<256x128xf32>, vector<128x128xf32> -> vector<128x128xf32>
    %c0_62 = arith.constant 0 : index
    %c0_63 = arith.constant 0 : index
    %166 = vector.load %arg9[%c0_62, %c0_63] : memref<128x1xf32, #tpu.memory_space<vmem>>, vector<128x1xf32>
    %167 = vector.broadcast %166 : vector<128x1xf32> to vector<128x128xf32>
    %168 = arith.addf %165, %167 : vector<128x128xf32>
    %cst_64 = arith.constant 2.000000e-01 : f32
    %169 = vector.broadcast %cst_64 : f32 to vector<128x128xf32>
    %170 = arith.mulf %169, %168 : vector<128x128xf32>
    %171 = arith.maximumf %168, %170 : vector<128x128xf32>
    %c0_65 = arith.constant 0 : index
    %c0_66 = arith.constant 0 : index
    %172 = vector.load %arg10[%c0_65, %c0_66] : memref<128x1xf32, #tpu.memory_space<vmem>>, vector<128x1xf32>
    %173 = vector.broadcast %172 : vector<128x1xf32> to vector<128x128xf32>
    %174 = arith.mulf %171, %173 : vector<128x128xf32>
    %cst_67 = arith.constant dense<0.000000e+00> : vector<128xf32>
    %175 = vector.multi_reduction <add>, %174, %cst_67 [0] : vector<128x128xf32> to vector<128xf32>
    %176 = vector.shape_cast %175 : vector<128xf32> to vector<1x128xf32>
    %c0_68 = arith.constant 0 : index
    %c0_69 = arith.constant 0 : index
    %177 = vector.load %arg11[%c0_68, %c0_69] : memref<1x1xf32, #tpu.memory_space<vmem>>, vector<1x1xf32>
    %178 = vector.broadcast %177 : vector<1x1xf32> to vector<1x128xf32>
    %179 = arith.addf %176, %178 : vector<1x128xf32>
    %180 = arith.negf %179 : vector<1x128xf32>
    %181 = math.exp %180 : vector<1x128xf32>
    %cst_70 = arith.constant 1.000000e+00 : f32
    %182 = vector.broadcast %cst_70 : f32 to vector<1x128xf32>
    %183 = arith.addf %182, %181 : vector<1x128xf32>
    %184 = arith.divf %182, %183 : vector<1x128xf32>
    %c0_71 = arith.constant 0 : index
    %c0_72 = arith.constant 0 : index
    %185 = vector.load %arg12[%c0_71, %c0_72] : memref<1x128xf32, #tpu.memory_space<vmem>>, vector<1x128xf32>
    tpu.vector_store %arg12[%c0_71, %c0_72], %184 {strides = array<i32>} : memref<1x128xf32, #tpu.memory_space<vmem>>, vector<1x128xf32>,
    return
  }
  func.func @transform_0(%arg0: i32) -> (i32, i32, i32) {
    %c0_i32 = arith.constant 0 : i32
    %c0_i32_0 = arith.constant 0 : i32
    %c0_i32_1 = arith.constant 0 : i32
    return %c0_i32, %c0_i32_0, %arg0 : i32, i32, i32
  }
  func.func @transform_1(%arg0: i32) -> (i32, i32) {
    %c0_i32 = arith.constant 0 : i32
    %c0_i32_0 = arith.constant 0 : i32
    return %c0_i32, %arg0 : i32, i32
  }
  func.func @transform_2(%arg0: i32) -> (i32, i32) {
    %c0_i32 = arith.constant 0 : i32
    %c0_i32_0 = arith.constant 0 : i32
    %c0_i32_1 = arith.constant 0 : i32
    return %c0_i32, %c0_i32_0 : i32, i32
  }
  func.func @transform_3(%arg0: i32) -> (i32, i32) {
    %c0_i32 = arith.constant 0 : i32
    %c0_i32_0 = arith.constant 0 : i32
    %c0_i32_1 = arith.constant 0 : i32
    return %c0_i32, %c0_i32_0 : i32, i32
  }
  func.func @transform_4(%arg0: i32) -> (i32, i32) {
    %c0_i32 = arith.constant 0 : i32
    %c0_i32_0 = arith.constant 0 : i32
    %c0_i32_1 = arith.constant 0 : i32
    return %c0_i32, %c0_i32_0 : i32, i32
  }
  func.func @transform_5(%arg0: i32) -> (i32, i32) {
    %c0_i32 = arith.constant 0 : i32
    %c0_i32_0 = arith.constant 0 : i32
    %c0_i32_1 = arith.constant 0 : i32
    return %c0_i32, %c0_i32_0 : i32, i32
  }
  func.func @transform_6(%arg0: i32) -> (i32, i32) {
    %c0_i32 = arith.constant 0 : i32
    %c0_i32_0 = arith.constant 0 : i32
    %c0_i32_1 = arith.constant 0 : i32
    return %c0_i32, %c0_i32_0 : i32, i32
  }
  func.func @transform_7(%arg0: i32) -> (i32, i32) {
    %c0_i32 = arith.constant 0 : i32
    %c0_i32_0 = arith.constant 0 : i32
    %c0_i32_1 = arith.constant 0 : i32
    return %c0_i32, %c0_i32_0 : i32, i32
  }
  func.func @transform_8(%arg0: i32) -> (i32, i32) {
    %c0_i32 = arith.constant 0 : i32
    %c0_i32_0 = arith.constant 0 : i32
    %c0_i32_1 = arith.constant 0 : i32
    return %c0_i32, %c0_i32_0 : i32, i32
  }
  func.func @transform_9(%arg0: i32) -> (i32, i32) {
    %c0_i32 = arith.constant 0 : i32
    %c0_i32_0 = arith.constant 0 : i32
    %c0_i32_1 = arith.constant 0 : i32
    return %c0_i32, %c0_i32_0 : i32, i32
  }
  func.func @transform_10(%arg0: i32) -> (i32, i32) {
    %c0_i32 = arith.constant 0 : i32
    %c0_i32_0 = arith.constant 0 : i32
    %c0_i32_1 = arith.constant 0 : i32
    return %c0_i32, %c0_i32_0 : i32, i32
  }
  func.func @transform_11(%arg0: i32) -> (i32, i32) {
    %c0_i32 = arith.constant 0 : i32
    %c0_i32_0 = arith.constant 0 : i32
    return %c0_i32, %arg0 : i32, i32
  }
}

</mosaic_0001>

<bundles_post_ra>
// kernel: neg.1
= control target key start
LH: loop header
LB: loop body
LE: loop exit
PB: predicated region body
PF: predicated region fallthrough
CT: control target
= control target key end

     0   :  { %s520_s0 = inlined_call_operand.vmem [shape: f32[2,128,128], index: 0, kind: input, shape index: {}]   ;;  %s521_s1 = inlined_call_operand.vmem [shape: f32[2,128,128], index: 1, kind: output, shape index: {}]  }
   0x1   :  { %v2_v0 = vld [vmem:[%s520_s0] sm:$0xff]  ;;  %v258_v2 = vld [vmem:[%s520_s0 + $0x8] sm:$0xff]  ;;  %v262_v7 = vld [vmem:[%s520_s0 + $0x10] sm:$0xff] }
   0x2   :  { %v256_v1 = vld [vmem:[%s520_s0 + $0x80] sm:$0xff]  ;;  %v5_v3 = vxor.u32 2147483648, %v2_v0  ;;  %v20_v5 = vxor.u32 2147483648, %v258_v2  ;;  %v260_v6 = vld [vmem:[%s520_s0 + $0x88] sm:$0xff]  ;;  %v264_v8 = vld [vmem:[%s520_s0 + $0x90] sm:$0xff]  ;;  %v36_v10 = vxor.u32 2147483648, %v262_v7 }
   0x3   :  { %v12_v4 = vxor.u32 2147483648, %v256_v1  ;;  %v28_v9 = vxor.u32 2147483648, %v260_v6  ;;  %v44_v11 = vxor.u32 2147483648, %v264_v8  ;;  %v266_v12 = vld [vmem:[%s520_s0 + $0x18] sm:$0xff]  ;;  %v270_v14 = vld [vmem:[%s520_s0 + $0x20] sm:$0xff]  ;;  %v274_v19 = vld [vmem:[%s520_s0 + $0x28] sm:$0xff] }
   0x4   :  { %v268_v13 = vld [vmem:[%s520_s0 + $0x98] sm:$0xff]  ;;  %7 = vst [vmem:[%s521_s1] sm:$0xff] %v5_v3  ;;  %259 = vst [vmem:[%s521_s1 + $0x8] sm:$0xff] %v20_v5  ;;  %v52_v15 = vxor.u32 2147483648, %v266_v12  ;;  %v68_v17 = vxor.u32 2147483648, %v270_v14  ;;  %v272_v18 = vld [vmem:[%s520_s0 + $0xa0] sm:$0xff]  ;;  %v84_v22 = vxor.u32 2147483648, %v274_v19 }
   0x5   :  { %257 = vst [vmem:[%s521_s1 + $0x80] sm:$0xff] %v12_v4  ;;  %v60_v16 = vxor.u32 2147483648, %v268_v13  ;;  %v276_v20 = vld [vmem:[%s520_s0 + $0xa8] sm:$0xff]  ;;  %261 = vst [vmem:[%s521_s1 + $0x88] sm:$0xff] %v28_v9  ;;  %v76_v21 = vxor.u32 2147483648, %v272_v18  ;;  %v278_v24 = vld [vmem:[%s520_s0 + $0x30] sm:$0xff] }
   0x6   :  { %263 = vst [vmem:[%s521_s1 + $0x10] sm:$0xff] %v36_v10  ;;  %265 = vst [vmem:[%s521_s1 + $0x90] sm:$0xff] %v44_v11  ;;  %v92_v23 = vxor.u32 2147483648, %v276_v20  ;;  %v280_v25 = vld [vmem:[%s520_s0 + $0xb0] sm:$0xff]  ;;  %v282_v26 = vld [vmem:[%s520_s0 + $0x38] sm:$0xff]  ;;  %v100_v27 = vxor.u32 2147483648, %v278_v24 }
   0x7   :  { %267 = vst [vmem:[%s521_s1 + $0x18] sm:$0xff] %v52_v15  ;;  %269 = vst [vmem:[%s521_s1 + $0x98] sm:$0xff] %v60_v16  ;;  %v108_v28 = vxor.u32 2147483648, %v280_v25  ;;  %v116_v29 = vxor.u32 2147483648, %v282_v26  ;;  %v284_v30 = vld [vmem:[%s520_s0 + $0xb8] sm:$0xff]  ;;  %v286_v31 = vld [vmem:[%s520_s0 + $0x40] sm:$0xff] }
   0x8   :  { %271 = vst [vmem:[%s521_s1 + $0x20] sm:$0xff] %v68_v17  ;;  %v288_v32 = vld [vmem:[%s520_s0 + $0xc0] sm:$0xff]  ;;  %273 = vst [vmem:[%s521_s1 + $0xa0] sm:$0xff] %v76_v21  ;;  %v124_v33 = vxor.u32 2147483648, %v284_v30  ;;  %v132_v34 = vxor.u32 2147483648, %v286_v31  ;;  %v290_v36 = vld [vmem:[%s520_s0 + $0x48] sm:$0xff] }
   0x9   :  { %275 = vst [vmem:[%s521_s1 + $0x28] sm:$0xff] %v84_v22  ;;  %277 = vst [vmem:[%s521_s1 + $0xa8] sm:$0xff] %v92_v23  ;;  %v140_v35 = vxor.u32 2147483648, %v288_v32  ;;  %v292_v37 = vld [vmem:[%s520_s0 + $0xc8] sm:$0xff]  ;;  %v294_v38 = vld [vmem:[%s520_s0 + $0x50] sm:$0xff]  ;;  %v148_v39 = vxor.u32 2147483648, %v290_v36 }
   0xa   :  { %279 = vst [vmem:[%s521_s1 + $0x30] sm:$0xff] %v100_v27  ;;  %281 = vst [vmem:[%s521_s1 + $0xb0] sm:$0xff] %v108_v28  ;;  %v156_v40 = vxor.u32 2147483648, %v292_v37  ;;  %v164_v41 = vxor.u32 2147483648, %v294_v38  ;;  %v296_v42 = vld [vmem:[%s520_s0 + $0xd0] sm:$0xff]  ;;  %v298_v43 = vld [vmem:[%s520_s0 + $0x58] sm:$0xff] }
   0xb   :  { %283 = vst [vmem:[%s521_s1 + $0x38] sm:$0xff] %v116_v29  ;;  %v300_v44 = vld [vmem:[%s520_s0 + $0xd8] sm:$0xff]  ;;  %285 = vst [vmem:[%s521_s1 + $0xb8] sm:$0xff] %v124_v33  ;;  %v172_v45 = vxor.u32 2147483648, %v296_v42  ;;  %v180_v46 = vxor.u32 2147483648, %v298_v43  ;;  %v302_v48 = vld [vmem:[%s520_s0 + $0x60] sm:$0xff] }
   0xc   :  { %287 = vst [vmem:[%s521_s1 + $0x40] sm:$0xff] %v132_v34  ;;  %289 = vst [vmem:[%s521_s1 + $0xc0] sm:$0xff] %v140_v35  ;;  %v188_v47 = vxor.u32 2147483648, %v300_v44  ;;  %v304_v49 = vld [vmem:[%s520_s0 + $0xe0] sm:$0xff]  ;;  %v306_v50 = vld [vmem:[%s520_s0 + $0x68] sm:$0xff]  ;;  %v196_v51 = vxor.u32 2147483648, %v302_v48 }
   0xd   :  { %291 = vst [vmem:[%s521_s1 + $0x48] sm:$0xff] %v148_v39  ;;  %293 = vst [vmem:[%s521_s1 + $0xc8] sm:$0xff] %v156_v40  ;;  %v204_v52 = vxor.u32 2147483648, %v304_v49  ;;  %v212_v53 = vxor.u32 2147483648, %v306_v50  ;;  %v308_v54 = vld [vmem:[%s520_s0 + $0xe8] sm:$0xff]  ;;  %v310_v55 = vld [vmem:[%s520_s0 + $0x70] sm:$0xff] }
   0xe   :  { %295 = vst [vmem:[%s521_s1 + $0x50] sm:$0xff] %v164_v41  ;;  %v312_v56 = vld [vmem:[%s520_s0 + $0xf0] sm:$0xff]  ;;  %297 = vst [vmem:[%s521_s1 + $0xd0] sm:$0xff] %v172_v45  ;;  %v220_v57 = vxor.u32 2147483648, %v308_v54  ;;  %v228_v58 = vxor.u32 2147483648, %v310_v55  ;;  %v314_v60 = vld [vmem:[%s520_s0 + $0x78] sm:$0xff] }
   0xf   :  { %299 = vst [vmem:[%s521_s1 + $0x58] sm:$0xff] %v180_v46  ;;  %301 = vst [vmem:[%s521_s1 + $0xd8] sm:$0xff] %v188_v47  ;;  %v236_v59 = vxor.u32 2147483648, %v312_v56  ;;  %v316_v61 = vld [vmem:[%s520_s0 + $0xf8] sm:$0xff]  ;;  %v244_v62 = vxor.u32 2147483648, %v314_v60 }
  0x10   :  { %303 = vst [vmem:[%s521_s1 + $0x60] sm:$0xff] %v196_v51  ;;  %305 = vst [vmem:[%s521_s1 + $0xe0] sm:$0xff] %v204_v52  ;;  %v252_v63 = vxor.u32 2147483648, %v316_v61 }
  0x11   :  { %307 = vst [vmem:[%s521_s1 + $0x68] sm:$0xff] %v212_v53  ;;  %309 = vst [vmem:[%s521_s1 + $0xe8] sm:$0xff] %v220_v57 }
  0x12   :  { %311 = vst [vmem:[%s521_s1 + $0x70] sm:$0xff] %v228_v58  ;;  %313 = vst [vmem:[%s521_s1 + $0xf0] sm:$0xff] %v236_v59 }
  0x13   :  { %315 = vst [vmem:[%s521_s1 + $0x78] sm:$0xff] %v244_v62  ;;  %317 = vst [vmem:[%s521_s1 + $0xf8] sm:$0xff] %v252_v63 }

// kernel: semantic_module_forward.1
= control target key start
LH: loop header
LB: loop body
LE: loop exit
PB: predicated region body
PF: predicated region fallthrough
CT: control target
= control target key end

     0   :  { %s6341_s0 = inlined_call_operand.vmem [shape: f32[20,3,256], index: 0, kind: input, shape index: {}]   ;;  %s6342_s1 = inlined_call_operand.vmem [shape: f32[3,256], index: 1, kind: input, shape index: {}]   ;;  %s6343_s2 = inlined_call_operand.vmem [shape: f32[256,24], index: 2, kind: input, shape index: {}]   ;;  %s6344_s3 = inlined_call_operand.vmem [shape: f32[64,3], index: 3, kind: input, shape index: {}]   ;;  %s6345_s4 = inlined_call_operand.vmem [shape: f32[64,1], index: 4, kind: input, shape index: {}]   ;;  %s6346_s5 = inlined_call_operand.vmem [shape: f32[256,64], index: 5, kind: input, shape index: {}]   ;;  %s6347_s6 = inlined_call_operand.vmem [shape: f32[256,1], index: 6, kind: input, shape index: {}]   ;;  %s6348_s7 = inlined_call_operand.vmem [shape: f32[128,256], index: 7, kind: input, shape index: {}]   ;;  %s6349_s8 = inlined_call_operand.vmem [shape: f32[128,1], index: 8, kind: input, shape index: {}]   ;;  %s6350_s9 = inlined_call_operand.vmem [shape: f32[128,1], index: 9, kind: input, shape index: {}]   ;;  %s6351_s10 = inlined_call_operand.<no memory space> [shape: f32[1,1], index: 10, kind: input, shape index: {}]   ;;  %s6352_s11 = inlined_call_operand.hbm [shape: f32[1,256], index: 11, kind: output, shape index: {}]  }
   0x1   :  { %6355 = sst [smem:[#allocation10_spill]] %s6341_s0  ;;  %v16_v0 = vstv %s6351_s10 }
   0x2   :  { %17 = vst [vmem:[#allocation2] sm:$0x1] %v16_v0 }
   0x3   :  { %18 = vsyncpa [#allocation5], 0 }
   0x4   :  { %20 = vsyncpa [#allocation5 + $0x1], 0  ;;  %s4667_s19 = smov 0   ;;  %s4669_s20 = smov 0  }
   0x5   :  { %s4671_s21 = smov 0   ;;  %s4673_s22 = smov 0  }
   0x6 LB: > { %s4688_s10 = sadd.s32 4294967295, %s4598_s22   ;;  %s3549_s23 = sadd.s32 4294967294, %s4598_s22   ;;  %s4598_s22 = sphi %s4673_s22, %s6373_s22   ;;  %s4594_s21 = sphi %s4671_s21, %s6372_s21   ;;  %s4590_s20 = sphi %s4669_s20, %s6371_s20   ;;  %s4586_s19 = sphi %s4667_s19, %s6370_s19  }
   0x7   : > { %s4692_s24 = sadd.s32 1, %s4598_s22   ;;  %s33_s25 = sadd.s32 1, %s4594_s21 }
   0x8   : > { %s30_s26 = ssub.s32 %s4598_s22, %s4692_s24  ;;  %p40_p0 = scmp.ne.s32.totalorder %s4594_s21, %s4590_s20 }
   0x9   : > { %p31_p1 = scmp.eq.s32.totalorder %s30_s26, 0  ;;  %p41_p2 = scmp.eq.s32.totalorder %s4598_s22, 0 }
   0xa   : > { %p285_p3 = scmp.eq.s32.totalorder %s4688_s10, 1  ;;  %p290_p4 = scmp.ne.s32.totalorder %s4590_s20, %s4586_s19 }
   0xb   : > { %s4704_s27 = scalar_select %p31_p1, %s4594_s21, %s33_s25  }
   0xc   : > { %p42_p5 = por %p41_p2, %p40_p0  ;;  %p4706_p6 = por %p285_p3, %p40_p0 }
   0xd   : > { %p291_p7 = scmp.eq.s32.totalorder %s3549_s23, 1  ;;  %p3551_p9 = scmp.ge.s32.totalorder %s4598_s22, 2 }
   0xf   : > { %p4710_p8 = por %p291_p7, %p290_p4  ;;  %334 = sbr.rel (%p3551_p9) target bundleno = 45 (0x2d), region = 52 }
  0x16   : > { %337 = sbr.rel (!%p42_p5) target bundleno = 45 (0x2d), region = 56  ;;  %s339_s30 = sand.u32 (%p42_p5), 1, %s4594_s21  }
  0x17   : > { %s3552_s12 = sshll.u32 (%p42_p5), %s4598_s22, 2  ;;  %s4471_s13 = smul.u32 (%p42_p5), 80, %s339_s30 }
  0x18   : > { %s6358_s0 = sld [smem:[#allocation10_spill]] (%p42_p5) }
  0x19   : > { %s4729_s17 = scalar_lea.vmem (%p42_p5), [#allocation3], %s4471_s13 }
  0x1e   : > { %s4722_s16 = scalar_lea.vmem %s6358_s0, %s3552_s12 }
  0x1f   : > { %v359_v1 = vld [vmem:[%s4722_s16] sm:$0xf]  ;;  %v361_v2 = vld [vmem:[%s4722_s16 + $0x8] sm:$0xf]  ;;  %v363_v3 = vld [vmem:[%s4722_s16 + $0x10] sm:$0xf] }
  0x20   : > { %v365_v4 = vld [vmem:[%s4722_s16 + $0x18] sm:$0xf]  ;;  %v367_v5 = vld [vmem:[%s4722_s16 + $0x20] sm:$0xf]  ;;  %360 = vst [vmem:[%s4729_s17] sm:$0xf] %v359_v1 }
  0x21   : > { %362 = vst [vmem:[%s4729_s17 + $0x4] sm:$0xf] %v361_v2  ;;  %364 = vst [vmem:[%s4729_s17 + $0x8] sm:$0xf] %v363_v3  ;;  %v369_v6 = vld [vmem:[%s4722_s16 + $0x28] sm:$0xf] }
  0x22   : > { %366 = vst [vmem:[%s4729_s17 + $0xc] sm:$0xf] %v365_v4  ;;  %368 = vst [vmem:[%s4729_s17 + $0x10] sm:$0xf] %v367_v5  ;;  %v371_v7 = vld [vmem:[%s4722_s16 + $0x30] sm:$0xf] }
  0x23   : > { %v373_v8 = vld [vmem:[%s4722_s16 + $0x38] sm:$0xf]  ;;  %370 = vst [vmem:[%s4729_s17 + $0x14] sm:$0xf] %v369_v6  ;;  %372 = vst [vmem:[%s4729_s17 + $0x18] sm:$0xf] %v371_v7 }
  0x24   : > { %374 = vst [vmem:[%s4729_s17 + $0x1c] sm:$0xf] %v373_v8  ;;  %v375_v9 = vld [vmem:[%s4722_s16 + $0x40] sm:$0xf]  ;;  %v377_v10 = vld [vmem:[%s4722_s16 + $0x48] sm:$0xf] }
  0x25   : > { %v379_v11 = vld [vmem:[%s4722_s16 + $0x50] sm:$0xf]  ;;  %376 = vst [vmem:[%s4729_s17 + $0x20] sm:$0xf] %v375_v9  ;;  %378 = vst [vmem:[%s4729_s17 + $0x24] sm:$0xf] %v377_v10 }
  0x26   : > { %380 = vst [vmem:[%s4729_s17 + $0x28] sm:$0xf] %v379_v11  ;;  %v381_v12 = vld [vmem:[%s4722_s16 + $0x58] sm:$0xf]  ;;  %v383_v13 = vld [vmem:[%s4722_s16 + $0x60] sm:$0xf] }
  0x27   : > { %v385_v14 = vld [vmem:[%s4722_s16 + $0x68] sm:$0xf]  ;;  %382 = vst [vmem:[%s4729_s17 + $0x2c] sm:$0xf] %v381_v12  ;;  %384 = vst [vmem:[%s4729_s17 + $0x30] sm:$0xf] %v383_v13 }
  0x28   : > { %386 = vst [vmem:[%s4729_s17 + $0x34] sm:$0xf] %v385_v14  ;;  %v387_v15 = vld [vmem:[%s4722_s16 + $0x70] sm:$0xf]  ;;  %v389_v16 = vld [vmem:[%s4722_s16 + $0x78] sm:$0xf] }
  0x29   : > { %v391_v17 = vld [vmem:[%s4722_s16 + $0x80] sm:$0xf]  ;;  %388 = vst [vmem:[%s4729_s17 + $0x38] sm:$0xf] %v387_v15  ;;  %390 = vst [vmem:[%s4729_s17 + $0x3c] sm:$0xf] %v389_v16 }
  0x2a   : > { %392 = vst [vmem:[%s4729_s17 + $0x40] sm:$0xf] %v391_v17  ;;  %v393_v18 = vld [vmem:[%s4722_s16 + $0x88] sm:$0xf]  ;;  %v395_v19 = vld [vmem:[%s4722_s16 + $0x90] sm:$0xf] }
  0x2b   : > { %v397_v20 = vld [vmem:[%s4722_s16 + $0x98] sm:$0xf]  ;;  %394 = vst [vmem:[%s4729_s17 + $0x44] sm:$0xf] %v393_v18  ;;  %396 = vst [vmem:[%s4729_s17 + $0x48] sm:$0xf] %v395_v19 }
  0x2c   : > { %398 = vst [vmem:[%s4729_s17 + $0x4c] sm:$0xf] %v397_v20 }
  0x2d PF: > { %p3553_p10 = scmp.ge.s32.totalorder %s4598_s22, 1  ;;  %p467_p11 = scmp.lt.s32.totalorder %s4598_s22, 3 }
  0x2f   : > { %p468_p12 = pnand %p3553_p10, %p467_p11 }
  0x31   : > { %471 = sbr.rel (%p468_p12) target bundleno = 1094 (0x446), region = 101 }
  0x38   : > { %s4769_s18 = sand.u32 1, %s4590_s20   ;;  %p516_p13 = scmp.lt.s32.totalorder %s4688_s10, 1  ;;  %v4776_v21 = vld [vmem:[%s6343_s2] sm:$0xff]  ;;  %vm603_vm0 = vcmask 195584   ;;  %v4600_v23 = vmov 1   ;;  %v4601_v26 = vmov 2  }
  0x39   : > { %s4472_s23 = smul.u32 80, %s4769_s18  ;;  %4071 = vmatprep.mubr.msk.f32.mxu0 %vm603_vm0, %v4776_v21  ;;  %v4784_v22 = vld [vmem:[%s6343_s2 + $0x80] sm:$0xff]  ;;  %4515 = vset.pattern.permute.xlu1 %v4600_v23  ;;  %vm589_vm1 = vcmask 1042432   ;;  %vm591_vm2 = vcmask 1045504   ;;  %vm593_vm3 = vcmask 1040384   ;;  %vm595_vm4 = vcmask 1043456  }
  0x3a   : > { %s517_s30 = scalar_select %p516_p13, %s4688_s10, 1  ;;  %4095 = vmatprep.mubr.msk.f32.mxu1 %vm603_vm0, %v4784_v22  ;;  %4516 = vset.pattern.permute.xlu0 %v4601_v26  ;;  %vm599_vm5 = vcmask 1041408   ;;  %vm597_vm6 = vcmask 1046528   ;;  %vm601_vm7 = vcmask 1044480   ;;  %v4832_v4 = vld [vmem:[%s6344_s3] sm:$0xff]  ;;  %v4847_v13 = vld [vmem:[%s6344_s3 + $0x8] sm:$0xff] }
  0x3b   : > { %s4789_s15 = scalar_lea.vmem [#allocation3], %s4472_s23  ;;  %2214 = vperm.xlu1 %4515, %v4832_v4   ;;  %2266 = vperm.xlu0 %4516, %v4832_v4   ;;  %vm2621_vm8 = vcmask 523264   ;;  %s515_s13 = scalar_lea.vmem [#allocation4], %s4769_s18 }
  0x3c   : > { %s3554_s14 = sshll.u32 %s517_s30, 2  ;;  %v553_v24 = vld [vmem:[%s4789_s15] sm:$0x7]  ;;  %v3555_v25 = vld [vmem:[%s4789_s15 + $0x4] sm:$0x7] }
  0x3d   : > { %s4797_s25 = scalar_lea.vmem %s6342_s1, %s3554_s14  ;;  %v3556_v27 = vld [vmem:[%s4789_s15 + $0x8] sm:$0x7]  ;;  %v3557_v28 = vld [vmem:[%s4789_s15 + $0xc] sm:$0x7]  ;;  %v3590_v46 = vld [vmem:[%s4789_s15 + $0x10] sm:$0x7] }
  0x3e   : > { %v4802_v29 = vld [vmem:[%s4797_s25] sm:$0x7]  ;;  %v3591_v50 = vld [vmem:[%s4789_s15 + $0x14] sm:$0x7]  ;;  %v3592_v51 = vld [vmem:[%s4789_s15 + $0x18] sm:$0x7] }
  0x3f   : > { %v554_v30 = vsub.f32 %v553_v24, %v4802_v29  ;;  %v558_v31 = vsub.f32 %v3555_v25, %v4802_v29  ;;  %v562_v32 = vsub.f32 %v3556_v27, %v4802_v29  ;;  %v566_v33 = vsub.f32 %v3557_v28, %v4802_v29  ;;  %v3626_v56 = vld [vmem:[%s4789_s15 + $0x20] sm:$0x7]  ;;  %v3627_v57 = vld [vmem:[%s4789_s15 + $0x24] sm:$0x7]  ;;  %v3628_v62 = vld [vmem:[%s4789_s15 + $0x28] sm:$0x7]  ;;  %2218 = vperm.xlu1 %4515, %v4847_v13  }
  0x40   : > { %v951_v49 = vsub.f32 %v3590_v46, %v4802_v29  ;;  %v955_v54 = vsub.f32 %v3591_v50, %v4802_v29  ;;  %v4819_v55 = vsub.f32 %v3592_v51, %v4802_v29  ;;  %v3593_v3 = vld [vmem:[%s4789_s15 + $0x1c] sm:$0x7]  ;;  %v1252_v7 = vsub.f32 %v3626_v56, %v4802_v29  ;;  %v3629_v18 = vld [vmem:[%s4789_s15 + $0x2c] sm:$0x7]  ;;  %v4858_v27 = vld [vmem:[%s6344_s3 + $0x10] sm:$0xff]  ;;  %s3476_s14 = sshll.u32 %s515_s13, 4  ;;  %s6299_s14 = int_to_ptr.vmem [resolvable:$true] %s3476_s14 }
  0x41   : > { %v555_v34 = vmul.f32 %v554_v30, %v554_v30  ;;  %v559_v35 = vmul.f32 %v558_v31, %v558_v31  ;;  %v563_v36 = vmul.f32 %v562_v32, %v562_v32  ;;  %v569_v37 = vrot.slane %v554_v30, 5  ;;  %v4863_v28 = vld [vmem:[%s6343_s2 + $0x8] sm:$0xff]  ;;  %2274 = vperm.xlu0 %4516, %v4858_v27   ;;  %s4536_s0 = scalar_lea.vmem %s6299_s14, 16 }
  0x42   : > { %v575_v38 = vrot.slane %v558_v31, 7  ;;  %v581_v39 = vrot.slane %v562_v32, 1  ;;  %v567_v40 = vmul.f32 %v566_v33, %v566_v33  ;;  %v587_v44 = vrot.slane %v566_v33, 3  ;;  %v4868_v30 = vld [vmem:[%s6343_s2 + $0x88] sm:$0xff]  ;;  %p4537_p0 = scmp.ne.s32.totalorder %s6299_s14, %s4536_s0 }
  0x43   : > { %v572_v41 = vrot.slane %v559_v35, 2  ;;  %v578_v42 = vrot.slane %v563_v36, 4  ;;  %v590_v43 = vsel %vm589_vm1, %v555_v34, %v569_v37  ;;  %v952_v60 = vmul.f32 %v951_v49, %v951_v49  ;;  %v3662_v35 = vld [vmem:[%s4789_s15 + $0x30] sm:$0x7]  ;;  %v3664_v51 = vld [vmem:[%s4789_s15 + $0x38] sm:$0x7]  ;;  %4517 = vset.pattern.permute.xlu1 %v4601_v26 }
  0x44   : > { %v584_v45 = vrot.slane %v567_v40, 6  ;;  %v966_v61 = vrot.slane %v951_v49, 5  ;;  %v956_v0 = vmul.f32 %v955_v54, %v955_v54  ;;  %v960_v1 = vmul.f32 %v4819_v55, %v4819_v55  ;;  %v4878_v36 = vld [vmem:[%s6343_s2 + $0x10] sm:$0xff]  ;;  %2270 = vperm.xlu1 %4517, %v4847_v13   ;;  %p4538_p1 = pnand %p4537_p0, %p4706_p6 }
  0x45   : > { %v592_v47 = vsel %vm591_vm2, %v590_v43, %v572_v41  ;;  %v594_v48 = vsel %vm593_vm3, %v572_v41, %v575_v38  ;;  %v972_v2 = vrot.slane %v955_v54, 7  ;;  %v978_v5 = vrot.slane %v4819_v55, 1  ;;  %v4883_v37 = vld [vmem:[%s6343_s2 + $0x90] sm:$0xff] }
  0x46   : > { %v596_v52 = vsel %vm595_vm4, %v594_v48, %v578_v42  ;;  %v600_v53 = vsel %vm599_vm5, %v581_v39, %v584_v45  ;;  %v986_v6 = vsel %vm589_vm1, %v952_v60, %v966_v61  ;;  %v1256_v8 = vsub.f32 %v3627_v57, %v4802_v29  ;;  %v3663_v42 = vld [vmem:[%s4789_s15 + $0x34] sm:$0x7]  ;;  %v3698_v57 = vld [vmem:[%s4789_s15 + $0x40] sm:$0x7]  ;;  %p4539_p2 = pneg %p4538_p1 }
  0x47   : > { %v598_v58 = vsel %vm597_vm6, %v596_v52, %v581_v39  ;;  %v602_v59 = vsel %vm601_vm7, %v600_v53, %v587_v44  ;;  %v969_v9 = vrot.slane %v956_v0, 2  ;;  %v975_v10 = vrot.slane %v960_v1, 4  ;;  %v4909_v52 = vld [vmem:[%s6343_s2 + $0x98] sm:$0xff]  ;;  %v4924_v60 = vld [vmem:[%s6343_s2 + $0xa0] sm:$0xff] }
  0x48   : > { %v4399_v63 = vpack.c.bf16 %v598_v58, %v592_v47  ;;  %v4841_v11 = vsub.f32 %v3628_v62, %v4802_v29  ;;  %v963_v12 = vsub.f32 %v3593_v3, %v4802_v29  ;;  %v1253_v14 = vmul.f32 %v1252_v7, %v1252_v7  ;;  %v4897_v47 = vld [vmem:[%s6343_s2 + $0x18] sm:$0xff]  ;;  %v3699_v58 = vld [vmem:[%s4789_s15 + $0x44] sm:$0x7] }
  0x49   : > { %v1257_v15 = vmul.f32 %v1256_v8, %v1256_v8  ;;  %v1267_v16 = vrot.slane %v1252_v7, 5  ;;  %v1273_v17 = vrot.slane %v1256_v8, 7  ;;  %v987_v19 = vsel %vm591_vm2, %v986_v6, %v969_v9 }
  0x4a   : > { %4400 = vmatprep.subr.bf16.mxu0 %v4399_v63  ;;  %4467 = vmatprep.subr.bf16.mxu1 %v4399_v63  ;;  %v988_v20 = vsel %vm593_vm3, %v969_v9, %v972_v2  ;;  %v1261_v24 = vmul.f32 %v4841_v11, %v4841_v11  ;;  %v1279_v25 = vrot.slane %v4841_v11, 1  ;;  %v964_v34 = vmul.f32 %v963_v12, %v963_v12  ;;  %v3700_v9 = vld [vmem:[%s4789_s15 + $0x48] sm:$0x7] }
  0x4b   : > { %4402 = vmatpush3.bf16.msra.mxu0 %v4399_v63  ;;  %4469 = vmatpush3.bf16.msra.mxu1 %v4399_v63  ;;  %v989_v31 = vsel %vm595_vm4, %v988_v20, %v975_v10  ;;  %v1270_v32 = vrot.slane %v1257_v15, 2  ;;  %v1287_v33 = vsel %vm589_vm1, %v1253_v14, %v1267_v16  ;;  %v984_v40 = vrot.slane %v963_v12, 3  ;;  %v4947_v10 = vld [vmem:[%s6343_s2 + $0x28] sm:$0xff]  ;;  %v4959_v15 = vld [vmem:[%s6343_s2 + $0x30] sm:$0xff] }
  0x4c   : > { %4069 = vmatprep.subr.mxu0 %v602_v59  ;;  %4468 = vmatprep.subr.mxu1 %v602_v59  ;;  %v990_v38 = vsel %vm597_vm6, %v989_v31, %v978_v5  ;;  %v1276_v39 = vrot.slane %v1261_v24, 4  ;;  %v1264_v41 = vsub.f32 %v3629_v18, %v4802_v29  ;;  %v981_v46 = vrot.slane %v964_v34, 6  ;;  %v4952_v11 = vld [vmem:[%s6343_s2 + $0xa8] sm:$0xff]  ;;  %v4964_v16 = vld [vmem:[%s6343_s2 + $0xb0] sm:$0xff]  ;;  %v4972_v24 = vld [vmem:[%s6344_s3 + $0x20] sm:$0xff] }
  0x4d   : > { %v4403_v43 = vpack.c.bf16 %v990_v38, %v987_v19  ;;  %v1288_v44 = vsel %vm591_vm2, %v1287_v33, %v1270_v32  ;;  %v1289_v45 = vsel %vm593_vm3, %v1270_v32, %v1273_v17  ;;  %v1553_v50 = vsub.f32 %v3662_v35, %v4802_v29  ;;  %2282 = vperm.xlu0 %4516, %v4972_v24  }
  0x4e   : > { %v1290_v48 = vsel %vm595_vm4, %v1289_v45, %v1276_v39  ;;  %v1265_v49 = vmul.f32 %v1264_v41, %v1264_v41  ;;  %v991_v54 = vsel %vm599_vm5, %v978_v5, %v981_v46  ;;  %v1285_v55 = vrot.slane %v1264_v41, 3  ;;  %v4995_v41 = vld [vmem:[%s6343_s2 + $0xb8] sm:$0xff]  ;;  %v5008_v45 = vld [vmem:[%s6343_s2 + $0xc0] sm:$0xff] }
  0x4f   : > { %4070 = vmatpush3.msra.mxu0 %v602_v59  ;;  %4470 = vmatpush3.msra.mxu1 %v602_v59  ;;  %v1291_v53 = vsel %vm597_vm6, %v1290_v48, %v1279_v25  ;;  %v1557_v56 = vsub.f32 %v3663_v42, %v4802_v29  ;;  %v4919_v59 = vld [vmem:[%s6343_s2 + $0x20] sm:$0xff]  ;;  %v992_v62 = vsel %vm601_vm7, %v991_v54, %v984_v40  ;;  %v1568_v3 = vrot.slane %v1553_v50, 5  ;;  %v4990_v40 = vld [vmem:[%s6343_s2 + $0x38] sm:$0xff] }
  0x50   : > { %4072 = vmatmul.mubr.msk.f32.vlgmr.msra.gmra.mrb[0].mxu0 %vm603_vm0, %v4863_v28  ;;  %4096 = vmatmul.mubr.msk.f32.vlgmr.msra.gmra.mrb[0].mxu1 %vm603_vm0, %v4868_v30  ;;  %v4407_v61 = vpack.c.bf16 %v1291_v53, %v1288_v44  ;;  %v1282_v63 = vrot.slane %v1265_v49, 6  ;;  %v1554_v0 = vmul.f32 %v1553_v50, %v1553_v50  ;;  %v4930_v2 = vsub.f32 %v3664_v51, %v4802_v29  ;;  %v5003_v44 = vld [vmem:[%s6343_s2 + $0x40] sm:$0xff]  ;;  %v5019_v50 = vld [vmem:[%s6344_s3 + $0x30] sm:$0xff] }
  0x51   : > { %4074 = vmatprep.mubr.msk.f32.mxu0 %vm603_vm0, %v4878_v36  ;;  %4098 = vmatprep.mubr.msk.f32.mxu1 %vm603_vm0, %v4883_v37  ;;  %v1558_v1 = vmul.f32 %v1557_v56, %v1557_v56  ;;  %v1574_v5 = vrot.slane %v1557_v56, 7  ;;  %v1854_v7 = vsub.f32 %v3698_v57, %v4802_v29  ;;  %v1858_v8 = vsub.f32 %v3699_v58, %v4802_v29  ;;  %v5036_v56 = vld [vmem:[%s6343_s2 + $0x48] sm:$0xff] }
  0x52   : > { %4404 = vmatprep.subr.bf16.mxu1 %v4403_v43  ;;  %v1292_v6 = vsel %vm599_vm5, %v1279_v25, %v1282_v63  ;;  %v1562_v12 = vmul.f32 %v4930_v2, %v4930_v2  ;;  %4408 = vmatprep.subr.bf16.mxu0 %v4407_v61  ;;  %v1580_v18 = vrot.slane %v4930_v2, 1  ;;  %v1588_v19 = vsel %vm589_vm1, %v1554_v0, %v1568_v3  ;;  %v5041_v57 = vld [vmem:[%s6343_s2 + $0xc8] sm:$0xff]  ;;  %v5077_v3 = vld [vmem:[%s6343_s2 + $0xd8] sm:$0xff] }
  0x53   : > { %4406 = vmatpush3.bf16.msra.mxu1 %v4403_v43  ;;  %v1571_v14 = vrot.slane %v1558_v1, 2  ;;  %v1293_v17 = vsel %vm601_vm7, %v1292_v6, %v1285_v55  ;;  %v1859_v20 = vmul.f32 %v1858_v8, %v1858_v8  ;;  %4410 = vmatpush3.bf16.msra.mxu0 %v4407_v61  ;;  %v1855_v32 = vmul.f32 %v1854_v7, %v1854_v7  ;;  %v5047_v61 = vld [vmem:[%s6343_s2 + $0x50] sm:$0xff]  ;;  %v5072_v1 = vld [vmem:[%s6343_s2 + $0x58] sm:$0xff]  ;;  %v5083_v6 = vld [vmem:[%s6343_s2 + $0x60] sm:$0xff] }
  0x54   : > { %4075 = vmatmul.mubr.msk.f32.gmra.mrb[2].mxu0 %vm603_vm0, %v4897_v47  ;;  %4099 = vmatmul.mubr.msk.f32.gmra.mrb[2].mxu1 %vm603_vm0, %v4909_v52  ;;  %v1577_v25 = vrot.slane %v1562_v12, 4  ;;  %v4976_v33 = vsub.f32 %v3700_v9, %v4802_v29  ;;  %v1869_v35 = vrot.slane %v1854_v7, 5  ;;  %v1875_v39 = vrot.slane %v1858_v8, 7  ;;  %v5088_v7 = vld [vmem:[%s6343_s2 + $0xe0] sm:$0xff]  ;;  %v2156_v9 = vld [vmem:[%s6344_s3 + $0x18] sm:$0xff] }
  0x55   : > { %4077 = vmatprep.mubr.msk.f32.mxu0 %vm603_vm0, %v4919_v59  ;;  %4101 = vmatprep.mubr.msk.f32.mxu1 %vm603_vm0, %v4924_v60  ;;  %v1590_v31 = vsel %vm593_vm3, %v1571_v14, %v1574_v5  ;;  %v1589_v34 = vsel %vm591_vm2, %v1588_v19, %v1571_v14  ;;  %v1872_v38 = vrot.slane %v1859_v20, 2  ;;  %v4602_v49 = vmov 0   ;;  %v3665_v5 = vld [vmem:[%s4789_s15 + $0x3c] sm:$0x7]  ;;  %v3701_v14 = vld [vmem:[%s4789_s15 + $0x4c] sm:$0x7] }
  0x56   : > { %4123 = vmatprep.subr.mxu1 %v992_v62  ;;  %v1591_v42 = vsel %vm595_vm4, %v1590_v31, %v1577_v25  ;;  %v1863_v43 = vmul.f32 %v4976_v33, %v4976_v33  ;;  %4177 = vmatprep.subr.mxu0 %v1293_v17  ;;  %v1881_v54 = vrot.slane %v4976_v33, 1  ;;  %v1889_v55 = vsel %vm589_vm1, %v1855_v32, %v1869_v35  ;;  %v5125_v19 = vld [vmem:[%s6343_s2 + $0xf0] sm:$0xff]  ;;  %v5140_v31 = vld [vmem:[%s6343_s2 + $0x78] sm:$0xff]  ;;  %s3767_s15 = sshll.u32 %s4688_s10, 4  ;;  %s4603_s10 = smov [#allocation4]  }
  0x57   : > { %4124 = vmatpush3.msra.mxu1 %v992_v62  ;;  %v1592_v46 = vsel %vm597_vm6, %v1591_v42, %v1580_v18  ;;  %v1891_v48 = vsel %vm593_vm3, %v1872_v38, %v1875_v39  ;;  %4178 = vmatpush3.msra.mxu0 %v1293_v17  ;;  %v5052_v62 = vld [vmem:[%s6343_s2 + $0xd0] sm:$0xff]  ;;  %v1890_v63 = vsel %vm591_vm2, %v1889_v55, %v1872_v38  ;;  %v2325_v38 = vld [vmem:[%s6345_s4] sm:$0xff]  ;;  %v5187_v2 = vld [vmem:[%s6344_s3 + $0x38] sm:$0xff]  ;;  %s6297_s23 = scalar_lea.hbm %s6352_s11, %s3767_s15  ;;  %s4540_s26 = sshll.u32 %s4603_s10, 4  ;;  %s4541_s26 = int_to_ptr.vmem [resolvable:$false] %s4540_s26 }
  0x58   : > { %4078 = vmatmul.mubr.msk.f32.gmra.mrb[4].mxu0 %vm603_vm0, %v4947_v10  ;;  %4102 = vmatmul.mubr.msk.f32.gmra.mrb[4].mxu1 %vm603_vm0, %v4952_v11  ;;  %v5021_v51 = vpack.c.bf16 %v1592_v46, %v1589_v34  ;;  %v1878_v53 = vrot.slane %v1863_v43, 4  ;;  %v1565_v12 = vsub.f32 %v3665_v5, %v4802_v29  ;;  %v5120_v17 = vld [vmem:[%s6343_s2 + $0x70] sm:$0xff]  ;;  %v1866_v25 = vsub.f32 %v3701_v14, %v4802_v29  ;;  %v5159_v34 = vld [vmem:[%s6344_s3 + $0x28] sm:$0xff]  ;;  %s4542_s30 = scalar_lea.vmem %s4541_s26, 32  ;;  %p4543_p3 = scmp.lt.s32.totalorder %s6299_s14, %s4541_s26 }
  0x59   : > { %4080 = vmatprep.mubr.msk.f32.mxu0 %vm603_vm0, %v4959_v15  ;;  %4104 = vmatprep.mubr.msk.f32.mxu1 %vm603_vm0, %v4964_v16  ;;  %v2327_v33 = vld [vmem:[%s6345_s4 + $0x10] sm:$0xff]  ;;  %p4544_p4 = scmp.lt.s32.totalorder %s4542_s30, %s4536_s0 }
  0x5a   : > { %4518 = vset.pattern.permute.xlu1 %v4602_v49  ;;  %v1892_v58 = vsel %vm595_vm4, %v1891_v48, %v1878_v53  ;;  %2290 = vperm.xlu0 %4516, %v5019_v50   ;;  %v1566_v20 = vmul.f32 %v1565_v12, %v1565_v12  ;;  %v1867_v32 = vmul.f32 %v1866_v25, %v1866_v25  ;;  %v1586_v35 = vrot.slane %v1565_v12, 3  ;;  %v2445_v53 = vld [vmem:[%s6347_s6 + $0x80] sm:$0xff]  ;;  %v2447_v55 = vld [vmem:[%s6347_s6 + $0x90] sm:$0xff] }
  0x5b   : > { %2173 = vperm.xlu1 %4518, %v4858_v27   ;;  %4412 = vmatprep.subr.bf16.mxu1 %v5021_v51  ;;  %v1893_v0 = vsel %vm597_vm6, %v1892_v58, %v1881_v54  ;;  %v1887_v46 = vrot.slane %v1866_v25, 3  ;;  %v2431_v58 = vld [vmem:[%s6347_s6 + $0x10] sm:$0xff]  ;;  %v2457_v25 = vld [vmem:[%s6347_s6 + $0xe0] sm:$0xff]  ;;  %p4545_p5 = por %p4544_p4, %p4543_p3 }
  0x5c   : > { %4081 = vmatmul.mubr.msk.f32.gmra.mrb[6].mxu0 %vm603_vm0, %v4990_v40  ;;  %4105 = vmatmul.mubr.msk.f32.gmra.mrb[6].mxu1 %vm603_vm0, %v4995_v41  ;;  %v4415_v8 = vpack.c.bf16 %v1893_v0, %v1890_v63  ;;  %v1583_v29 = vrot.slane %v1566_v20, 6  ;;  %v1884_v42 = vrot.slane %v1867_v32, 6  ;;  %v2449_v63 = vld [vmem:[%s6347_s6 + $0xa0] sm:$0xff]  ;;  %v2435_v5 = vld [vmem:[%s6347_s6 + $0x30] sm:$0xff]  ;;  %v3323_v32 = vld [vmem:[%s6350_s9 + $0x58] sm:$0xff] }
  0x5d   : > { %4083 = vmatprep.mubr.msk.f32.mxu0 %vm603_vm0, %v5003_v44  ;;  %4107 = vmatprep.mubr.msk.f32.mxu1 %vm603_vm0, %v5008_v45  ;;  %v2433_v0 = vld [vmem:[%s6347_s6 + $0x20] sm:$0xff]  ;;  %v2455_v12 = vld [vmem:[%s6347_s6 + $0xd0] sm:$0xff]  ;;  %p4546_p7 = pnand %p4545_p5, %p4539_p2 }
  0x5e   : > { %4528 = vset.pattern.permute.xlu0 %v4602_v49  ;;  %4416 = vmatprep.subr.bf16.mxu0 %v4415_v8  ;;  %v1593_v39 = vsel %vm599_vm5, %v1580_v18, %v1583_v29  ;;  %v1894_v18 = vsel %vm599_vm5, %v1881_v54, %v1884_v42  ;;  %v2429_v54 = vld [vmem:[%s6347_s6] sm:$0xff]  ;;  %v2331_v14 = vld [vmem:[%s6345_s4 + $0x30] sm:$0xff]  ;;  %v3044_v42 = vld [vmem:[%s6349_s8 + $0x28] sm:$0xff] }
  0x5f   : > { %4519 = vset.pattern.permute.xlu1 %v4600_v23  ;;  %2163 = vperm.xlu0 %4528, %v4832_v4   ;;  %v5109_v4 = vld [vmem:[%s6343_s2 + $0x68] sm:$0xff]  ;;  %v1594_v43 = vsel %vm601_vm7, %v1593_v39, %v1586_v35  ;;  %v1895_v48 = vsel %vm601_vm7, %v1894_v18, %v1887_v46  ;;  %v2439_v20 = vld [vmem:[%s6347_s6 + $0x50] sm:$0xff]  ;;  %v3324_v35 = vld [vmem:[%s6350_s9 + $0x60] sm:$0xff] }
  0x60   : > { %4084 = vmatmul.mubr.msk.f32.gmra.mrb[8].mxu0 %vm603_vm0, %v5036_v56  ;;  %4108 = vmatmul.mubr.msk.f32.gmra.mrb[8].mxu1 %vm603_vm0, %v5041_v57  ;;  %v3322_v29 = vld [vmem:[%s6350_s9 + $0x50] sm:$0xff]  ;;  %v3047_v18 = vld [vmem:[%s6349_s8 + $0x40] sm:$0xff] }
  0x61   : > { %4086 = vmatprep.mubr.msk.f32.mxu0 %vm603_vm0, %v5047_v61  ;;  %4110 = vmatprep.mubr.msk.f32.mxu1 %vm603_vm0, %v5052_v62  ;;  %v3326_v39 = vld [vmem:[%s6350_s9 + $0x70] sm:$0xff] }
  0x62   : > { %2222 = vperm.xlu1 %4519, %v4858_v27   ;;  %v5114_v27 = vld [vmem:[%s6343_s2 + $0xe8] sm:$0xff]  ;;  %v3045_v46 = vld [vmem:[%s6349_s8 + $0x30] sm:$0xff] }
  0x63   : > { %2168 = vperm.xlu0 %4528, %v4847_v13   ;;  %v5145_v13 = vld [vmem:[%s6343_s2 + $0xf8] sm:$0xff] }
  0x64   : > { %4087 = vmatmul.mubr.msk.f32.gmra.mrb[10].mxu0 %vm603_vm0, %v5072_v1  ;;  %4111 = vmatmul.mubr.msk.f32.gmra.mrb[10].mxu1 %vm603_vm0, %v5077_v3 }
  0x65   : > { %4089 = vmatprep.mubr.msk.f32.mxu0 %vm603_vm0, %v5083_v6  ;;  %4113 = vmatprep.mubr.msk.f32.mxu1 %vm603_vm0, %v5088_v7 }
  0x66   : > { %2226 = vperm.xlu1 %4519, %v2156_v9  }
  0x67   : > { %2178 = vperm.xlu0 %4528, %v2156_v9  }
  0x68   : > { %4090 = vmatmul.mubr.msk.f32.gmra.mrb[12].mxu0 %vm603_vm0, %v5109_v4  ;;  %4114 = vmatmul.mubr.msk.f32.gmra.mrb[12].mxu1 %vm603_vm0, %v5114_v27 }
  0x69   : > { %4092 = vmatprep.mubr.msk.f32.mxu0 %vm603_vm0, %v5120_v17  ;;  %4116 = vmatprep.mubr.msk.f32.mxu1 %vm603_vm0, %v5125_v19 }
  0x6a   : > { %4520 = vset.pattern.permute.xlu1 %v4601_v26 }
  0x6b   : > { %2278 = vperm.xlu1 %4520, %v2156_v9   ;;  %2188 = vperm.xlu0 %4528, %v5159_v34   ;;  %v2437_v9 = vld [vmem:[%s6347_s6 + $0x40] sm:$0xff] }
  0x6c   : > { %4093 = vmatmul.mubr.msk.f32.gmra.mrb[14].mxu0 %vm603_vm0, %v5140_v31  ;;  %4117 = vmatmul.mubr.msk.f32.gmra.mrb[14].mxu1 %vm603_vm0, %v5145_v13 }
  0x6d   : > { %4125 = vmatprep.mubr.msk.f32.mxu1 %vm603_vm0, %v4776_v21  ;;  %4179 = vmatprep.mubr.msk.f32.mxu0 %vm603_vm0, %v4776_v21 }
  0x6f   : > { %4521 = vset.pattern.permute.xlu1 %v4602_v49  ;;  %2335 = vperm.xlu0 %4528, %v2325_v38   ;;  %v3312_v38 = vld [vmem:[%s6350_s9] sm:$0xff] }
  0x70   : > { %4126 = vmatmul.mubr.msk.f32.vlgmr.msra.gmra.mrb[16].mxu1 %vm603_vm0, %v4863_v28  ;;  %4180 = vmatmul.mubr.msk.f32.vlgmr.msra.gmra.mrb[16].mxu0 %vm603_vm0, %v4863_v28 }
  0x71   : > { %4128 = vmatprep.mubr.msk.f32.mxu1 %vm603_vm0, %v4878_v36  ;;  %4182 = vmatprep.mubr.msk.f32.mxu0 %vm603_vm0, %v4878_v36 }
  0x72   : > { %4414 = vmatpush3.bf16.msra.mxu1 %v5021_v51  ;;  %2183 = vperm.xlu1 %4521, %v4972_v24   ;;  %v2330_v51 = vld [vmem:[%s6345_s4 + $0x28] sm:$0xff] }
  0x73   : > { %4418 = vmatpush3.bf16.msra.mxu0 %v4415_v8  ;;  %4231 = vmatprep.subr.mxu1 %v1594_v43  ;;  %v2453_v8 = vld [vmem:[%s6347_s6 + $0xc0] sm:$0xff] }
  0x74   : > { %4129 = vmatmul.mubr.msk.f32.gmra.mrb[18].mxu1 %vm603_vm0, %v4897_v47  ;;  %4183 = vmatmul.mubr.msk.f32.gmra.mrb[18].mxu0 %vm603_vm0, %v4897_v47 }
  0x75   : > { %4131 = vmatprep.mubr.msk.f32.mxu1 %vm603_vm0, %v4919_v59  ;;  %4185 = vmatprep.mubr.msk.f32.mxu0 %vm603_vm0, %v4919_v59 }
  0x76   : > { %4522 = vset.pattern.permute.xlu1 %v4600_v23  ;;  %2198 = vperm.xlu0 %4528, %v5187_v2  }
  0x77   : > { %2230 = vperm.xlu1 %4522, %v4972_v24   ;;  %4285 = vmatprep.subr.mxu0 %v1895_v48  ;;  %v2326_v24 = vld [vmem:[%s6345_s4 + $0x8] sm:$0xff] }
  0x78   : > { %4132 = vmatmul.mubr.msk.f32.gmra.mrb[20].mxu1 %vm603_vm0, %v4947_v10  ;;  %4186 = vmatmul.mubr.msk.f32.gmra.mrb[20].mxu0 %vm603_vm0, %v4947_v10 }
  0x79   : > { %4134 = vmatprep.mubr.msk.f32.mxu1 %vm603_vm0, %v4959_v15  ;;  %4188 = vmatprep.mubr.msk.f32.mxu0 %vm603_vm0, %v4959_v15 }
  0x7a   : > { %2345 = vperm.xlu0 %4528, %v2327_v33   ;;  %4232 = vmatpush3.msra.mxu1 %v1594_v43  ;;  %v3445_v43 = vld [vmem:[#allocation2] sm:$0x1]  ;;  %v3049_v33 = vld [vmem:[%s6349_s8 + $0x50] sm:$0xff] }
  0x7b   : > { %2234 = vperm.xlu1 %4522, %v5159_v34   ;;  %4286 = vmatpush3.msra.mxu0 %v1895_v48  ;;  %v3048_v48 = vld [vmem:[%s6349_s8 + $0x48] sm:$0xff] }
  0x7c   : > { %4135 = vmatmul.mubr.msk.f32.gmra.mrb[22].mxu1 %vm603_vm0, %v4990_v40  ;;  %4189 = vmatmul.mubr.msk.f32.gmra.mrb[22].mxu0 %vm603_vm0, %v4990_v40 }
  0x7d   : > { %4137 = vmatprep.mubr.msk.f32.mxu1 %vm603_vm0, %v5003_v44  ;;  %4191 = vmatprep.mubr.msk.f32.mxu0 %vm603_vm0, %v5003_v44 }
  0x7e   : > { %2360 = vperm.xlu0 %4528, %v2330_v51   ;;  %v3050_v51 = vld [vmem:[%s6349_s8 + $0x58] sm:$0xff] }
  0x7f   : > { %4523 = vset.pattern.permute.xlu1 %v4602_v49 }
  0x80   : > { %4138 = vmatmul.mubr.msk.f32.gmra.mrb[24].mxu1 %vm603_vm0, %v5036_v56  ;;  %4192 = vmatmul.mubr.msk.f32.gmra.mrb[24].mxu0 %vm603_vm0, %v5036_v56 }
  0x81   : > { %4140 = vmatprep.mubr.msk.f32.mxu1 %vm603_vm0, %v5047_v61  ;;  %4194 = vmatprep.mubr.msk.f32.mxu0 %vm603_vm0, %v5047_v61 }
  0x82   : > { %2340 = vperm.xlu1 %4523, %v2326_v24   ;;  %2543 = vperm.xlu0 %4528, %v2445_v53   ;;  %v3051_v24 = vld [vmem:[%s6349_s8 + $0x60] sm:$0xff]  ;;  %v3052_v53 = vld [vmem:[%s6349_s8 + $0x68] sm:$0xff] }
  0x84   : > { %4141 = vmatmul.mubr.msk.f32.gmra.mrb[26].mxu1 %vm603_vm0, %v5072_v1  ;;  %4195 = vmatmul.mubr.msk.f32.gmra.mrb[26].mxu0 %vm603_vm0, %v5072_v1 }
  0x85   : > { %4143 = vmatprep.mubr.msk.f32.mxu1 %vm603_vm0, %v5083_v6  ;;  %4197 = vmatprep.mubr.msk.f32.mxu0 %vm603_vm0, %v5083_v6 }
  0x86   : > { %4524 = vset.pattern.permute.xlu1 %v4601_v26  ;;  %2463 = vperm.xlu0 %4528, %v2429_v54  }
  0x87   : > { %2286 = vperm.xlu1 %4524, %v5159_v34   ;;  %v3042_v34 = vld [vmem:[%s6349_s8 + $0x18] sm:$0xff] }
  0x88   : > { %4144 = vmatmul.mubr.msk.f32.gmra.mrb[28].mxu1 %vm603_vm0, %v5109_v4  ;;  %4198 = vmatmul.mubr.msk.f32.gmra.mrb[28].mxu0 %vm603_vm0, %v5109_v4 }
  0x89   : > { %4146 = vmatprep.mubr.msk.f32.mxu1 %vm603_vm0, %v5120_v17  ;;  %4200 = vmatprep.mubr.msk.f32.mxu0 %vm603_vm0, %v5120_v17 }
  0x8a   : > { %2553 = vperm.xlu0 %4528, %v2447_v55  }
  0x8b   : > { %4525 = vset.pattern.permute.xlu1 %v4602_v49 }
  0x8c   : > { %4147 = vmatmul.mubr.msk.f32.gmra.mrb[30].mxu1 %vm603_vm0, %v5140_v31  ;;  %4201 = vmatmul.mubr.msk.f32.gmra.mrb[30].mxu0 %vm603_vm0, %v5140_v31 }
  0x8d   : > { %4149 = vmatprep.mubr.msk.f32.mxu1 %vm603_vm0, %v4784_v22  ;;  %4203 = vmatprep.mubr.msk.f32.mxu0 %vm603_vm0, %v4784_v22 }
  0x8e   : > { %2193 = vperm.xlu1 %4525, %v5019_v50   ;;  %2473 = vperm.xlu0 %4528, %v2431_v58  }
  0x90   : > { %4150 = vmatmul.mubr.msk.f32.gmra.mrb[32].mxu1 %vm603_vm0, %v4868_v30  ;;  %4204 = vmatmul.mubr.msk.f32.gmra.mrb[32].mxu0 %vm603_vm0, %v4868_v30 }
  0x91   : > { %4152 = vmatprep.mubr.msk.f32.mxu1 %vm603_vm0, %v4883_v37  ;;  %4206 = vmatprep.mubr.msk.f32.mxu0 %vm603_vm0, %v4883_v37 }
  0x92   : > { %4526 = vset.pattern.permute.xlu1 %v4600_v23  ;;  %2563 = vperm.xlu0 %4528, %v2449_v63   ;;  %v2451_v23 = vld [vmem:[%s6347_s6 + $0xb0] sm:$0xff] }
  0x93   : > { %2238 = vperm.xlu1 %4526, %v5019_v50   ;;  %v2328_v50 = vld [vmem:[%s6345_s4 + $0x18] sm:$0xff] }
  0x94   : > { %4153 = vmatmul.mubr.msk.f32.gmra.mrb[34].mxu1 %vm603_vm0, %v4909_v52  ;;  %4207 = vmatmul.mubr.msk.f32.gmra.mrb[34].mxu0 %vm603_vm0, %v4909_v52 }
  0x95   : > { %4155 = vmatprep.mubr.msk.f32.mxu1 %vm603_vm0, %v4924_v60  ;;  %4209 = vmatprep.mubr.msk.f32.mxu0 %vm603_vm0, %v4924_v60 }
  0x96   : > { %2483 = vperm.xlu0 %4528, %v2433_v0  }
  0x97   : > { %2242 = vperm.xlu1 %4526, %v5187_v2  }
  0x98   : > { %4156 = vmatmul.mubr.msk.f32.gmra.mrb[36].mxu1 %vm603_vm0, %v4952_v11  ;;  %4210 = vmatmul.mubr.msk.f32.gmra.mrb[36].mxu0 %vm603_vm0, %v4952_v11 }
  0x99   : > { %4158 = vmatprep.mubr.msk.f32.mxu1 %vm603_vm0, %v4964_v16  ;;  %4212 = vmatprep.mubr.msk.f32.mxu0 %vm603_vm0, %v4964_v16 }
  0x9a   : > { %2573 = vperm.xlu0 %4528, %v2451_v23   ;;  %v3053_v23 = vld [vmem:[%s6349_s8 + $0x70] sm:$0xff] }
  0x9b   : > { %4527 = vset.pattern.permute.xlu1 %v4602_v49 }
  0x9c   : > { %4159 = vmatmul.mubr.msk.f32.gmra.mrb[38].mxu1 %vm603_vm0, %v4995_v41  ;;  %4213 = vmatmul.mubr.msk.f32.gmra.mrb[38].mxu0 %vm603_vm0, %v4995_v41 }
  0x9d   : > { %4161 = vmatprep.mubr.msk.f32.mxu1 %vm603_vm0, %v5008_v45  ;;  %4215 = vmatprep.mubr.msk.f32.mxu0 %vm603_vm0, %v5008_v45 }
  0x9e   : > { %2350 = vperm.xlu1 %4527, %v2328_v50   ;;  %2493 = vperm.xlu0 %4528, %v2435_v5  }
  0xa0   : > { %4162 = vmatmul.mubr.msk.f32.gmra.mrb[40].mxu1 %vm603_vm0, %v5041_v57  ;;  %4216 = vmatmul.mubr.msk.f32.gmra.mrb[40].mxu0 %vm603_vm0, %v5041_v57 }
  0xa1   : > { %4164 = vmatprep.mubr.msk.f32.mxu1 %vm603_vm0, %v5052_v62  ;;  %4218 = vmatprep.mubr.msk.f32.mxu0 %vm603_vm0, %v5052_v62 }
  0xa2   : > { %4529 = vset.pattern.permute.xlu1 %v4601_v26  ;;  %2583 = vperm.xlu0 %4528, %v2453_v8   ;;  %v2329_v26 = vld [vmem:[%s6345_s4 + $0x20] sm:$0xff] }
  0xa3   : > { %2294 = vperm.xlu1 %4529, %v5187_v2   ;;  %v3046_v2 = vld [vmem:[%s6349_s8 + $0x38] sm:$0xff] }
  0xa4   : > { %4165 = vmatmul.mubr.msk.f32.gmra.mrb[42].mxu1 %vm603_vm0, %v5077_v3  ;;  %4219 = vmatmul.mubr.msk.f32.gmra.mrb[42].mxu0 %vm603_vm0, %v5077_v3 }
  0xa5   : > { %4167 = vmatprep.mubr.msk.f32.mxu1 %vm603_vm0, %v5088_v7  ;;  %4221 = vmatprep.mubr.msk.f32.mxu0 %vm603_vm0, %v5088_v7 }
  0xa6   : > { %2503 = vperm.xlu0 %4528, %v2437_v9  }
  0xa7   : > { %4530 = vset.pattern.permute.xlu1 %v4602_v49  ;;  %v2332_v49 = vld [vmem:[%s6345_s4 + $0x38] sm:$0xff] }
  0xa8   : > { %4168 = vmatmul.mubr.msk.f32.gmra.mrb[44].mxu1 %vm603_vm0, %v5114_v27  ;;  %4222 = vmatmul.mubr.msk.f32.gmra.mrb[44].mxu0 %vm603_vm0, %v5114_v27 }
  0xa9   : > { %4170 = vmatprep.mubr.msk.f32.mxu1 %vm603_vm0, %v5125_v19  ;;  %4224 = vmatprep.mubr.msk.f32.mxu0 %vm603_vm0, %v5125_v19 }
  0xaa   : > { %2355 = vperm.xlu1 %4530, %v2329_v26   ;;  %2593 = vperm.xlu0 %4528, %v2455_v12   ;;  %v3054_v26 = vld [vmem:[%s6349_s8 + $0x78] sm:$0xff] }
  0xac   : > { %4171 = vmatmul.mubr.msk.f32.gmra.mrb[46].mxu1 %vm603_vm0, %v5145_v13  ;;  %4225 = vmatmul.mubr.msk.f32.gmra.mrb[46].mxu0 %vm603_vm0, %v5145_v13 }
  0xad   : > { %4233 = vmatprep.mubr.msk.f32.mxu1 %vm603_vm0, %v4776_v21  ;;  %4287 = vmatprep.mubr.msk.f32.mxu0 %vm603_vm0, %v4776_v21  ;;  %v2446_v21 = vld [vmem:[%s6347_s6 + $0x88] sm:$0xff] }
  0xae   : > { %2365 = vperm.xlu1 %4530, %v2331_v14   ;;  %2513 = vperm.xlu0 %4528, %v2439_v20  }
  0xb0   : > { %4234 = vmatmul.mubr.msk.f32.vlgmr.msra.gmra.mrb[48].mxu1 %vm603_vm0, %v4863_v28  ;;  %4288 = vmatmul.mubr.msk.f32.vlgmr.msra.gmra.mrb[48].mxu0 %vm603_vm0, %v4863_v28  ;;  %v2441_v28 = vld [vmem:[%s6347_s6 + $0x60] sm:$0xff] }
  0xb1   : > { %4236 = vmatprep.mubr.msk.f32.mxu1 %vm603_vm0, %v4878_v36  ;;  %4290 = vmatprep.mubr.msk.f32.mxu0 %vm603_vm0, %v4878_v36  ;;  %v2430_v36 = vld [vmem:[%s6347_s6 + $0x8] sm:$0xff] }
  0xb2   : > { %2370 = vperm.xlu1 %4530, %v2332_v49   ;;  %2603 = vperm.xlu0 %4528, %v2457_v25  }
  0xb4   : > { %4237 = vmatmul.mubr.msk.f32.gmra.mrb[50].mxu1 %vm603_vm0, %v4897_v47  ;;  %4291 = vmatmul.mubr.msk.f32.gmra.mrb[50].mxu0 %vm603_vm0, %v4897_v47  ;;  %v2459_v47 = vld [vmem:[%s6347_s6 + $0xf0] sm:$0xff] }
  0xb5   : > { %4239 = vmatprep.mubr.msk.f32.mxu1 %vm603_vm0, %v4919_v59  ;;  %4293 = vmatprep.mubr.msk.f32.mxu0 %vm603_vm0, %v4919_v59  ;;  %v2448_v59 = vld [vmem:[%s6347_s6 + $0x98] sm:$0xff] }
  0xb6   : > { %2548 = vperm.xlu1 %4530, %v2446_v21   ;;  %2523 = vperm.xlu0 %4528, %v2441_v28   ;;  %v3325_v21 = vld [vmem:[%s6350_s9 + $0x68] sm:$0xff] }
  0xb8   : > { %4240 = vmatmul.mubr.msk.f32.gmra.mrb[52].mxu1 %vm603_vm0, %v4947_v10  ;;  %4294 = vmatmul.mubr.msk.f32.gmra.mrb[52].mxu0 %vm603_vm0, %v4947_v10  ;;  %v2443_v10 = vld [vmem:[%s6347_s6 + $0x70] sm:$0xff] }
  0xb9   : > { %4242 = vmatprep.mubr.msk.f32.mxu1 %vm603_vm0, %v4959_v15  ;;  %4296 = vmatprep.mubr.msk.f32.mxu0 %vm603_vm0, %v4959_v15  ;;  %v2432_v15 = vld [vmem:[%s6347_s6 + $0x18] sm:$0xff] }
  0xba   : > { %2468 = vperm.xlu1 %4530, %v2430_v36   ;;  %2613 = vperm.xlu0 %4528, %v2459_v47   ;;  %v5650_v54 = vpop.permute.xlu1 %2214 }
  0xbc   : > { %4243 = vmatmul.mubr.msk.f32.gmra.mrb[54].mxu1 %vm603_vm0, %v4990_v40  ;;  %4297 = vmatmul.mubr.msk.f32.gmra.mrb[54].mxu0 %vm603_vm0, %v4990_v40  ;;  %v3039_v40 = vld [vmem:[%s6349_s8] sm:$0xff] }
  0xbd   : > { %4245 = vmatprep.mubr.msk.f32.mxu1 %vm603_vm0, %v5003_v44  ;;  %4299 = vmatprep.mubr.msk.f32.mxu0 %vm603_vm0, %v5003_v44  ;;  %v2450_v44 = vld [vmem:[%s6347_s6 + $0xa8] sm:$0xff] }
  0xbe   : > { %2558 = vperm.xlu1 %4530, %v2448_v59   ;;  %2533 = vperm.xlu0 %4528, %v2443_v10   ;;  %v5658_v12 = vpop.permute.xlu1 %2218  ;;  %v3327_v10 = vld [vmem:[%s6350_s9 + $0x78] sm:$0xff] }
  0xc0   : > { %4246 = vmatmul.mubr.msk.f32.gmra.mrb[56].mxu1 %vm603_vm0, %v5036_v56  ;;  %4300 = vmatmul.mubr.msk.f32.gmra.mrb[56].mxu0 %vm603_vm0, %v5036_v56  ;;  %v3041_v56 = vld [vmem:[%s6349_s8 + $0x10] sm:$0xff] }
  0xc1   : > { %4248 = vmatprep.mubr.msk.f32.mxu1 %vm603_vm0, %v5047_v61  ;;  %4302 = vmatprep.mubr.msk.f32.mxu0 %vm603_vm0, %v5047_v61  ;;  %v2434_v61 = vld [vmem:[%s6347_s6 + $0x28] sm:$0xff] }
  0xc2   : > { %2478 = vperm.xlu1 %4530, %v2432_v15   ;;  %3057 = vperm.xlu0 %4528, %v3039_v40  }
  0xc3   : > { %v5666_v15 = vpop.permute.xlu1 %2270 }
  0xc4   : > { %4249 = vmatmul.mubr.msk.f32.gmra.mrb[58].mxu1 %vm603_vm0, %v5072_v1  ;;  %4303 = vmatmul.mubr.msk.f32.gmra.mrb[58].mxu0 %vm603_vm0, %v5072_v1  ;;  %v3043_v1 = vld [vmem:[%s6349_s8 + $0x20] sm:$0xff] }
  0xc5   : > { %4251 = vmatprep.mubr.msk.f32.mxu1 %vm603_vm0, %v5083_v6  ;;  %4305 = vmatprep.mubr.msk.f32.mxu0 %vm603_vm0, %v5083_v6  ;;  %v2452_v6 = vld [vmem:[%s6347_s6 + $0xb8] sm:$0xff] }
  0xc6   : > { %2568 = vperm.xlu1 %4530, %v2450_v44   ;;  %3067 = vperm.xlu0 %4528, %v3041_v56  }
  0xc8   : > { %4252 = vmatmul.mubr.msk.f32.gmra.mrb[60].mxu1 %vm603_vm0, %v5109_v4  ;;  %4306 = vmatmul.mubr.msk.f32.gmra.mrb[60].mxu0 %vm603_vm0, %v5109_v4  ;;  %v3313_v4 = vld [vmem:[%s6350_s9 + $0x8] sm:$0xff] }
  0xc9   : > { %4254 = vmatprep.mubr.msk.f32.mxu1 %vm603_vm0, %v5120_v17  ;;  %4308 = vmatprep.mubr.msk.f32.mxu0 %vm603_vm0, %v5120_v17  ;;  %v2436_v17 = vld [vmem:[%s6347_s6 + $0x38] sm:$0xff] }
  0xca   : > { %2488 = vperm.xlu1 %4530, %v2434_v61   ;;  %3077 = vperm.xlu0 %4528, %v3043_v1  }
  0xcc   : > { %4255 = vmatmul.mubr.msk.f32.gmra.mrb[62].mxu1 %vm603_vm0, %v5140_v31  ;;  %4309 = vmatmul.mubr.msk.f32.gmra.mrb[62].mxu0 %vm603_vm0, %v5140_v31  ;;  %v3314_v31 = vld [vmem:[%s6350_s9 + $0x10] sm:$0xff] }
  0xcd   : > { %4257 = vmatprep.mubr.msk.f32.mxu1 %vm603_vm0, %v4784_v22  ;;  %4311 = vmatprep.mubr.msk.f32.mxu0 %vm603_vm0, %v4784_v22  ;;  %v2454_v22 = vld [vmem:[%s6347_s6 + $0xc8] sm:$0xff] }
  0xce   : > { %2578 = vperm.xlu1 %4530, %v2452_v6   ;;  %3335 = vperm.xlu0 %4528, %v3313_v4  }
  0xd0   : > { %4258 = vmatmul.mubr.msk.f32.gmra.mrb[64].mxu1 %vm603_vm0, %v4868_v30  ;;  %4312 = vmatmul.mubr.msk.f32.gmra.mrb[64].mxu0 %vm603_vm0, %v4868_v30  ;;  %v3315_v30 = vld [vmem:[%s6350_s9 + $0x18] sm:$0xff] }
  0xd1   : > { %4260 = vmatprep.mubr.msk.f32.mxu1 %vm603_vm0, %v4883_v37  ;;  %4314 = vmatprep.mubr.msk.f32.mxu0 %vm603_vm0, %v4883_v37  ;;  %v2438_v37 = vld [vmem:[%s6347_s6 + $0x48] sm:$0xff] }
  0xd2   : > { %2498 = vperm.xlu1 %4530, %v2436_v17   ;;  %3340 = vperm.xlu0 %4528, %v3314_v31  }
  0xd4   : > { %4261 = vmatmul.mubr.msk.f32.gmra.mrb[66].mxu1 %vm603_vm0, %v4909_v52  ;;  %4315 = vmatmul.mubr.msk.f32.gmra.mrb[66].mxu0 %vm603_vm0, %v4909_v52  ;;  %v3316_v52 = vld [vmem:[%s6350_s9 + $0x20] sm:$0xff] }
  0xd5   : > { %4263 = vmatprep.mubr.msk.f32.mxu1 %vm603_vm0, %v4924_v60  ;;  %4317 = vmatprep.mubr.msk.f32.mxu0 %vm603_vm0, %v4924_v60  ;;  %v2456_v60 = vld [vmem:[%s6347_s6 + $0xd8] sm:$0xff] }
  0xd6   : > { %2588 = vperm.xlu1 %4530, %v2454_v22   ;;  %3345 = vperm.xlu0 %4528, %v3315_v30  }
  0xd8   : > { %4264 = vmatmul.mubr.msk.f32.gmra.mrb[68].mxu1 %vm603_vm0, %v4952_v11  ;;  %4318 = vmatmul.mubr.msk.f32.gmra.mrb[68].mxu0 %vm603_vm0, %v4952_v11  ;;  %v3317_v11 = vld [vmem:[%s6350_s9 + $0x28] sm:$0xff] }
  0xd9   : > { %4266 = vmatprep.mubr.msk.f32.mxu1 %vm603_vm0, %v4964_v16  ;;  %4320 = vmatprep.mubr.msk.f32.mxu0 %vm603_vm0, %v4964_v16  ;;  %v2440_v16 = vld [vmem:[%s6347_s6 + $0x58] sm:$0xff] }
  0xda   : > { %2508 = vperm.xlu1 %4530, %v2438_v37   ;;  %3350 = vperm.xlu0 %4528, %v3316_v52  }
  0xdc   : > { %4267 = vmatmul.mubr.msk.f32.gmra.mrb[70].mxu1 %vm603_vm0, %v4995_v41  ;;  %4321 = vmatmul.mubr.msk.f32.gmra.mrb[70].mxu0 %vm603_vm0, %v4995_v41  ;;  %v3318_v41 = vld [vmem:[%s6350_s9 + $0x30] sm:$0xff] }
  0xdd   : > { %4269 = vmatprep.mubr.msk.f32.mxu1 %vm603_vm0, %v5008_v45  ;;  %4323 = vmatprep.mubr.msk.f32.mxu0 %vm603_vm0, %v5008_v45  ;;  %v2458_v45 = vld [vmem:[%s6347_s6 + $0xe8] sm:$0xff] }
  0xde   : > { %2598 = vperm.xlu1 %4530, %v2456_v60   ;;  %3355 = vperm.xlu0 %4528, %v3317_v11  }
  0xe0   : > { %4270 = vmatmul.mubr.msk.f32.gmra.mrb[72].mxu1 %vm603_vm0, %v5041_v57  ;;  %4324 = vmatmul.mubr.msk.f32.gmra.mrb[72].mxu0 %vm603_vm0, %v5041_v57  ;;  %v3319_v57 = vld [vmem:[%s6350_s9 + $0x38] sm:$0xff] }
  0xe1   : > { %4272 = vmatprep.mubr.msk.f32.mxu1 %vm603_vm0, %v5052_v62  ;;  %4326 = vmatprep.mubr.msk.f32.mxu0 %vm603_vm0, %v5052_v62  ;;  %v2442_v62 = vld [vmem:[%s6347_s6 + $0x68] sm:$0xff] }
  0xe2   : > { %2518 = vperm.xlu1 %4530, %v2440_v16   ;;  %3360 = vperm.xlu0 %4528, %v3318_v41  }
  0xe4   : > { %4273 = vmatmul.mubr.msk.f32.gmra.mrb[74].mxu1 %vm603_vm0, %v5077_v3  ;;  %4327 = vmatmul.mubr.msk.f32.gmra.mrb[74].mxu0 %vm603_vm0, %v5077_v3  ;;  %v3320_v3 = vld [vmem:[%s6350_s9 + $0x40] sm:$0xff] }
  0xe5   : > { %4275 = vmatprep.mubr.msk.f32.mxu1 %vm603_vm0, %v5088_v7  ;;  %4329 = vmatprep.mubr.msk.f32.mxu0 %vm603_vm0, %v5088_v7  ;;  %v2460_v7 = vld [vmem:[%s6347_s6 + $0xf8] sm:$0xff] }
  0xe6   : > { %2608 = vperm.xlu1 %4530, %v2458_v45   ;;  %3365 = vperm.xlu0 %4528, %v3319_v57  }
  0xe8   : > { %4276 = vmatmul.mubr.msk.f32.gmra.mrb[76].mxu1 %vm603_vm0, %v5114_v27  ;;  %4330 = vmatmul.mubr.msk.f32.gmra.mrb[76].mxu0 %vm603_vm0, %v5114_v27  ;;  %v3321_v27 = vld [vmem:[%s6350_s9 + $0x48] sm:$0xff] }
  0xe9   : > { %4278 = vmatprep.mubr.msk.f32.mxu1 %vm603_vm0, %v5125_v19  ;;  %4332 = vmatprep.mubr.msk.f32.mxu0 %vm603_vm0, %v5125_v19  ;;  %v2444_v19 = vld [vmem:[%s6347_s6 + $0x78] sm:$0xff] }
  0xea   : > { %2528 = vperm.xlu1 %4530, %v2442_v62   ;;  %3370 = vperm.xlu0 %4528, %v3320_v3  }
  0xec   : > { %4279 = vmatmul.mubr.msk.f32.gmra.mrb[78].mxu1 %vm603_vm0, %v5145_v13  ;;  %4333 = vmatmul.mubr.msk.f32.gmra.mrb[78].mxu0 %vm603_vm0, %v5145_v13  ;;  %v3040_v13 = vld [vmem:[%s6349_s8 + $0x8] sm:$0xff] }
  0xee   : > { %2618 = vperm.xlu1 %4530, %v2460_v7   ;;  %3375 = vperm.xlu0 %4528, %v3321_v27  }
  0xf2   : > { %2538 = vperm.xlu1 %4530, %v2444_v19   ;;  %3380 = vperm.xlu0 %4528, %v3322_v29  }
  0xf6   : > { %3062 = vperm.xlu1 %4530, %v3040_v13   ;;  %3385 = vperm.xlu0 %4528, %v3323_v32  }
  0xfa   : > { %3072 = vperm.xlu1 %4530, %v3042_v34   ;;  %3390 = vperm.xlu0 %4528, %v3324_v35  }
  0xfe   : > { %3330 = vperm.xlu1 %4530, %v3312_v38   ;;  %3400 = vperm.xlu0 %4528, %v3326_v39  }
 0x102   : > { %3082 = vperm.xlu1 %4530, %v3044_v42   ;;  %3448 = vperm.xlu0 %4528, %v3445_v43  }
 0x106   : > { %3087 = vperm.xlu1 %4530, %v3045_v46  }
 0x10a   : > { %3092 = vperm.xlu1 %4530, %v3046_v2  }
 0x10e   : > { %3097 = vperm.xlu1 %4530, %v3047_v18  }
 0x112   : > { %3102 = vperm.xlu1 %4530, %v3048_v48  }
 0x116   : > { %3107 = vperm.xlu1 %4530, %v3049_v33  }
 0x11a   : > { %3112 = vperm.xlu1 %4530, %v3050_v51  }
 0x11e   : > { %3117 = vperm.xlu1 %4530, %v3051_v24  }
 0x122   : > { %3122 = vperm.xlu1 %4530, %v3052_v53  }
 0x123   : > { %v4097_v55 = vpop.f32.mrb[0].mxu1  ;;  %v4073_v58 = vpop.f32.mrb[0].mxu0 }
 0x124   : > { %v846_v63 = vpop.f32.mrb[1].mxu1  ;;  %v766_v0 = vpop.f32.mrb[1].mxu0 }
 0x126   : > { %3127 = vperm.xlu1 %4530, %v3053_v23  }
 0x127   : > { %v4100_v50 = vpop.f32.mrb[2].mxu1  ;;  %v4076_v5 = vpop.f32.mrb[2].mxu0 }
 0x128   : > { %v856_v8 = vpop.f32.mrb[3].mxu1  ;;  %v776_v9 = vpop.f32.mrb[3].mxu0 }
 0x12a   : > { %3132 = vperm.xlu1 %4530, %v3054_v26  }
 0x12b   : > { %v4103_v14 = vpop.f32.mrb[4].mxu1  ;;  %v4079_v20 = vpop.f32.mrb[4].mxu0 }
 0x12c   : > { %v866_v49 = vpop.f32.mrb[5].mxu1  ;;  %v786_v25 = vpop.f32.mrb[5].mxu0 }
 0x12e   : > { %3395 = vperm.xlu1 %4530, %v3325_v21  }
 0x12f   : > { %v4106_v28 = vpop.f32.mrb[6].mxu1  ;;  %v4082_v36 = vpop.f32.mrb[6].mxu0 }
 0x130   : > { %v876_v47 = vpop.f32.mrb[7].mxu1  ;;  %v796_v59 = vpop.f32.mrb[7].mxu0 }
 0x132   : > { %3405 = vperm.xlu1 %4530, %v3327_v10   ;;  %v2397_v10 = vld [vmem:[%s6346_s5] sm:$0xff] }
 0x133   : > { %v4085_v40 = vpop.f32.mrb[8].mxu0  ;;  %v5668_v44 = vpop.f32.mrb[8].mxu1  ;;  %4351 = vmatprep.mubr.msk.f32.mxu1 %vm2621_vm8, %v2397_v10 }
 0x134   : > { %v926_v56 = vmax.f32 %v4073_v58, %v4085_v40  ;;  %v806_v61 = vpop.f32.mrb[9].mxu0  ;;  %v5670_v1 = vpop.f32.mrb[9].mxu1 }
 0x135   : > { %v925_v6 = vmax.f32 %v766_v0, %v806_v61 }
 0x136   : > { %v5672_v4 = vmax.f32 %v926_v56, %v4097_v55 }
 0x137   : > { %v5674_v17 = vmax.f32 %v925_v6, %v846_v63  ;;  %v4088_v31 = vpop.f32.mrb[10].mxu0  ;;  %v5676_v22 = vpop.f32.mrb[10].mxu1 }
 0x138   : > { %v942_v30 = vmax.f32 %v5672_v4, %v5668_v44  ;;  %v928_v37 = vmax.f32 %v4076_v5, %v4088_v31  ;;  %v816_v52 = vpop.f32.mrb[11].mxu0  ;;  %v5680_v60 = vpop.f32.mrb[11].mxu1 }
 0x139   : > { %v941_v11 = vmax.f32 %v5674_v17, %v5670_v1  ;;  %v927_v16 = vmax.f32 %v776_v9, %v816_v52 }
 0x13a   : > { %v5684_v41 = vmax.f32 %v928_v37, %v4100_v50 }
 0x13b   : > { %v5686_v45 = vmax.f32 %v927_v16, %v856_v8  ;;  %v4091_v57 = vpop.f32.mrb[12].mxu0  ;;  %v5688_v62 = vpop.f32.mrb[12].mxu1 }
 0x13c   : > { %v944_v3 = vmax.f32 %v5684_v41, %v5676_v22  ;;  %v930_v7 = vmax.f32 %v4079_v20, %v4091_v57  ;;  %v826_v27 = vpop.f32.mrb[13].mxu0  ;;  %v5692_v19 = vpop.f32.mrb[13].mxu1 }
 0x13d   : > { %v943_v29 = vmax.f32 %v5686_v45, %v5680_v60  ;;  %v929_v13 = vmax.f32 %v786_v25, %v826_v27  ;;  %v5720_v8 = vpop.permute.xlu1 %2173 }
 0x13e   : > { %v5696_v32 = vmax.f32 %v930_v7, %v4103_v14 }
 0x13f   : > { %v5698_v34 = vmax.f32 %v929_v13, %v866_v49  ;;  %v4094_v35 = vpop.f32.mrb[14].mxu0  ;;  %v5700_v38 = vpop.f32.mrb[14].mxu1 }
 0x140   : > { %v932_v42 = vmax.f32 %v4082_v36, %v4094_v35  ;;  %v836_v43 = vpop.f32.mrb[15].mxu0  ;;  %v5704_v46 = vpop.f32.mrb[15].mxu1  ;;  %v6359_v22 = vmax.f32 %v5696_v32, %v5688_v62 }
 0x141   : > { %v931_v18 = vmax.f32 %v796_v59, %v836_v43  ;;  %v5738_v36 = vpop.permute.xlu1 %2222  ;;  %v6360_v60 = vmax.f32 %v5698_v34, %v5692_v19 }
 0x142   : > { %v5708_v48 = vmax.f32 %v932_v42, %v4106_v28 }
 0x143   : > { %v5710_v33 = vmax.f32 %v931_v18, %v876_v47  ;;  %v4127_v51 = vpop.f32.mrb[16].mxu1  ;;  %v4181_v24 = vpop.f32.mrb[16].mxu0 }
 0x144   : > { %v1059_v55 = vpop.f32.mrb[17].mxu1  ;;  %v1360_v58 = vpop.f32.mrb[17].mxu0  ;;  %v6361_v62 = vmax.f32 %v5708_v48, %v5700_v38 }
 0x145   : > { %v5746_v43 = vpop.permute.xlu1 %2226  ;;  %v6362_v19 = vmax.f32 %v5710_v33, %v5704_v46 }
 0x147   : > { %v4130_v0 = vpop.f32.mrb[18].mxu1  ;;  %v4184_v23 = vpop.f32.mrb[18].mxu0 }
 0x148   : > { %v5716_v50 = vpop.f32.mrb[19].mxu1  ;;  %v5718_v5 = vpop.f32.mrb[19].mxu0 }
 0x14b   : > { %v5722_v9 = vpop.f32.mrb[20].mxu1  ;;  %v5724_v26 = vpop.f32.mrb[20].mxu0 }
 0x14c   : > { %v5726_v14 = vpop.f32.mrb[21].mxu1  ;;  %v5728_v20 = vpop.f32.mrb[21].mxu0 }
 0x14f   : > { %v5730_v49 = vpop.f32.mrb[22].mxu1  ;;  %v5732_v25 = vpop.f32.mrb[22].mxu0 }
 0x150   : > { %v5734_v21 = vpop.f32.mrb[23].mxu1  ;;  %v5736_v28 = vpop.f32.mrb[23].mxu0 }
 0x153   : > { %v4139_v47 = vpop.f32.mrb[24].mxu1  ;;  %v4193_v59 = vpop.f32.mrb[24].mxu0 }
 0x154   : > { %v1219_v40 = vmax.f32 %v4127_v51, %v4139_v47  ;;  %v1520_v56 = vmax.f32 %v4181_v24, %v4193_v59  ;;  %v1099_v61 = vpop.f32.mrb[25].mxu1  ;;  %v1400_v6 = vpop.f32.mrb[25].mxu0 }
 0x155   : > { %v1218_v31 = vmax.f32 %v1059_v55, %v1099_v61  ;;  %v1519_v37 = vmax.f32 %v1360_v58, %v1400_v6 }
 0x157   : > { %v4142_v52 = vpop.f32.mrb[26].mxu1  ;;  %v4196_v16 = vpop.f32.mrb[26].mxu0 }
 0x158   : > { %v1221_v57 = vmax.f32 %v4130_v0, %v4142_v52  ;;  %v1522_v7 = vmax.f32 %v4184_v23, %v4196_v16  ;;  %v1109_v27 = vpop.f32.mrb[27].mxu1  ;;  %v1410_v13 = vpop.f32.mrb[27].mxu0 }
 0x159   : > { %v1220_v35 = vmax.f32 %v5716_v50, %v1109_v27  ;;  %v1521_v42 = vmax.f32 %v5718_v5, %v1410_v13  ;;  %v5756_v16 = vpop.permute.xlu1 %2278 }
 0x15b   : > { %v4145_v18 = vpop.f32.mrb[28].mxu1  ;;  %v4199_v51 = vpop.f32.mrb[28].mxu0 }
 0x15c   : > { %v1223_v24 = vmax.f32 %v5722_v9, %v4145_v18  ;;  %v1524_v47 = vmax.f32 %v5724_v26, %v4199_v51  ;;  %v1119_v55 = vpop.f32.mrb[29].mxu1  ;;  %v1420_v58 = vpop.f32.mrb[29].mxu0 }
 0x15d   : > { %v1222_v59 = vmax.f32 %v5726_v14, %v1119_v55  ;;  %v1523_v0 = vmax.f32 %v5728_v20, %v1420_v58 }
 0x15f   : > { %v4148_v23 = vpop.f32.mrb[30].mxu1  ;;  %v4202_v10 = vpop.f32.mrb[30].mxu0 }
 0x160   : > { %v1225_v50 = vmax.f32 %v5730_v49, %v4148_v23  ;;  %v1526_v5 = vmax.f32 %v5732_v25, %v4202_v10  ;;  %v1129_v61 = vpop.f32.mrb[31].mxu1  ;;  %v1430_v6 = vpop.f32.mrb[31].mxu0 }
 0x161   : > { %v1224_v52 = vmax.f32 %v5734_v21, %v1129_v61  ;;  %v1525_v9 = vmax.f32 %v5736_v28, %v1430_v6  ;;  %v5758_v61 = vpop.permute.xlu1 %2183 }
 0x163   : > { %v4151_v26 = vpop.f32.mrb[32].mxu1  ;;  %v4205_v27 = vpop.f32.mrb[32].mxu0 }
 0x164   : > { %v1227_v13 = vmax.f32 %v1219_v40, %v4151_v26  ;;  %v1528_v14 = vmax.f32 %v1520_v56, %v4205_v27  ;;  %v1139_v18 = vpop.f32.mrb[33].mxu1  ;;  %v1440_v20 = vpop.f32.mrb[33].mxu0 }
 0x165   : > { %v1226_v51 = vmax.f32 %v1218_v31, %v1139_v18  ;;  %v1527_v55 = vmax.f32 %v1519_v37, %v1440_v20  ;;  %v5760_v31 = vpop.permute.xlu0 %2266 }
 0x167   : > { %v4154_v58 = vpop.f32.mrb[34].mxu1  ;;  %v4208_v49 = vpop.f32.mrb[34].mxu0 }
 0x168   : > { %v1229_v23 = vmax.f32 %v1221_v57, %v4154_v58  ;;  %v1530_v25 = vmax.f32 %v1522_v7, %v4208_v49  ;;  %v1149_v10 = vpop.f32.mrb[35].mxu1  ;;  %v1450_v63 = vpop.f32.mrb[35].mxu0 }
 0x169   : > { %v1228_v53 = vmax.f32 %v1220_v35, %v1149_v10  ;;  %v1529_v21 = vmax.f32 %v1521_v42, %v1450_v63  ;;  %v5762_v42 = vpop.permute.xlu1 %2230 }
 0x16b   : > { %v4157_v28 = vpop.f32.mrb[36].mxu1  ;;  %v4211_v6 = vpop.f32.mrb[36].mxu0 }
 0x16c   : > { %v1231_v2 = vmax.f32 %v1223_v24, %v4157_v28  ;;  %v1532_v39 = vmax.f32 %v1524_v47, %v4211_v6  ;;  %v1159_v40 = vpop.f32.mrb[37].mxu1  ;;  %v1460_v56 = vpop.f32.mrb[37].mxu0 }
 0x16d   : > { %v1230_v26 = vmax.f32 %v1222_v59, %v1159_v40  ;;  %v1531_v27 = vmax.f32 %v1523_v0, %v1460_v56  ;;  %v5764_v40 = vpop.permute.xlu0 %2274 }
 0x16f   : > { %v4160_v37 = vpop.f32.mrb[38].mxu1  ;;  %v4214_v18 = vpop.f32.mrb[38].mxu0 }
 0x170   : > { %v1233_v57 = vmax.f32 %v1225_v50, %v4160_v37  ;;  %v1534_v7 = vmax.f32 %v1526_v5, %v4214_v18  ;;  %v1169_v20 = vpop.f32.mrb[39].mxu1  ;;  %v1470_v58 = vpop.f32.mrb[39].mxu0 }
 0x171   : > { %v1232_v35 = vmax.f32 %v1224_v52, %v1169_v20  ;;  %v1533_v63 = vmax.f32 %v1525_v9, %v1470_v58  ;;  %v5776_v58 = vpop.permute.xlu1 %2234 }
 0x173   : > { %v4163_v49 = vpop.f32.mrb[40].mxu1  ;;  %v4217_v10 = vpop.f32.mrb[40].mxu0 }
 0x174   : > { %v1235_v24 = vmax.f32 %v1227_v13, %v4163_v49  ;;  %v1536_v47 = vmax.f32 %v1528_v14, %v4217_v10  ;;  %v1179_v28 = vpop.f32.mrb[41].mxu1  ;;  %v1480_v6 = vpop.f32.mrb[41].mxu0 }
 0x175   : > { %v1234_v59 = vmax.f32 %v1226_v51, %v1179_v28  ;;  %v1535_v0 = vmax.f32 %v1527_v55, %v1480_v6 }
 0x176   : > { %v1243_v50 = vmax.f32 %v942_v30, %v1235_v24  ;;  %v5788_v24 = vpop.permute.xlu0 %2282 }
 0x177   : > { %v1242_v5 = vmax.f32 %v941_v11, %v1234_v59  ;;  %v4166_v52 = vpop.f32.mrb[42].mxu1  ;;  %v4220_v9 = vpop.f32.mrb[42].mxu0 }
 0x178   : > { %v5772_v56 = vmax.f32 %v1243_v50, %v1536_v47  ;;  %v1237_v13 = vmax.f32 %v1229_v23, %v4166_v52  ;;  %v1538_v14 = vmax.f32 %v1530_v25, %v4220_v9  ;;  %v1189_v37 = vpop.f32.mrb[43].mxu1  ;;  %v1490_v18 = vpop.f32.mrb[43].mxu0 }
 0x179   : > { %v5774_v51 = vmax.f32 %v1242_v5, %v1535_v0  ;;  %v1236_v55 = vmax.f32 %v1228_v53, %v1189_v37  ;;  %v1537_v20 = vmax.f32 %v1529_v21, %v1490_v18  ;;  %v5800_v0 = vpop.permute.xlu1 %2340 }
 0x17a   : > { %v1245_v44 = vmax.f32 %v944_v3, %v1237_v13  ;;  %v5820_v52 = vpop.permute.xlu0 %2290 }
 0x17b   : > { %v1244_v1 = vmax.f32 %v943_v29, %v1236_v55  ;;  %v4169_v4 = vpop.f32.mrb[44].mxu1  ;;  %v4223_v17 = vpop.f32.mrb[44].mxu0 }
 0x17c   : > { %v5784_v30 = vmax.f32 %v1245_v44, %v1538_v14  ;;  %v1239_v11 = vmax.f32 %v1231_v2, %v4169_v4  ;;  %v1540_v23 = vmax.f32 %v1532_v39, %v4223_v17  ;;  %v1199_v25 = vpop.f32.mrb[45].mxu1  ;;  %v1500_v49 = vpop.f32.mrb[45].mxu0 }
 0x17d   : > { %v5786_v53 = vmax.f32 %v1244_v1, %v1537_v20  ;;  %v1238_v21 = vmax.f32 %v1230_v26, %v1199_v25  ;;  %v1539_v10 = vmax.f32 %v1531_v27, %v1500_v49  ;;  %v5830_v9 = vpop.permute.xlu1 %2286 }
 0x17e   : > { %v1247_v41 = vmax.f32 %v6359_v22, %v1239_v11  ;;  %v5840_v55 = vpop.permute.xlu0 %2163 }
 0x17f   : > { %v1246_v45 = vmax.f32 %v6360_v60, %v1238_v21  ;;  %v4172_v3 = vpop.f32.mrb[46].mxu1  ;;  %v4226_v29 = vpop.f32.mrb[46].mxu0 }
 0x180   : > { %v5796_v2 = vmax.f32 %v1247_v41, %v1540_v23  ;;  %v1241_v39 = vmax.f32 %v1233_v57, %v4172_v3  ;;  %v1542_v47 = vmax.f32 %v1534_v7, %v4226_v29  ;;  %v1209_v28 = vpop.f32.mrb[47].mxu1  ;;  %v1510_v6 = vpop.f32.mrb[47].mxu0 }
 0x181   : > { %v5798_v26 = vmax.f32 %v1246_v45, %v1539_v10  ;;  %v1240_v27 = vmax.f32 %v1232_v35, %v1209_v28  ;;  %v1541_v59 = vmax.f32 %v1533_v63, %v1510_v6  ;;  %v5850_v17 = vpop.permute.xlu1 %2193 }
 0x182   : > { %v1249_v32 = vmax.f32 %v6361_v62, %v1241_v39  ;;  %v5856_v60 = vpop.permute.xlu0 %2168 }
 0x183   : > { %v1248_v34 = vmax.f32 %v6362_v19, %v1240_v27  ;;  %v5808_v50 = vpop.f32.mrb[48].mxu1  ;;  %v5810_v57 = vpop.f32.mrb[48].mxu0 }
 0x184   : > { %v5812_v7 = vmax.f32 %v1249_v32, %v1542_v47  ;;  %v5814_v5 = vpop.f32.mrb[49].mxu1  ;;  %v5816_v35 = vpop.f32.mrb[49].mxu0 }
 0x185   : > { %v5818_v63 = vmax.f32 %v1248_v34, %v1541_v59  ;;  %v5862_v59 = vpop.permute.xlu1 %2238 }
 0x186   : > { %6363 = vst [vmem:[#allocation7_spill] sm:$0xff] %v5812_v7 }
 0x187   : > { %6364 = vst [vmem:[#allocation8_spill] sm:$0xff] %v5818_v63  ;;  %v5822_v38 = vpop.f32.mrb[50].mxu1  ;;  %v5824_v48 = vpop.f32.mrb[50].mxu0 }
 0x188   : > { %v5826_v46 = vpop.f32.mrb[51].mxu1  ;;  %v5828_v33 = vpop.f32.mrb[51].mxu0 }
 0x18b   : > { %v5832_v13 = vpop.f32.mrb[52].mxu1  ;;  %v5834_v14 = vpop.f32.mrb[52].mxu0 }
 0x18c   : > { %v5836_v37 = vpop.f32.mrb[53].mxu1  ;;  %v5838_v18 = vpop.f32.mrb[53].mxu0 }
 0x18f   : > { %v5842_v20 = vpop.f32.mrb[54].mxu1  ;;  %v5844_v44 = vpop.f32.mrb[54].mxu0 }
 0x190   : > { %v5846_v1 = vpop.f32.mrb[55].mxu1  ;;  %v5848_v4 = vpop.f32.mrb[55].mxu0 }
 0x193   : > { %v4247_v11 = vpop.f32.mrb[56].mxu1  ;;  %v4301_v23 = vpop.f32.mrb[56].mxu0 }
 0x194   : > { %v1821_v25 = vmax.f32 %v5808_v50, %v4247_v11  ;;  %v2122_v49 = vmax.f32 %v5810_v57, %v4301_v23  ;;  %v1701_v21 = vpop.f32.mrb[57].mxu1  ;;  %v2002_v10 = vpop.f32.mrb[57].mxu0 }
 0x195   : > { %v1820_v22 = vmax.f32 %v5814_v5, %v1701_v21  ;;  %v2121_v41 = vmax.f32 %v5816_v35, %v2002_v10  ;;  %v2201_v5 = vlaneseq }
 0x197   : > { %v4250_v45 = vpop.f32.mrb[58].mxu1  ;;  %v4304_v3 = vpop.f32.mrb[58].mxu0 }
 0x198   : > { %v1823_v29 = vmax.f32 %v5822_v38, %v4250_v45  ;;  %v2124_v39 = vmax.f32 %v5824_v48, %v4304_v3  ;;  %v1711_v47 = vpop.f32.mrb[59].mxu1  ;;  %v2012_v28 = vpop.f32.mrb[59].mxu0  ;;  %v5870_v45 = vshrl.u32 %v2201_v5, 7 }
 0x199   : > { %v1822_v6 = vmax.f32 %v5826_v46, %v1711_v47  ;;  %v2123_v27 = vmax.f32 %v5828_v33, %v2012_v28  ;;  %v2179_v48 = vpop.permute.xlu0 %2178  ;;  %v5874_v3 = vpop.permute.xlu1 %2242 }
 0x19a   : > { %6365 = vst [vmem:[#allocation9_spill] sm:$0xff] %v5870_v45 }
 0x19b   : > { %v4253_v62 = vpop.f32.mrb[60].mxu1  ;;  %v4307_v32 = vpop.f32.mrb[60].mxu0 }
 0x19c   : > { %v1825_v19 = vmax.f32 %v5832_v13, %v4253_v62  ;;  %v2126_v34 = vmax.f32 %v5834_v14, %v4307_v32  ;;  %v1721_v50 = vpop.f32.mrb[61].mxu1  ;;  %v2022_v57 = vpop.f32.mrb[61].mxu0  ;;  %v6353_v32 = vsub.s32 0, %v5870_v45 }
 0x19d   : > { %v1824_v35 = vmax.f32 %v5836_v37, %v1721_v50  ;;  %v2125_v38 = vmax.f32 %v5838_v18, %v2022_v57  ;;  %v2299_v57 = vsub.s32 2, %v5870_v45 }
 0x19f   : > { %v4256_v11 = vpop.f32.mrb[62].mxu1  ;;  %v4310_v46 = vpop.f32.mrb[62].mxu0 }
 0x1a0   : > { %v1827_v33 = vmax.f32 %v5842_v20, %v4256_v11  ;;  %v2128_v23 = vmax.f32 %v5844_v44, %v4310_v46  ;;  %v1731_v21 = vpop.f32.mrb[63].mxu1  ;;  %v2032_v10 = vpop.f32.mrb[63].mxu0  ;;  %v2247_v44 = vsub.s32 1, %v5870_v45 }
 0x1a1   : > { %v1826_v13 = vmax.f32 %v5846_v1, %v1731_v21  ;;  %v2127_v14 = vmax.f32 %v5848_v4, %v2032_v10  ;;  %v2189_v4 = vpop.permute.xlu0 %2188  ;;  %v4535_v10 = vld [vmem:[%s4797_s25] sm:$0x7]  ;;  %s3464_s25 = scalar_lea.sflag [#allocation5], %s4769_s18 }
 0x1a3   : > { %v4259_v37 = vpop.f32.mrb[64].mxu1  ;;  %v4313_v47 = vpop.f32.mrb[64].mxu0 }
 0x1a4   : > { %v5876_v18 = vmax.f32 %v1821_v25, %v4259_v37  ;;  %v5878_v28 = vmax.f32 %v2122_v49, %v4313_v47  ;;  %v1741_v20 = vpop.f32.mrb[65].mxu1  ;;  %v2042_v62 = vpop.f32.mrb[65].mxu0  ;;  %v5892_v37 = vrot.slane %v4535_v10, %v2247_v44 }
 0x1a5   : > { %v5882_v50 = vmax.f32 %v1820_v22, %v1741_v20  ;;  %v5884_v1 = vmax.f32 %v2121_v41, %v2042_v62  ;;  %v5896_v22 = vrot.slane %v4535_v10, %v6353_v32  ;;  %v5902_v20 = vpop.permute.xlu1 %2350  ;;  %v5904_v62 = vrot.slane %v4535_v10, %v2299_v57 }
 0x1a6   : > { %v2249_v32 = vmul.f32 %v5892_v37, %v5650_v54  ;;  %v2250_v57 = vmul.f32 %v5892_v37, %v5658_v12  ;;  %v5926_v54 = vpop.permute.xlu0 %2335 }
 0x1a7   : > { %v4262_v5 = vpop.f32.mrb[66].mxu1  ;;  %v4316_v11 = vpop.f32.mrb[66].mxu0  ;;  %v2302_v12 = vmul.f32 %v5904_v62, %v5666_v15 }
 0x1a8   : > { %v5887_v25 = vmax.f32 %v1823_v29, %v4262_v5  ;;  %v5889_v46 = vmax.f32 %v2124_v39, %v4316_v11  ;;  %v1751_v49 = vpop.f32.mrb[67].mxu1  ;;  %v2052_v21 = vpop.f32.mrb[67].mxu0 }
 0x1a9   : > { %v5898_v41 = vmax.f32 %v1822_v6, %v1751_v49  ;;  %v5900_v47 = vmax.f32 %v2123_v27, %v2052_v21  ;;  %v2205_v6 = vmul.f32 %v5896_v22, %v5840_v55  ;;  %v2251_v21 = vmul.f32 %v5892_v37, %v5738_v36 }
 0x1aa   : > { %v2301_v55 = vmul.f32 %v5904_v62, %v5760_v31  ;;  %v2305_v31 = vmul.f32 %v5904_v62, %v5788_v24  ;;  %v2254_v24 = vmul.f32 %v5892_v37, %v5776_v58  ;;  %v2307_v58 = vmul.f32 %v5904_v62, %v5820_v52 }
 0x1ab   : > { %v4265_v29 = vpop.f32.mrb[68].mxu1  ;;  %v4319_v39 = vpop.f32.mrb[68].mxu0 }
 0x1ac   : > { %v5906_v5 = vmax.f32 %v1825_v19, %v4265_v29  ;;  %v5908_v11 = vmax.f32 %v2126_v34, %v4319_v39  ;;  %v1761_v44 = vpop.f32.mrb[69].mxu1  ;;  %v2062_v63 = vpop.f32.mrb[69].mxu0  ;;  %v2206_v19 = vmul.f32 %v5896_v22, %v5856_v60  ;;  %v2207_v34 = vmul.f32 %v5896_v22, %v5720_v8 }
 0x1ad   : > { %v5914_v27 = vmax.f32 %v1824_v35, %v1761_v44  ;;  %v5916_v49 = vmax.f32 %v2125_v38, %v2062_v63  ;;  %v2303_v63 = vmul.f32 %v5904_v62, %v5764_v40  ;;  %v2208_v60 = vmul.f32 %v5896_v22, %v2179_v48 }
 0x1ae   : > { %v2252_v8 = vmul.f32 %v5892_v37, %v5746_v43  ;;  %v2257_v40 = vadd.f32 %v2249_v32, %v2205_v6  ;;  %v2258_v45 = vadd.f32 %v2250_v57, %v2206_v19  ;;  %v2259_v7 = vadd.f32 %v2251_v21, %v2207_v34 }
 0x1af   : > { %v4268_v35 = vpop.f32.mrb[70].mxu1  ;;  %v4322_v38 = vpop.f32.mrb[70].mxu0  ;;  %v2209_v48 = vmul.f32 %v5896_v22, %v5758_v61  ;;  %v2253_v43 = vmul.f32 %v5892_v37, %v5762_v42  ;;  %v2304_v61 = vmul.f32 %v5904_v62, %v5756_v16 }
 0x1b0   : > { %v5937_v10 = vmax.f32 %v1827_v33, %v4268_v35  ;;  %v5939_v36 = vmax.f32 %v2128_v23, %v4322_v38  ;;  %v1771_v29 = vpop.f32.mrb[71].mxu1  ;;  %v2072_v39 = vpop.f32.mrb[71].mxu0  ;;  %v2210_v23 = vmul.f32 %v5896_v22, %v2189_v4  ;;  %v2260_v57 = vadd.f32 %v2252_v8, %v2208_v60 }
 0x1b1   : > { %v5943_v44 = vmax.f32 %v1826_v13, %v1771_v29  ;;  %v5945_v15 = vmax.f32 %v2127_v14, %v2072_v39  ;;  %v5951_v33 = vpop.permute.xlu1 %2294  ;;  %v2211_v13 = vmul.f32 %v5896_v22, %v5850_v17  ;;  %v2255_v14 = vmul.f32 %v5892_v37, %v5862_v59  ;;  %v2199_v60 = vpop.permute.xlu0 %2198 }
 0x1b2   : > { %v2309_v21 = vadd.f32 %v2301_v55, %v2257_v40  ;;  %v2310_v35 = vadd.f32 %v2302_v12, %v2258_v45  ;;  %v2311_v38 = vadd.f32 %v2303_v63, %v2259_v7  ;;  %v2261_v8 = vadd.f32 %v2253_v43, %v2209_v48 }
 0x1b3   : > { %v4271_v32 = vpop.f32.mrb[72].mxu1  ;;  %v4325_v6 = vpop.f32.mrb[72].mxu0  ;;  %v2262_v29 = vadd.f32 %v2254_v24, %v2210_v23  ;;  %v2312_v55 = vadd.f32 %v2304_v61, %v2260_v57  ;;  %v2212_v63 = vmul.f32 %v5896_v22, %v2199_v60 }
 0x1b4   : > { %v1837_v42 = vmax.f32 %v5876_v18, %v4271_v32  ;;  %v2138_v19 = vmax.f32 %v5878_v28, %v4325_v6  ;;  %v1781_v4 = vpop.f32.mrb[73].mxu1  ;;  %v2082_v34 = vpop.f32.mrb[73].mxu0  ;;  %v2306_v18 = vmul.f32 %v5904_v62, %v5830_v9  ;;  %v2263_v28 = vadd.f32 %v2255_v14, %v2211_v13 }
 0x1b5   : > { %v1836_v17 = vmax.f32 %v5882_v50, %v1781_v4  ;;  %v2137_v59 = vmax.f32 %v5884_v1, %v2082_v34  ;;  %v2313_v48 = vadd.f32 %v2305_v31, %v2261_v8  ;;  %v2356_v43 = vpop.permute.xlu1 %2355 }
 0x1b6   : > { %v1845_v16 = vmax.f32 %v5772_v56, %v1837_v42  ;;  %v2315_v13 = vadd.f32 %v2307_v58, %v2263_v28 }
 0x1b7   : > { %v1844_v39 = vmax.f32 %v5774_v51, %v1836_v17  ;;  %v4274_v32 = vpop.f32.mrb[74].mxu1  ;;  %v4328_v52 = vpop.f32.mrb[74].mxu0  ;;  %v2256_v51 = vmul.f32 %v5892_v37, %v5874_v3 }
 0x1b8   : > { %v2146_v40 = vmax.f32 %v1845_v16, %v2138_v19  ;;  %v1839_v50 = vmax.f32 %v5887_v25, %v4274_v32  ;;  %v2140_v45 = vmax.f32 %v5889_v46, %v4328_v52  ;;  %v1791_v7 = vpop.f32.mrb[75].mxu1  ;;  %v2092_v1 = vpop.f32.mrb[75].mxu0  ;;  %v2314_v25 = vadd.f32 %v2306_v18, %v2262_v29 }
 0x1b9   : > { %v2145_v56 = vmax.f32 %v1844_v39, %v2137_v59  ;;  %v1838_v12 = vmax.f32 %v5898_v41, %v1791_v7  ;;  %v2139_v9 = vmax.f32 %v5900_v47, %v2092_v1  ;;  %v2346_v37 = vpop.permute.xlu0 %2345 }
 0x1ba   : > { %v2318_v23 = vadd.f32 %v2310_v35, %v2146_v40  ;;  %v1847_v24 = vmax.f32 %v5784_v30, %v1839_v50 }
 0x1bb   : > { %v2317_v46 = vadd.f32 %v2309_v21, %v2145_v56  ;;  %v1846_v14 = vmax.f32 %v5786_v53, %v1838_v12  ;;  %v4277_v6 = vpop.f32.mrb[76].mxu1  ;;  %v4331_v22 = vpop.f32.mrb[76].mxu0  ;;  %v2264_v53 = vadd.f32 %v2256_v51, %v2212_v63 }
 0x1bc   : > { %v2374_v57 = vadd.f32 %v5800_v0, %v2318_v23  ;;  %v2148_v41 = vmax.f32 %v1847_v24, %v2140_v45  ;;  %v1841_v47 = vmax.f32 %v5906_v5, %v4277_v6  ;;  %v2142_v31 = vmax.f32 %v5908_v11, %v4331_v22  ;;  %v1801_v61 = vpop.f32.mrb[77].mxu1  ;;  %v2102_v3 = vpop.f32.mrb[77].mxu0 }
 0x1bd   : > { %v2373_v42 = vadd.f32 %v5926_v54, %v2317_v46  ;;  %v2147_v30 = vmax.f32 %v1846_v14, %v2139_v9  ;;  %v1840_v19 = vmax.f32 %v5914_v27, %v1801_v61  ;;  %v2141_v4 = vmax.f32 %v5916_v49, %v2102_v3  ;;  %v2399_v61 = vld [vmem:[%s6346_s5 + $0x10] sm:$0xff]  ;;  %v2400_v3 = vld [vmem:[%s6346_s5 + $0x18] sm:$0xff] }
 0x1be   : > { %v2320_v34 = vadd.f32 %v2312_v55, %v2148_v41  ;;  %v1849_v58 = vmax.f32 %v5796_v2, %v1841_v47  ;;  %v2382_v0 = vmul.f32 0.2, %v2374_v57  ;;  %v2308_v5 = vmul.f32 %v5904_v62, %v5951_v33  ;;  %v2366_v2 = vpop.permute.xlu1 %2365  ;;  %v6367_v55 = vld [vmem:[#allocation8_spill] sm:$0xff] }
 0x1bf   : > { %v2319_v21 = vadd.f32 %v2311_v38, %v2147_v30  ;;  %v1848_v11 = vmax.f32 %v5798_v26, %v1840_v19  ;;  %v4280_v17 = vpop.f32.mrb[78].mxu1  ;;  %v4334_v59 = vpop.f32.mrb[78].mxu0  ;;  %v2381_v35 = vmul.f32 0.2, %v2373_v42  ;;  %v6366_v38 = vld [vmem:[#allocation7_spill] sm:$0xff]  ;;  %v2403_v30 = vld [vmem:[%s6346_s5 + $0x30] sm:$0xff] }
 0x1c0   : > { %v2376_v54 = vadd.f32 %v5902_v20, %v2320_v34  ;;  %v2150_v60 = vmax.f32 %v1849_v58, %v2142_v31  ;;  %v1843_v27 = vmax.f32 %v5937_v10, %v4280_v17  ;;  %v2144_v49 = vmax.f32 %v5939_v36, %v4334_v59  ;;  %v1811_v8 = vpop.f32.mrb[79].mxu1  ;;  %v2112_v16 = vpop.f32.mrb[79].mxu0  ;;  %v2404_v19 = vld [vmem:[%s6346_s5 + $0x38] sm:$0xff]  ;;  %v2407_v34 = vld [vmem:[%s6346_s5 + $0x50] sm:$0xff]  ;;  %v2413_v17 = vld [vmem:[%s6346_s5 + $0x80] sm:$0xff] }
 0x1c1   : > { %v2375_v29 = vadd.f32 %v2346_v37, %v2319_v21  ;;  %v2149_v18 = vmax.f32 %v1848_v11, %v2141_v4  ;;  %v1842_v62 = vmax.f32 %v5943_v44, %v1811_v8  ;;  %v2143_v33 = vmax.f32 %v5945_v15, %v2112_v16  ;;  %v2361_v20 = vpop.permute.xlu0 %2360  ;;  %v2401_v37 = vld [vmem:[%s6346_s5 + $0x20] sm:$0xff]  ;;  %v2408_v58 = vld [vmem:[%s6346_s5 + $0x58] sm:$0xff]  ;;  %v2411_v21 = vld [vmem:[%s6346_s5 + $0x70] sm:$0xff] }
 0x1c2   : > { %v2322_v26 = vadd.f32 %v2314_v25, %v2150_v60  ;;  %v1851_v28 = vmax.f32 %v6366_v38, %v1843_v27  ;;  %v2389_v39 = vmax.f32 %v2373_v42, %v2381_v35  ;;  %v2390_v32 = vmax.f32 %v2374_v57, %v2382_v0  ;;  %v2371_v51 = vpop.permute.xlu1 %2370  ;;  %v2402_v42 = vld [vmem:[%s6346_s5 + $0x28] sm:$0xff]  ;;  %v2405_v4 = vld [vmem:[%s6346_s5 + $0x40] sm:$0xff]  ;;  %v2412_v11 = vld [vmem:[%s6346_s5 + $0x78] sm:$0xff] }
 0x1c3   : > { %v2321_v52 = vadd.f32 %v2313_v48, %v2149_v18  ;;  %v1850_v10 = vmax.f32 %v6367_v55, %v1842_v62  ;;  %v2383_v40 = vmul.f32 0.2, %v2375_v29  ;;  %v2384_v36 = vmul.f32 0.2, %v2376_v54  ;;  %v2409_v0 = vld [vmem:[%s6346_s5 + $0x60] sm:$0xff]  ;;  %v2414_v59 = vld [vmem:[%s6346_s5 + $0x88] sm:$0xff] }
 0x1c4   : > { %v2316_v50 = vadd.f32 %v2308_v5, %v2264_v53  ;;  %v2378_v45 = vadd.f32 %v2361_v20, %v2322_v26  ;;  %v2152_v7 = vmax.f32 %v1851_v28, %v2144_v49  ;;  %v4419_v1 = vpack.c.bf16 %v2390_v32, %v2389_v39  ;;  %v2406_v53 = vld [vmem:[%s6346_s5 + $0x48] sm:$0xff]  ;;  %v2415_v35 = vld [vmem:[%s6346_s5 + $0x90] sm:$0xff]  ;;  %v2417_v60 = vld [vmem:[%s6346_s5 + $0xa0] sm:$0xff] }
 0x1c5   : > { %v2377_v63 = vadd.f32 %v2356_v43, %v2321_v52  ;;  %v2151_v56 = vmax.f32 %v1850_v10, %v2143_v33  ;;  %v2391_v44 = vmax.f32 %v2375_v29, %v2383_v40  ;;  %v2392_v12 = vmax.f32 %v2376_v54, %v2384_v36  ;;  %v2410_v5 = vld [vmem:[%s6346_s5 + $0x68] sm:$0xff]  ;;  %v2416_v54 = vld [vmem:[%s6346_s5 + $0x98] sm:$0xff]  ;;  %v2419_v49 = vld [vmem:[%s6346_s5 + $0xb0] sm:$0xff]  ;;  %v6124_v39 = vpop.permute.xlu0 %2543 }
 0x1c6   : > { %v2324_v15 = vadd.f32 %v2316_v50, %v2152_v7  ;;  %4420 = vmatprep.subr.bf16.mxu1 %v4419_v1  ;;  %v2386_v9 = vmul.f32 0.2, %v2378_v45  ;;  %v2418_v27 = vld [vmem:[%s6346_s5 + $0xa8] sm:$0xff]  ;;  %v2420_v8 = vld [vmem:[%s6346_s5 + $0xb8] sm:$0xff]  ;;  %v2421_v16 = vld [vmem:[%s6346_s5 + $0xc0] sm:$0xff]  ;;  %v6122_v28 = vpop.permute.xlu1 %2548 }
 0x1c7   : > { %v2323_v23 = vadd.f32 %v2315_v13, %v2151_v56  ;;  %4422 = vmatpush3.bf16.msra.mxu1 %v4419_v1  ;;  %v4423_v24 = vpack.c.bf16 %v2392_v12, %v2391_v44  ;;  %v2385_v48 = vmul.f32 0.2, %v2377_v63  ;;  %v2398_v13 = vld [vmem:[%s6346_s5 + $0x8] sm:$0xff]  ;;  %v2423_v29 = vld [vmem:[%s6346_s5 + $0xd0] sm:$0xff]  ;;  %v2424_v18 = vld [vmem:[%s6346_s5 + $0xd8] sm:$0xff] }
 0x1c8   : > { %v2380_v25 = vadd.f32 %v2371_v51, %v2324_v15  ;;  %v2394_v46 = vmax.f32 %v2378_v45, %v2386_v9  ;;  %v2425_v62 = vld [vmem:[%s6346_s5 + $0xe0] sm:$0xff]  ;;  %v2426_v33 = vld [vmem:[%s6346_s5 + $0xe8] sm:$0xff]  ;;  %v2427_v26 = vld [vmem:[%s6346_s5 + $0xf0] sm:$0xff] }
 0x1c9   : > { %v2379_v14 = vadd.f32 %v2366_v2, %v2323_v23  ;;  %4424 = vmatprep.subr.bf16.mxu1 %v4423_v24  ;;  %v2393_v6 = vmax.f32 %v2377_v63, %v2385_v48  ;;  %v2422_v2 = vld [vmem:[%s6346_s5 + $0xc8] sm:$0xff]  ;;  %v2428_v38 = vld [vmem:[%s6346_s5 + $0xf8] sm:$0xff]  ;;  %v2464_v52 = vpop.permute.xlu0 %2463 }
 0x1ca   : > { %v2388_v22 = vmul.f32 0.2, %v2380_v25  ;;  %v3008_v32 = vld [vmem:[%s6348_s7 + $0x8] sm:$0xff]  ;;  %v2469_v20 = vpop.permute.xlu1 %2468 }
 0x1cb   : > { %4426 = vmatpush3.bf16.msra.mxu1 %v4423_v24  ;;  %v4427_v57 = vpack.c.bf16 %v2394_v46, %v2393_v6  ;;  %v2387_v43 = vmul.f32 0.2, %v2379_v14  ;;  %3199 = vmatprep.mubr.f32.mxu0 %v3008_v32 }
 0x1cc   : > { %v2396_v41 = vmax.f32 %v2380_v25, %v2388_v22 }
 0x1cd   : > { %4428 = vmatprep.subr.bf16.mxu1 %v4427_v57  ;;  %v2395_v47 = vmax.f32 %v2379_v14, %v2387_v43  ;;  %v6131_v10 = vpop.permute.xlu0 %2553 }
 0x1ce   : > { %v6129_v55 = vpop.permute.xlu1 %2558 }
 0x1cf   : > { %4430 = vmatpush3.bf16.msra.mxu1 %v4427_v57  ;;  %v4431_v31 = vpack.c.bf16 %v2396_v41, %v2395_v47 }
 0x1d1   : > { %4432 = vmatprep.subr.bf16.mxu1 %v4431_v31  ;;  %v2474_v36 = vpop.permute.xlu0 %2473 }
 0x1d2   : > { %v2479_v40 = vpop.permute.xlu1 %2478 }
 0x1d3   : > { %4434 = vmatpush3.bf16.msra.mxu1 %v4431_v31 }
 0x1d5   : > { %v6135_v45 = vpop.permute.xlu0 %2563 }
 0x1d6   : > { %4352 = vmatmul.mubr.msk.f32.vlgmr.msra.gmra.mrb[80].mxu1 %vm2621_vm8, %v2398_v13  ;;  %v6133_v50 = vpop.permute.xlu1 %2568 }
 0x1d7   : > { %4354 = vmatprep.mubr.msk.f32.mxu1 %vm2621_vm8, %v2399_v61 }
 0x1d9   : > { %v2484_v1 = vpop.permute.xlu0 %2483 }
 0x1da   : > { %4355 = vmatmul.mubr.msk.f32.gmra.mrb[82].mxu1 %vm2621_vm8, %v2400_v3  ;;  %v2489_v7 = vpop.permute.xlu1 %2488 }
 0x1db   : > { %4357 = vmatprep.mubr.msk.f32.mxu1 %vm2621_vm8, %v2401_v37 }
 0x1dd   : > { %v6139_v56 = vpop.permute.xlu0 %2573 }
 0x1de   : > { %4358 = vmatmul.mubr.msk.f32.gmra.mrb[84].mxu1 %vm2621_vm8, %v2402_v42  ;;  %v6137_v63 = vpop.permute.xlu1 %2578 }
 0x1df   : > { %4360 = vmatprep.mubr.msk.f32.mxu1 %vm2621_vm8, %v2403_v30 }
 0x1e1   : > { %v2494_v12 = vpop.permute.xlu0 %2493 }
 0x1e2   : > { %4361 = vmatmul.mubr.msk.f32.gmra.mrb[86].mxu1 %vm2621_vm8, %v2404_v19  ;;  %v2499_v44 = vpop.permute.xlu1 %2498 }
 0x1e3   : > { %4363 = vmatprep.mubr.msk.f32.mxu1 %vm2621_vm8, %v2405_v4 }
 0x1e5   : > { %v6143_v9 = vpop.permute.xlu0 %2583 }
 0x1e6   : > { %4364 = vmatmul.mubr.msk.f32.gmra.mrb[88].mxu1 %vm2621_vm8, %v2406_v53  ;;  %v6141_v15 = vpop.permute.xlu1 %2588 }
 0x1e7   : > { %4366 = vmatprep.mubr.msk.f32.mxu1 %vm2621_vm8, %v2407_v34 }
 0x1e9   : > { %v2504_v23 = vpop.permute.xlu0 %2503 }
 0x1ea   : > { %4367 = vmatmul.mubr.msk.f32.gmra.mrb[90].mxu1 %vm2621_vm8, %v2408_v58  ;;  %v2509_v51 = vpop.permute.xlu1 %2508 }
 0x1eb   : > { %4369 = vmatprep.mubr.msk.f32.mxu1 %vm2621_vm8, %v2409_v0 }
 0x1ed   : > { %v6147_v48 = vpop.permute.xlu0 %2593 }
 0x1ee   : > { %4370 = vmatmul.mubr.msk.f32.gmra.mrb[92].mxu1 %vm2621_vm8, %v2410_v5  ;;  %v6145_v24 = vpop.permute.xlu1 %2598 }
 0x1ef   : > { %4372 = vmatprep.mubr.msk.f32.mxu1 %vm2621_vm8, %v2411_v21 }
 0x1f1   : > { %v2514_v47 = vpop.permute.xlu0 %2513 }
 0x1f2   : > { %4373 = vmatmul.mubr.msk.f32.gmra.mrb[94].mxu1 %vm2621_vm8, %v2412_v11  ;;  %v2519_v57 = vpop.permute.xlu1 %2518 }
 0x1f3   : > { %4375 = vmatprep.mubr.msk.f32.mxu1 %vm2621_vm8, %v2413_v17 }
 0x1f5   : > { %v6153_v11 = vpop.permute.xlu0 %2603 }
 0x1f6   : > { %4376 = vmatmul.mubr.msk.f32.gmra.mrb[96].mxu1 %vm2621_vm8, %v2414_v59  ;;  %v6151_v0 = vpop.permute.xlu1 %2608 }
 0x1f7   : > { %4378 = vmatprep.mubr.msk.f32.mxu1 %vm2621_vm8, %v2415_v35 }
 0x1fa   : > { %4379 = vmatmul.mubr.msk.f32.gmra.mrb[98].mxu1 %vm2621_vm8, %v2416_v54 }
 0x1fb   : > { %4381 = vmatprep.mubr.msk.f32.mxu1 %vm2621_vm8, %v2417_v60 }
 0x1fe   : > { %4382 = vmatmul.mubr.msk.f32.gmra.mrb[100].mxu1 %vm2621_vm8, %v2418_v27 }
 0x1ff   : > { %4384 = vmatprep.mubr.msk.f32.mxu1 %vm2621_vm8, %v2419_v49 }
 0x202   : > { %4385 = vmatmul.mubr.msk.f32.gmra.mrb[102].mxu1 %vm2621_vm8, %v2420_v8 }
 0x203   : > { %4387 = vmatprep.mubr.msk.f32.mxu1 %vm2621_vm8, %v2421_v16 }
 0x206   : > { %4388 = vmatmul.mubr.msk.f32.gmra.mrb[104].mxu1 %vm2621_vm8, %v2422_v2 }
 0x207   : > { %4390 = vmatprep.mubr.msk.f32.mxu1 %vm2621_vm8, %v2423_v29  ;;  %v2529_v29 = vpop.permute.xlu1 %2528 }
 0x20a   : > { %4391 = vmatmul.mubr.msk.f32.gmra.mrb[106].mxu1 %vm2621_vm8, %v2424_v18 }
 0x20b   : > { %4393 = vmatprep.mubr.msk.f32.mxu1 %vm2621_vm8, %v2425_v62 }
 0x20e   : > { %4394 = vmatmul.mubr.msk.f32.gmra.mrb[108].mxu1 %vm2621_vm8, %v2426_v33 }
 0x20f   : > { %4396 = vmatprep.mubr.msk.f32.mxu1 %vm2621_vm8, %v2427_v26  ;;  %v2524_v26 = vpop.permute.xlu0 %2523 }
 0x212   : > { %4397 = vmatmul.mubr.msk.f32.gmra.mrb[110].mxu1 %vm2621_vm8, %v2428_v38 }
 0x2a9   : > { %v4353_v25 = vpop.f32.mrb[80].mxu1 }
 0x2aa   : > { %v2790_v46 = vadd.f32 %v4353_v25, %v2469_v20  ;;  %v2784_v14 = vpop.f32.mrb[81].mxu1 }
 0x2ab   : > { %v2785_v6 = vadd.f32 %v2784_v14, %v2464_v52  ;;  %v6161_v14 = vpop.permute.xlu1 %2618 }
 0x2ac   : > { %v2944_v22 = vmul.f32 0.2, %v2790_v46 }
 0x2ad   : > { %v2943_v43 = vmul.f32 0.2, %v2785_v6  ;;  %v4356_v41 = vpop.f32.mrb[82].mxu1 }
 0x2ae   : > { %v2976_v31 = vmax.f32 %v2790_v46, %v2944_v22  ;;  %v2800_v13 = vadd.f32 %v4356_v41, %v2479_v40  ;;  %v2794_v61 = vpop.f32.mrb[83].mxu1 }
 0x2af   : > { %v2975_v3 = vmax.f32 %v2785_v6, %v2943_v43  ;;  %v2795_v37 = vadd.f32 %v2794_v61, %v2474_v36  ;;  %v6163_v43 = vpop.permute.xlu0 %2613 }
 0x2b0   : > { %v2946_v42 = vmul.f32 0.2, %v2800_v13 }
 0x2b1   : > { %v6149_v30 = vpack.c.bf16 %v2976_v31, %v2975_v3  ;;  %v2945_v19 = vmul.f32 0.2, %v2795_v37  ;;  %v4359_v4 = vpop.f32.mrb[84].mxu1 }
 0x2b2   : > { %v2978_v53 = vmax.f32 %v2800_v13, %v2946_v42  ;;  %v2810_v34 = vadd.f32 %v4359_v4, %v2489_v7  ;;  %v2804_v58 = vpop.f32.mrb[85].mxu1  ;;  %v2539_v4 = vpop.permute.xlu1 %2538 }
 0x2b3   : > { %v2977_v5 = vmax.f32 %v2795_v37, %v2945_v19  ;;  %v2805_v21 = vadd.f32 %v2804_v58, %v2484_v1  ;;  %v2534_v58 = vpop.permute.xlu0 %2533 }
 0x2b4   : > { %v2948_v17 = vmul.f32 0.2, %v2810_v34 }
 0x2b5   : > { %v6155_v59 = vpack.c.bf16 %v2978_v53, %v2977_v5  ;;  %v2947_v35 = vmul.f32 0.2, %v2805_v21  ;;  %v4362_v54 = vpop.f32.mrb[86].mxu1 }
 0x2b6   : > { %v2980_v60 = vmax.f32 %v2810_v34, %v2948_v17  ;;  %v2820_v27 = vadd.f32 %v4362_v54, %v2499_v44  ;;  %v2814_v49 = vpop.f32.mrb[87].mxu1 }
 0x2b7   : > { %v2979_v8 = vmax.f32 %v2805_v21, %v2947_v35  ;;  %v2815_v16 = vadd.f32 %v2814_v49, %v2494_v12 }
 0x2b8   : > { %v2950_v2 = vmul.f32 0.2, %v2820_v27 }
 0x2b9   : > { %v6157_v18 = vpack.c.bf16 %v2980_v60, %v2979_v8  ;;  %v2949_v62 = vmul.f32 0.2, %v2815_v16  ;;  %v4365_v33 = vpop.f32.mrb[88].mxu1 }
 0x2ba   : > { %v2982_v38 = vmax.f32 %v2820_v27, %v2950_v2  ;;  %v2830_v32 = vadd.f32 %v4365_v33, %v2509_v51  ;;  %v2824_v20 = vpop.f32.mrb[89].mxu1 }
 0x2bb   : > { %v2981_v52 = vmax.f32 %v2815_v16, %v2949_v62  ;;  %v2825_v40 = vadd.f32 %v2824_v20, %v2504_v23 }
 0x2bc   : > { %v2952_v36 = vmul.f32 0.2, %v2830_v32 }
 0x2bd   : > { %v6159_v7 = vpack.c.bf16 %v2982_v38, %v2981_v52  ;;  %v2951_v1 = vmul.f32 0.2, %v2825_v40  ;;  %v4368_v44 = vpop.f32.mrb[90].mxu1 }
 0x2be   : > { %v2984_v25 = vmax.f32 %v2830_v32, %v2952_v36  ;;  %v2840_v46 = vadd.f32 %v4368_v44, %v2519_v57  ;;  %v2834_v12 = vpop.f32.mrb[91].mxu1 }
 0x2bf   : > { %v2983_v6 = vmax.f32 %v2825_v40, %v2951_v1  ;;  %v2835_v22 = vadd.f32 %v2834_v12, %v2514_v47 }
 0x2c0   : > { %v2954_v41 = vmul.f32 0.2, %v2840_v46 }
 0x2c1   : > { %v6165_v31 = vpack.c.bf16 %v2984_v25, %v2983_v6  ;;  %v2953_v51 = vmul.f32 0.2, %v2835_v22  ;;  %v4371_v13 = vpop.f32.mrb[92].mxu1 }
 0x2c2   : > { %v2986_v23 = vmax.f32 %v2840_v46, %v2954_v41  ;;  %v2850_v61 = vadd.f32 %v4371_v13, %v2529_v29  ;;  %v2844_v3 = vpop.f32.mrb[93].mxu1 }
 0x2c3   : > { %v2985_v37 = vmax.f32 %v2835_v22, %v2953_v51  ;;  %v2845_v42 = vadd.f32 %v2844_v3, %v2524_v26 }
 0x2c4   : > { %v2956_v19 = vmul.f32 0.2, %v2850_v61 }
 0x2c5   : > { %v6167_v57 = vpack.c.bf16 %v2986_v23, %v2985_v37  ;;  %v2955_v53 = vmul.f32 0.2, %v2845_v42  ;;  %v4374_v34 = vpop.f32.mrb[94].mxu1 }
 0x2c6   : > { %v2988_v47 = vmax.f32 %v2850_v61, %v2956_v19  ;;  %v2860_v5 = vadd.f32 %v4374_v34, %v2539_v4  ;;  %v2854_v21 = vpop.f32.mrb[95].mxu1 }
 0x2c7   : > { %v2987_v17 = vmax.f32 %v2845_v42, %v2955_v53  ;;  %v2855_v35 = vadd.f32 %v2854_v21, %v2534_v58 }
 0x2c8   : > { %v2958_v54 = vmul.f32 0.2, %v2860_v5 }
 0x2c9   : > { %v6169_v60 = vpack.c.bf16 %v2988_v47, %v2987_v17  ;;  %v2957_v27 = vmul.f32 0.2, %v2855_v35  ;;  %v4377_v49 = vpop.f32.mrb[96].mxu1 }
 0x2ca   : > { %v2990_v8 = vmax.f32 %v2860_v5, %v2958_v54  ;;  %v2870_v16 = vadd.f32 %v4377_v49, %v6122_v28  ;;  %v2864_v2 = vpop.f32.mrb[97].mxu1 }
 0x2cb   : > { %v2989_v29 = vmax.f32 %v2855_v35, %v2957_v27  ;;  %v2865_v62 = vadd.f32 %v2864_v2, %v6124_v39 }
 0x2cc   : > { %v2960_v33 = vmul.f32 0.2, %v2870_v16 }
 0x2cd   : > { %v6173_v26 = vpack.c.bf16 %v2990_v8, %v2989_v29  ;;  %v2959_v38 = vmul.f32 0.2, %v2865_v62  ;;  %v4380_v32 = vpop.f32.mrb[98].mxu1 }
 0x2ce   : > { %v2992_v20 = vmax.f32 %v2870_v16, %v2960_v33  ;;  %v2880_v52 = vadd.f32 %v4380_v32, %v6129_v55  ;;  %v2874_v40 = vpop.f32.mrb[99].mxu1 }
 0x2cf   : > { %v2991_v36 = vmax.f32 %v2865_v62, %v2959_v38  ;;  %v2875_v1 = vadd.f32 %v2874_v40, %v6131_v10 }
 0x2d0   : > { %v2962_v44 = vmul.f32 0.2, %v2880_v52 }
 0x2d1   : > { %v2961_v25 = vmul.f32 0.2, %v2875_v1  ;;  %v4383_v46 = vpop.f32.mrb[100].mxu1  ;;  %v4435_v28 = vpack.c.bf16 %v2992_v20, %v2991_v36 }
 0x2d2   : > { %v2994_v12 = vmax.f32 %v2880_v52, %v2962_v44  ;;  %v2890_v6 = vadd.f32 %v4383_v46, %v6133_v50  ;;  %v2884_v39 = vpop.f32.mrb[101].mxu1  ;;  %v3013_v46 = vld [vmem:[%s6348_s7 + $0x30] sm:$0xff] }
 0x2d3   : > { %v2993_v22 = vmax.f32 %v2875_v1, %v2961_v25  ;;  %v2885_v41 = vadd.f32 %v2884_v39, %v6135_v45  ;;  %4436 = vmatprep.subr.bf16.mxu0 %v4435_v28  ;;  %v3014_v25 = vld [vmem:[%s6348_s7 + $0x38] sm:$0xff]  ;;  %v3016_v28 = vld [vmem:[%s6348_s7 + $0x48] sm:$0xff]  ;;  %v3017_v39 = vld [vmem:[%s6348_s7 + $0x50] sm:$0xff] }
 0x2d4   : > { %v2964_v51 = vmul.f32 0.2, %v2890_v6  ;;  %4438 = vmatpush3.bf16.msra.mxu0 %v6149_v30 }
 0x2d5   : > { %v2963_v55 = vmul.f32 0.2, %v2885_v41  ;;  %v4386_v13 = vpop.f32.mrb[102].mxu1  ;;  %v4439_v23 = vpack.c.bf16 %v2994_v12, %v2993_v22  ;;  %v3015_v12 = vld [vmem:[%s6348_s7 + $0x40] sm:$0xff]  ;;  %v3020_v22 = vld [vmem:[%s6348_s7 + $0x68] sm:$0xff] }
 0x2d6   : > { %v2996_v61 = vmax.f32 %v2890_v6, %v2964_v51  ;;  %v2900_v10 = vadd.f32 %v4386_v13, %v6137_v63  ;;  %v2894_v3 = vpop.f32.mrb[103].mxu1  ;;  %v3018_v6 = vld [vmem:[%s6348_s7 + $0x58] sm:$0xff]  ;;  %v3024_v13 = vld [vmem:[%s6348_s7 + $0x88] sm:$0xff] }
 0x2d7   : > { %v2995_v37 = vmax.f32 %v2885_v41, %v2963_v55  ;;  %v2895_v42 = vadd.f32 %v2894_v3, %v6139_v56  ;;  %4440 = vmatprep.subr.bf16.mxu0 %v4439_v23  ;;  %v3019_v41 = vld [vmem:[%s6348_s7 + $0x60] sm:$0xff]  ;;  %v3022_v51 = vld [vmem:[%s6348_s7 + $0x78] sm:$0xff]  ;;  %v3021_v55 = vld [vmem:[%s6348_s7 + $0x70] sm:$0xff] }
 0x2d8   : > { %v2966_v50 = vmul.f32 0.2, %v2900_v10  ;;  %4442 = vmatpush3.bf16.msra.mxu0 %v6155_v59  ;;  %v3023_v23 = vld [vmem:[%s6348_s7 + $0x80] sm:$0xff]  ;;  %v3028_v3 = vld [vmem:[%s6348_s7 + $0xa8] sm:$0xff] }
 0x2d9   : > { %v2965_v19 = vmul.f32 0.2, %v2895_v42  ;;  %v4389_v45 = vpop.f32.mrb[104].mxu1  ;;  %v4443_v4 = vpack.c.bf16 %v2996_v61, %v2995_v37  ;;  %v3026_v61 = vld [vmem:[%s6348_s7 + $0x98] sm:$0xff]  ;;  %v3027_v37 = vld [vmem:[%s6348_s7 + $0xa0] sm:$0xff] }
 0x2da   : > { %v2998_v53 = vmax.f32 %v2900_v10, %v2966_v50  ;;  %v2910_v30 = vadd.f32 %v4389_v45, %v6141_v15  ;;  %v2904_v34 = vpop.f32.mrb[105].mxu1  ;;  %v3025_v10 = vld [vmem:[%s6348_s7 + $0x90] sm:$0xff]  ;;  %v3031_v45 = vld [vmem:[%s6348_s7 + $0xc0] sm:$0xff] }
 0x2db   : > { %v2997_v58 = vmax.f32 %v2895_v42, %v2965_v19  ;;  %v2905_v47 = vadd.f32 %v2904_v34, %v6143_v9  ;;  %4444 = vmatprep.subr.bf16.mxu0 %v4443_v4  ;;  %v3030_v42 = vld [vmem:[%s6348_s7 + $0xb8] sm:$0xff]  ;;  %v3029_v50 = vld [vmem:[%s6348_s7 + $0xb0] sm:$0xff]  ;;  %v3032_v19 = vld [vmem:[%s6348_s7 + $0xc8] sm:$0xff] }
 0x2dc   : > { %v2968_v63 = vmul.f32 0.2, %v2910_v30  ;;  %4446 = vmatpush3.bf16.msra.mxu0 %v6157_v18  ;;  %v3034_v4 = vld [vmem:[%s6348_s7 + $0xd8] sm:$0xff]  ;;  %v3035_v34 = vld [vmem:[%s6348_s7 + $0xe0] sm:$0xff] }
 0x2dd   : > { %v2967_v5 = vmul.f32 0.2, %v2905_v47  ;;  %v4392_v56 = vpop.f32.mrb[106].mxu1  ;;  %v4447_v21 = vpack.c.bf16 %v2998_v53, %v2997_v58  ;;  %v3033_v53 = vld [vmem:[%s6348_s7 + $0xd0] sm:$0xff]  ;;  %v3038_v58 = vld [vmem:[%s6348_s7 + $0xf8] sm:$0xff] }
 0x2de   : > { %v3000_v17 = vmax.f32 %v2910_v30, %v2968_v63  ;;  %v2920_v59 = vadd.f32 %v4392_v56, %v6145_v24  ;;  %v2914_v35 = vpop.f32.mrb[107].mxu1  ;;  %v3036_v30 = vld [vmem:[%s6348_s7 + $0xe8] sm:$0xff]  ;;  %v3058_v63 = vpop.permute.xlu0 %3057 }
 0x2df   : > { %v2999_v54 = vmax.f32 %v2905_v47, %v2967_v5  ;;  %v2915_v27 = vadd.f32 %v2914_v35, %v6147_v48  ;;  %4448 = vmatprep.subr.bf16.mxu0 %v4447_v21  ;;  %v3037_v47 = vld [vmem:[%s6348_s7 + $0xf0] sm:$0xff]  ;;  %v3063_v5 = vpop.permute.xlu1 %3062 }
 0x2e0   : > { %v2970_v15 = vmul.f32 0.2, %v2920_v59  ;;  %4450 = vmatpush3.bf16.msra.mxu0 %v6159_v7 }
 0x2e1   : > { %v2969_v49 = vmul.f32 0.2, %v2915_v27  ;;  %v4395_v9 = vpop.f32.mrb[108].mxu1  ;;  %v4451_v8 = vpack.c.bf16 %v3000_v17, %v2999_v54 }
 0x2e2   : > { %v3002_v16 = vmax.f32 %v2920_v59, %v2970_v15  ;;  %v2930_v18 = vadd.f32 %v4395_v9, %v6151_v0  ;;  %v2924_v2 = vpop.f32.mrb[109].mxu1  ;;  %v3068_v56 = vpop.permute.xlu0 %3067 }
 0x2e3   : > { %v3001_v29 = vmax.f32 %v2915_v27, %v2969_v49  ;;  %v2925_v62 = vadd.f32 %v2924_v2, %v6153_v11  ;;  %4452 = vmatprep.subr.bf16.mxu0 %v4451_v8  ;;  %v3073_v21 = vpop.permute.xlu1 %3072 }
 0x2e4   : > { %v2972_v24 = vmul.f32 0.2, %v2930_v18  ;;  %4454 = vmatpush3.bf16.msra.mxu0 %v6165_v31 }
 0x2e5   : > { %v2971_v33 = vmul.f32 0.2, %v2925_v62  ;;  %v4398_v48 = vpop.f32.mrb[110].mxu1  ;;  %v4455_v38 = vpack.c.bf16 %v3002_v16, %v3001_v29 }
 0x2e6   : > { %v3004_v32 = vmax.f32 %v2930_v18, %v2972_v24  ;;  %v2940_v7 = vadd.f32 %v4398_v48, %v6161_v14  ;;  %v2934_v20 = vpop.f32.mrb[111].mxu1  ;;  %v3007_v14 = vld [vmem:[%s6348_s7] sm:$0xff]  ;;  %v3078_v17 = vpop.permute.xlu0 %3077 }
 0x2e7   : > { %v3003_v52 = vmax.f32 %v2925_v62, %v2971_v33  ;;  %v2935_v40 = vadd.f32 %v2934_v20, %v6163_v43  ;;  %4456 = vmatprep.subr.bf16.mxu0 %v4455_v38  ;;  %v3010_v43 = vld [vmem:[%s6348_s7 + $0x18] sm:$0xff]  ;;  %v3331_v59 = vpop.permute.xlu1 %3330 }
 0x2e8   : > { %v2974_v0 = vmul.f32 0.2, %v2940_v7  ;;  %4458 = vmatpush3.bf16.msra.mxu0 %v6167_v57  ;;  %v3009_v57 = vld [vmem:[%s6348_s7 + $0x10] sm:$0xff] }
 0x2e9   : > { %v2973_v36 = vmul.f32 0.2, %v2935_v40  ;;  %v4459_v11 = vpack.c.bf16 %v3004_v32, %v3003_v52 }
 0x2ea   : > { %v3006_v1 = vmax.f32 %v2940_v7, %v2974_v0  ;;  %v3336_v35 = vpop.permute.xlu0 %3335 }
 0x2eb   : > { %v3005_v44 = vmax.f32 %v2935_v40, %v2973_v36  ;;  %4460 = vmatprep.subr.bf16.mxu0 %v4459_v11  ;;  %v3083_v54 = vpop.permute.xlu1 %3082 }
 0x2ec   : > { %4462 = vmatpush3.bf16.msra.mxu0 %v6169_v60  ;;  %v3012_v60 = vld [vmem:[%s6348_s7 + $0x28] sm:$0xff] }
 0x2ed   : > { %v4463_v31 = vpack.c.bf16 %v3006_v1, %v3005_v44 }
 0x2ee   : > { %v3341_v27 = vpop.permute.xlu0 %3340 }
 0x2ef   : > { %4464 = vmatprep.subr.bf16.mxu0 %v4463_v31  ;;  %v3088_v49 = vpop.permute.xlu1 %3087 }
 0x2f0   : > { %4466 = vmatpush3.bf16.msra.mxu0 %v6173_v26  ;;  %v3011_v26 = vld [vmem:[%s6348_s7 + $0x20] sm:$0xff] }
 0x2f2   : > { %v3346_v16 = vpop.permute.xlu0 %3345 }
 0x2f3   : > { %3200 = vmatmul.mubr.f32.vlgmr.msra.gmra.mrb[80].mxu0 %v3007_v14  ;;  %v3093_v33 = vpop.permute.xlu1 %3092 }
 0x2f4   : > { %3204 = vmatprep.mubr.f32.mxu0 %v3010_v43 }
 0x2f6   : > { %v3351_v32 = vpop.permute.xlu0 %3350 }
 0x2f7   : > { %3205 = vmatmul.mubr.f32.gmra.mrb[82].mxu0 %v3009_v57  ;;  %v3098_v1 = vpop.permute.xlu1 %3097 }
 0x2f8   : > { %3209 = vmatprep.mubr.f32.mxu0 %v3012_v60 }
 0x2fa   : > { %v3356_v60 = vpop.permute.xlu0 %3355 }
 0x2fb   : > { %3210 = vmatmul.mubr.f32.gmra.mrb[84].mxu0 %v3011_v26 }
 0x2fc   : > { %3214 = vmatprep.mubr.f32.mxu0 %v3014_v25 }
 0x2ff   : > { %3215 = vmatmul.mubr.f32.gmra.mrb[86].mxu0 %v3013_v46 }
 0x300   : > { %3219 = vmatprep.mubr.f32.mxu0 %v3016_v28 }
 0x303   : > { %3220 = vmatmul.mubr.f32.gmra.mrb[88].mxu0 %v3015_v12 }
 0x304   : > { %3224 = vmatprep.mubr.f32.mxu0 %v3018_v6 }
 0x307   : > { %3225 = vmatmul.mubr.f32.gmra.mrb[90].mxu0 %v3017_v39 }
 0x308   : > { %3229 = vmatprep.mubr.f32.mxu0 %v3020_v22 }
 0x30b   : > { %3230 = vmatmul.mubr.f32.gmra.mrb[92].mxu0 %v3019_v41  ;;  %v3103_v41 = vpop.permute.xlu1 %3102 }
 0x30c   : > { %3234 = vmatprep.mubr.f32.mxu0 %v3022_v51 }
 0x30f   : > { %3235 = vmatmul.mubr.f32.gmra.mrb[94].mxu0 %v3021_v55 }
 0x310   : > { %3239 = vmatprep.mubr.f32.mxu0 %v3024_v13 }
 0x313   : > { %3240 = vmatmul.mubr.f32.gmra.mrb[96].mxu0 %v3023_v23 }
 0x314   : > { %3244 = vmatprep.mubr.f32.mxu0 %v3026_v61  ;;  %v3361_v61 = vpop.permute.xlu0 %3360 }
 0x317   : > { %3245 = vmatmul.mubr.f32.gmra.mrb[98].mxu0 %v3025_v10 }
 0x318   : > { %3249 = vmatprep.mubr.f32.mxu0 %v3028_v3 }
 0x31b   : > { %3250 = vmatmul.mubr.f32.gmra.mrb[100].mxu0 %v3027_v37 }
 0x31c   : > { %3254 = vmatprep.mubr.f32.mxu0 %v3030_v42 }
 0x31f   : > { %3255 = vmatmul.mubr.f32.gmra.mrb[102].mxu0 %v3029_v50 }
 0x320   : > { %3259 = vmatprep.mubr.f32.mxu0 %v3032_v19 }
 0x323   : > { %3260 = vmatmul.mubr.f32.gmra.mrb[104].mxu0 %v3031_v45 }
 0x324   : > { %3264 = vmatprep.mubr.f32.mxu0 %v3034_v4 }
 0x327   : > { %3265 = vmatmul.mubr.f32.gmra.mrb[106].mxu0 %v3033_v53  ;;  %v3108_v53 = vpop.permute.xlu1 %3107 }
 0x328   : > { %3269 = vmatprep.mubr.f32.mxu0 %v3036_v30 }
 0x32b   : > { %3270 = vmatmul.mubr.f32.gmra.mrb[108].mxu0 %v3035_v34 }
 0x32c   : > { %3274 = vmatprep.mubr.f32.mxu0 %v3038_v58 }
 0x32f   : > { %3275 = vmatmul.mubr.f32.gmra.mrb[110].mxu0 %v3037_v47 }
 0x3c6   : > { %v4017_v15 = vpop.f32.mrb[80].mxu0 }
 0x3c7   : > { %v4018_v9 = vpop.f32.mrb[81].mxu0 }
 0x3c8   : > { %v4019_v8 = vadd.f32 %v4018_v9, %v4017_v15  ;;  %v3113_v9 = vpop.permute.xlu1 %3112 }
 0x3ca   : > { %v3202_v18 = vadd.f32 %v4019_v8, %v3058_v63  ;;  %v4020_v2 = vpop.f32.mrb[82].mxu0  ;;  %v3366_v63 = vpop.permute.xlu0 %3365 }
 0x3cb   : > { %v4021_v29 = vpop.f32.mrb[83].mxu0 }
 0x3cc   : > { %v3280_v62 = vmul.f32 0.2, %v3202_v18  ;;  %v4022_v24 = vadd.f32 %v4021_v29, %v4020_v2 }
 0x3ce   : > { %v3207_v48 = vadd.f32 %v4022_v24, %v3063_v5  ;;  %v4023_v38 = vpop.f32.mrb[84].mxu0  ;;  %v3296_v20 = vmax.f32 %v3202_v18, %v3280_v62  ;;  %v3371_v2 = vpop.permute.xlu0 %3370 }
 0x3cf   : > { %v4024_v7 = vpop.f32.mrb[85].mxu0 }
 0x3d0   : > { %v3281_v52 = vmul.f32 0.2, %v3207_v48  ;;  %v4025_v40 = vadd.f32 %v4024_v7, %v4023_v38  ;;  %v3408_v31 = vmul.f32 %v3331_v59, %v3296_v20 }
 0x3d2   : > { %v3297_v0 = vmax.f32 %v3207_v48, %v3281_v52  ;;  %v3212_v36 = vadd.f32 %v4025_v40, %v3068_v56  ;;  %v4026_v11 = vpop.f32.mrb[86].mxu0 }
 0x3d3   : > { %v4027_v44 = vpop.f32.mrb[87].mxu0 }
 0x3d4   : > { %v3409_v14 = vmul.f32 %v3336_v35, %v3297_v0  ;;  %v3282_v43 = vmul.f32 0.2, %v3212_v36  ;;  %v4028_v57 = vadd.f32 %v4027_v44, %v4026_v11  ;;  %v3376_v11 = vpop.permute.xlu0 %3375 }
 0x3d6   : > { %v3424_v26 = vadd.f32 %v3409_v14, %v3408_v31  ;;  %v3298_v25 = vmax.f32 %v3212_v36, %v3282_v43  ;;  %v3217_v46 = vadd.f32 %v4028_v57, %v3073_v21  ;;  %v4029_v28 = vpop.f32.mrb[88].mxu0 }
 0x3d7   : > { %v4030_v12 = vpop.f32.mrb[89].mxu0 }
 0x3d8   : > { %v3410_v6 = vmul.f32 %v3341_v27, %v3298_v25  ;;  %v3283_v39 = vmul.f32 0.2, %v3217_v46  ;;  %v4031_v22 = vadd.f32 %v4030_v12, %v4029_v28 }
 0x3da   : > { %v3425_v51 = vadd.f32 %v3424_v26, %v3410_v6  ;;  %v3299_v55 = vmax.f32 %v3217_v46, %v3283_v39  ;;  %v3222_v13 = vadd.f32 %v4031_v22, %v3078_v17  ;;  %v4032_v23 = vpop.f32.mrb[90].mxu0  ;;  %v3381_v6 = vpop.permute.xlu0 %3380 }
 0x3db   : > { %v4033_v10 = vpop.f32.mrb[91].mxu0 }
 0x3dc   : > { %v3411_v3 = vmul.f32 %v3346_v16, %v3299_v55  ;;  %v3284_v37 = vmul.f32 0.2, %v3222_v13  ;;  %v4034_v42 = vadd.f32 %v4033_v10, %v4032_v23 }
 0x3de   : > { %v3426_v50 = vadd.f32 %v3425_v51, %v3411_v3  ;;  %v3300_v19 = vmax.f32 %v3222_v13, %v3284_v37  ;;  %v3227_v45 = vadd.f32 %v4034_v42, %v3083_v54  ;;  %v4035_v4 = vpop.f32.mrb[92].mxu0 }
 0x3df   : > { %v4036_v30 = vpop.f32.mrb[93].mxu0 }
 0x3e0   : > { %v3412_v34 = vmul.f32 %v3351_v32, %v3300_v19  ;;  %v3285_v58 = vmul.f32 0.2, %v3227_v45  ;;  %v4037_v47 = vadd.f32 %v4036_v30, %v4035_v4  ;;  %v3386_v19 = vpop.permute.xlu0 %3385 }
 0x3e2   : > { %v3427_v5 = vadd.f32 %v3426_v50, %v3412_v34  ;;  %v3301_v56 = vmax.f32 %v3227_v45, %v3285_v58  ;;  %v3232_v21 = vadd.f32 %v4037_v47, %v3088_v49  ;;  %v4038_v17 = vpop.f32.mrb[94].mxu0  ;;  %v3118_v49 = vpop.permute.xlu1 %3117 }
 0x3e3   : > { %v4039_v59 = vpop.f32.mrb[95].mxu0 }
 0x3e4   : > { %v3413_v35 = vmul.f32 %v3356_v60, %v3301_v56  ;;  %v3286_v27 = vmul.f32 0.2, %v3232_v21  ;;  %v4040_v15 = vadd.f32 %v4039_v59, %v4038_v17 }
 0x3e6   : > { %v3428_v8 = vadd.f32 %v3427_v5, %v3413_v35  ;;  %v3302_v16 = vmax.f32 %v3232_v21, %v3286_v27  ;;  %v3237_v18 = vadd.f32 %v4040_v15, %v3093_v33  ;;  %v4041_v54 = vpop.f32.mrb[96].mxu0  ;;  %v3123_v25 = vpop.permute.xlu1 %3122 }
 0x3e7   : > { %v4042_v29 = vpop.f32.mrb[97].mxu0  ;;  %v3391_v35 = vpop.permute.xlu0 %3390 }
 0x3e8   : > { %v3414_v62 = vmul.f32 %v3361_v61, %v3302_v16  ;;  %v3287_v24 = vmul.f32 0.2, %v3237_v18  ;;  %v4043_v48 = vadd.f32 %v4042_v29, %v4041_v54 }
 0x3ea   : > { %v3429_v38 = vadd.f32 %v3428_v8, %v3414_v62  ;;  %v3303_v32 = vmax.f32 %v3237_v18, %v3287_v24  ;;  %v3242_v7 = vadd.f32 %v4043_v48, %v3098_v1  ;;  %v4044_v20 = vpop.f32.mrb[98].mxu0 }
 0x3eb   : > { %v4045_v52 = vpop.f32.mrb[99].mxu0 }
 0x3ec   : > { %v3415_v40 = vmul.f32 %v3366_v63, %v3303_v32  ;;  %v3288_v0 = vmul.f32 0.2, %v3242_v7  ;;  %v4046_v36 = vadd.f32 %v4045_v52, %v4044_v20 }
 0x3ee   : > { %v3430_v44 = vadd.f32 %v3429_v38, %v3415_v40  ;;  %v3304_v31 = vmax.f32 %v3242_v7, %v3288_v0  ;;  %v3247_v14 = vadd.f32 %v4046_v36, %v3103_v41  ;;  %v4047_v33 = vpop.f32.mrb[100].mxu0  ;;  %v3128_v41 = vpop.permute.xlu1 %3127 }
 0x3ef   : > { %v4048_v43 = vpop.f32.mrb[101].mxu0 }
 0x3f0   : > { %v3416_v57 = vmul.f32 %v3371_v2, %v3304_v31  ;;  %v3289_v60 = vmul.f32 0.2, %v3247_v14  ;;  %v4049_v26 = vadd.f32 %v4048_v43, %v4047_v33 }
 0x3f2   : > { %v3431_v46 = vadd.f32 %v3430_v44, %v3416_v57  ;;  %v3305_v28 = vmax.f32 %v3247_v14, %v3289_v60  ;;  %v3252_v12 = vadd.f32 %v4049_v26, %v3108_v53  ;;  %v4050_v1 = vpop.f32.mrb[102].mxu0  ;;  %v3133_v5 = vpop.permute.xlu1 %3132 }
 0x3f3   : > { %v4051_v39 = vpop.f32.mrb[103].mxu0 }
 0x3f4   : > { %v3417_v22 = vmul.f32 %v3376_v11, %v3305_v28  ;;  %v3290_v51 = vmul.f32 0.2, %v3252_v12  ;;  %v4052_v55 = vadd.f32 %v4051_v39, %v4050_v1 }
 0x3f6   : > { %v3432_v13 = vadd.f32 %v3431_v46, %v3417_v22  ;;  %v3306_v23 = vmax.f32 %v3252_v12, %v3290_v51  ;;  %v3257_v61 = vadd.f32 %v4052_v55, %v3113_v9  ;;  %v4053_v10 = vpop.f32.mrb[104].mxu0  ;;  %v3396_v29 = vpop.permute.xlu1 %3395 }
 0x3f7   : > { %v4054_v3 = vpop.f32.mrb[105].mxu0 }
 0x3f8   : > { %v3418_v37 = vmul.f32 %v3381_v6, %v3306_v23  ;;  %v3291_v42 = vmul.f32 0.2, %v3257_v61  ;;  %v4055_v50 = vadd.f32 %v4054_v3, %v4053_v10 }
 0x3fa   : > { %v3433_v45 = vadd.f32 %v3432_v13, %v3418_v37  ;;  %v3307_v4 = vmax.f32 %v3257_v61, %v3291_v42  ;;  %v3262_v30 = vadd.f32 %v4055_v50, %v3118_v49  ;;  %v4056_v53 = vpop.f32.mrb[106].mxu0  ;;  %v3401_v49 = vpop.permute.xlu0 %3400 }
 0x3fb   : > { %v4057_v34 = vpop.f32.mrb[107].mxu0  ;;  %v3406_v11 = vpop.permute.xlu1 %3405 }
 0x3fc   : > { %v3419_v58 = vmul.f32 %v3386_v19, %v3307_v4  ;;  %v3292_v47 = vmul.f32 0.2, %v3262_v30  ;;  %v4058_v63 = vadd.f32 %v4057_v34, %v4056_v53 }
 0x3fe   : > { %v3434_v56 = vadd.f32 %v3433_v45, %v3419_v58  ;;  %v3308_v21 = vmax.f32 %v3262_v30, %v3292_v47  ;;  %v3267_v17 = vadd.f32 %v4058_v63, %v3123_v25  ;;  %v4059_v59 = vpop.f32.mrb[108].mxu0  ;;  %v3449_v60 = vpop.permute.xlu0 %3448  ;;  %v6368_v25 = vld [vmem:[#allocation9_spill] sm:$0xff] }
 0x3ff   : > { %v4060_v27 = vpop.f32.mrb[109].mxu0  ;;  %v6369_v46 = vsub.s32 0, %v6368_v25 }
 0x400   : > { %v3420_v15 = vmul.f32 %v3391_v35, %v3308_v21  ;;  %v3293_v9 = vmul.f32 0.2, %v3267_v17  ;;  %v4061_v8 = vadd.f32 %v4060_v27, %v4059_v59 }
 0x401   : > { %v3454_v28 = vrot.slane %v3449_v60, %v6369_v46 }
 0x402   : > { %v3435_v16 = vadd.f32 %v3434_v56, %v3420_v15  ;;  %v3309_v18 = vmax.f32 %v3267_v17, %v3293_v9  ;;  %v3272_v54 = vadd.f32 %v4061_v8, %v3128_v41  ;;  %v4062_v2 = vpop.f32.mrb[110].mxu0 }
 0x403   : > { %v4063_v62 = vpop.f32.mrb[111].mxu0 }
 0x404   : > { %v3421_v24 = vmul.f32 %v3396_v29, %v3309_v18  ;;  %v3294_v48 = vmul.f32 0.2, %v3272_v54  ;;  %v4064_v38 = vadd.f32 %v4063_v62, %v4062_v2 }
 0x406   : > { %v3436_v32 = vadd.f32 %v3435_v16, %v3421_v24  ;;  %v3310_v7 = vmax.f32 %v3272_v54, %v3294_v48  ;;  %v3277_v20 = vadd.f32 %v4064_v38, %v3133_v5 }
 0x408   : > { %v3422_v52 = vmul.f32 %v3401_v49, %v3310_v7  ;;  %v3295_v40 = vmul.f32 0.2, %v3277_v20 }
 0x40a   : > { %v3437_v0 = vadd.f32 %v3436_v32, %v3422_v52  ;;  %v3311_v36 = vmax.f32 %v3277_v20, %v3295_v40 }
 0x40c   : > { %v3423_v44 = vmul.f32 %v3406_v11, %v3311_v36 }
 0x40e   : > { %v3438_v31 = vadd.f32 %v3437_v0, %v3423_v44 }
 0x410   : > { %v3439_v14 = vrot.slane %v3438_v31, 4 }
 0x412   : > { %v3440_v33 = vadd.f32 %v3439_v14, %v3438_v31 }
 0x414   : > { %v3441_v43 = vrot.slane %v3440_v33, 2 }
 0x416   : > { %v3442_v57 = vadd.f32 %v3441_v43, %v3440_v33 }
 0x418   : > { %v3443_v26 = vrot.slane %v3442_v57, 1 }
 0x41a   : > { %v3444_v12 = vadd.f32 %v3443_v26, %v3442_v57 }
 0x41c   : > { %v3455_v1 = vadd.f32 %v3454_v28, %v3444_v12 }
 0x41e   : > { %v3766_v6 = vmul.f32 -1.442695, %v3455_v1 }
 0x420   : > { %4531 = vpow2.f32 %v3766_v6 }
 0x42a   : > { %v4532_v39 = vpop.eup %4531 }
 0x42b   : > { %v3459_v22 = vadd.f32 1.0, %v4532_v39 }
 0x42d   : > { %4533 = vrcp.f32 %v3459_v22 }
 0x437   : > { %v4534_v51 = vpop.eup %4533 }
 0x438   : > { %3462 = vst [vmem:[%s515_s13] sm:$0x1] %v4534_v51 }
 0x439   : > { %4549 = shalt.err (!%p4546_p7)
}
 0x43a   : > { %s4550_s18 = scalar_lea.hbm %s6297_s23, 16  ;;  %s4554_s13 = scalar_lea.hbm %s6352_s11, 32 }
 0x43b   : > { %p4551_p10 = scmp.ne.s32.totalorder %s6297_s23, %s4550_s18  ;;  %p4555_p13 = scmp.lt.u32.totalorder %s6297_s23, %s6352_s11 }
 0x43c   : > { %p4556_p0 = scmp.lt.u32.totalorder %s4554_s13, %s4550_s18  ;;  %p4558_p2 = scmp.lt.u32.totalorder %s4550_s18, %s6297_s23 }
 0x43d   : > { %p4552_p11 = pnand %p4551_p10, %p4706_p6 }
 0x43e   : > { %p4557_p1 = por %p4556_p0, %p4555_p13 }
 0x43f   : > { %p4553_p12 = pneg %p4552_p11 }
 0x440   : > { %p4559_p3 = por %p4558_p2, %p4557_p1 }
 0x442   : > { %p4560_p4 = pnand %p4559_p3, %p4553_p12 }
 0x444   : > { %4563 = shalt.err (!%p4560_p4)
}
 0x445   : > { %4473 = dma.vmem_to_hbm [thread:$0]  (%p4706_p6), %s6299_s14, 16, %s6297_s23, %s3464_s25  }
 0x446 PF: > { %s3488_s0 = sand.u32 1, %s4586_s19   ;;  %p4476_p5 = pnand %p3551_p9, %p4710_p8 }
 0x447   : > { %s3489_s10 = scalar_lea.sflag [#allocation5], %s3488_s0 }
 0x448   : > { %4581 = dma.done.wait (!%p4476_p5), %s3489_s10, 16  }
 0x449   : > { %4583 = vsyncadd (!%p4476_p5), %s3489_s10, 4294967280  ;;  %p23_p7 = scmp.ge.s32.totalorder %s4692_s24, 4   ;;  %s6370_s19 = smov %s4590_s20 }
 0x44a   : > { %s6371_s20 = smov %s4594_s21  ;;  %s6372_s21 = smov %s4704_s27 }
 0x44b   : > { %s6373_s22 = smov %s4692_s24  ;;  %25 = sbr.rel (!%p23_p7) target bundleno = 6 (0x6), region = 167 }
 0x452   :  { %3493 = vsyncpa [#allocation5], 1 }
 0x453   :  { %3495 = vsyncpa [#allocation5 + $0x1], 1 }

</bundles_post_ra>
